<compile_context>
chip_gen: v6e
topology: v6e:2x2x1
jax: 0.10.0
libtpu: 0.0.40
codegen_flags: <defaults>
</compile_context>

<pallas_src>
import functools

import jax
import jax.numpy as jnp
from jax.experimental import pallas as pl
from jax.experimental.pallas import tpu as pltpu

L_IN = 28                 # Linear(1536, 64) => 64 ch * 24 positions, 24 = 28 - 4
P_PAD = 32                # positions padded to a multiple of 8 (sublane aligned)
N_CONVS = 4
L_OUT = L_IN - N_CONVS    # 24 valid positions feeding the flatten
C1_OUT = 32               # real conv1 channels (padded to 64 lanes in-kernel)
C_OUT = 64                # channels after conv2..conv4
BN_EPS = 1e-5
MLP_W = 128               # padded lane width of the small MLP layers

# (w_row_start, w_row_end, bias_row) inside the packed MLP slab; every section
# start is a multiple of 8 so all weight reads are sublane-aligned.
_MLP_SECTS = ((0, 64, 64), (72, 200, 200), (208, 336, 336), (344, 472, 472))
MLP_ROWS = 480


def _round_up(n, m):
    return ((n + m - 1) // m) * m


# ----------------------------------------------------------------------------
# Fused forward kernel (one batch tile per grid step).
#   x_ref : (P_PAD*B_T, 1)  row = p*B_T + b  (position-major within the tile)
#   c1_ref: (3, 64)         conv1 taps + bias, 32 real channels in lanes 0..31
#   cN_ref: (129, 64)       fused two-tap weight (128, 64) + bias row (BN of
#                           the previous layer folded in offline)
#   d1_ref: (1537, 64)      dense 1536->64: 24 x (64,64) per-position blocks
#                           (channel-major flatten + BN4 folded) + bias row
#   mlp_ref: (480, 128)     dense1/dense2/dense3/cls, 128-lane zero-padded
#   o_ref : (B_T, 1)
# ----------------------------------------------------------------------------
def cnn20_kernel(x_ref, c1_ref, c2_ref, c3_ref, c4_ref, d1_ref, mlp_ref, o_ref,
                 *, batch_tile):
    bt = batch_tile
    x = x_ref[...]                                       # (P_PAD*bt, 1)

    # ---- conv1 (Cin=1): two-tap broadcast outer product on the VPU.
    # Shifting by one position = shifting by bt rows (bt % 8 == 0), so both
    # slices below are 8-aligned views (no relayout copies).
    w00 = c1_ref[0:1, :]
    w01 = c1_ref[1:2, :]
    b1 = c1_ref[2:3, :]
    m = x.shape[0] - bt
    h = jnp.maximum(x[:m, :] * w00 + x[bt:, :] * w01 + b1, 0.0)   # (31*bt, 64)

    # ---- conv2..conv4: fused two-tap matmul (K = 128) + bias + relu.
    # The previous layer's BN scale/shift is folded into the weight slab.
    for c_ref in (c2_ref, c3_ref, c4_ref):
        m = h.shape[0] - bt
        lhs = jnp.concatenate([h[:m, :], h[bt:, :]], axis=1)      # (m, 128)
        w = c_ref[0:2 * C_OUT, :]
        b = c_ref[2 * C_OUT:2 * C_OUT + 1, :]
        h = jnp.maximum(jnp.dot(lhs, w, preferred_element_type=jnp.float32) + b,
                        0.0)

    # ---- dense 1536 -> 64.  torch.flatten's channel-major order and BN4 are
    # pre-folded into d1_ref; contract as 24 aligned per-position matmuls
    # (rows l*bt .. (l+1)*bt are exactly position l of every batch element).
    accs = [jnp.zeros((bt, C_OUT), jnp.float32) for _ in range(4)]
    for l in range(L_OUT):
        accs[l % 4] = accs[l % 4] + jnp.dot(
            h[l * bt:(l + 1) * bt, :],
            d1_ref[l * C_OUT:(l + 1) * C_OUT, :],
            preferred_element_type=jnp.float32)
    d1b = d1_ref[L_OUT * C_OUT:L_OUT * C_OUT + 1, :]
    z = jnp.maximum(accs[0] + accs[1] + accs[2] + accs[3] + d1b, 0.0)  # (bt,64)

    # ---- dense1 (64->100), dense2 (100->50), dense3 (50->25), cls (25->1).
    # All padded to 128 lanes offline; the zero rows/cols are inert.
    for idx, (ws, we, br) in enumerate(_MLP_SECTS):
        w = mlp_ref[ws:we, :]
        b = mlp_ref[br:br + 1, :]
        z = jnp.dot(z, w, preferred_element_type=jnp.float32) + b
        if idx < len(_MLP_SECTS) - 1:
            z = jnp.maximum(z, 0.0)

    # ---- numerically stable sigmoid (EUP tanh) on the real logit (lane 0).
    o_ref[...] = 0.5 * (1.0 + jnp.tanh(0.5 * z[:, 0:1]))


# ----------------------------------------------------------------------------
# Wrapper: 1-D batch grid, weights fetched once (constant index_map).
# ----------------------------------------------------------------------------
def cnn20_forward(x_ncl, kernel_args, *, batch_tile=None):
    B = x_ncl.shape[0]
    assert x_ncl.shape[1:] == (1, L_IN)
    if batch_tile is None:
        # Modest default: the (rows, 1) x block pads to 128 lanes in VMEM, so
        # keep it small-ish; safe for v7x's 64 MiB VMEM as well.
        batch_tile = min(128, _round_up(B, 8))
    bt = _round_up(min(batch_tile, _round_up(B, 8)), 8)
    num_tiles = pl.cdiv(B, bt)
    b_pad = num_tiles * bt

    # (B, 1, 28) -> per-tile position-major rows: row = tile*32*bt + p*bt + b.
    # Positions are zero-padded 28 -> 32 and batch to a multiple of bt, so all
    # in-kernel slices are 8-sublane aligned. (Padded rows are finite junk and
    # are sliced away below.)
    xb = x_ncl.reshape(B, L_IN)
    xb = jnp.pad(xb, ((0, b_pad - B), (0, P_PAD - L_IN)))
    xk = (xb.reshape(num_tiles, bt, P_PAD)
            .transpose(0, 2, 1)
            .reshape(num_tiles * P_PAD * bt, 1))

    in_specs = [pl.BlockSpec((P_PAD * bt, 1), lambda i: (i, 0))]
    in_specs += [pl.BlockSpec(a.shape, lambda i: (0, 0)) for a in kernel_args]

    out = pl.pallas_call(
        functools.partial(cnn20_kernel, batch_tile=bt),
        out_shape=jax.ShapeDtypeStruct((b_pad, 1), jnp.float32),
        grid=(num_tiles,),
        in_specs=in_specs,
        out_specs=pl.BlockSpec((bt, 1), lambda i: (i, 0)),
        compiler_params=pltpu.CompilerParams(
            dimension_semantics=("parallel",),
            vmem_limit_bytes=32 * 1024 * 1024),
    )(xk, *kernel_args)
    return out[:B]


# ----------------------------------------------------------------------------
# Synthetic parameters in PyTorch layout, packed to kernel layout offline.
# ----------------------------------------------------------------------------
def init_params(key):
    conv_dims = [(1, 32), (32, 64), (64, 64), (64, 64)]
    dense_dims = [(1536, 64), (64, 100), (100, 50), (50, 25), (25, 1)]
    keys = iter(jax.random.split(key, 6 * len(conv_dims) + 2 * len(dense_dims)))
    convs = []
    for cin, cout in conv_dims:
        convs.append(dict(
            w=0.1 * jax.random.normal(next(keys), (cout, cin, 2), jnp.float32),
            b=0.1 * jax.random.normal(next(keys), (cout,), jnp.float32),
            gamma=1.0 + 0.1 * jax.random.normal(next(keys), (cout,), jnp.float32),
            beta=0.1 * jax.random.normal(next(keys), (cout,), jnp.float32),
            mean=0.1 * jax.random.normal(next(keys), (cout,), jnp.float32),
            var=1.0 + 0.1 * jax.random.uniform(next(keys), (cout,), jnp.float32)))
    dense = []
    for fin, fout in dense_dims:
        dense.append(dict(
            w=0.1 * jax.random.normal(next(keys), (fout, fin), jnp.float32),
            b=0.1 * jax.random.normal(next(keys), (fout,), jnp.float32)))
    return dict(convs=convs, dense=dense)


def pack_params(params):
    """PyTorch-layout params -> 6 kernel slabs (all layout/BN folding offline)."""
    convs, dense = params["convs"], params["dense"]

    def bn_fold(layer):
        scale = layer["gamma"] / jnp.sqrt(layer["var"] + BN_EPS)
        shift = layer["beta"] - layer["mean"] * scale
        return scale, shift

    # conv1: taps + bias, 32 real channels padded to 64 lanes (phantoms stay 0).
    w1, b1 = convs[0]["w"], convs[0]["b"]                  # (32, 1, 2), (32,)
    c1 = jnp.zeros((3, C_OUT), jnp.float32)
    c1 = c1.at[0, :C1_OUT].set(w1[:, 0, 0])
    c1 = c1.at[1, :C1_OUT].set(w1[:, 0, 1])
    c1 = c1.at[2, :C1_OUT].set(b1)

    # conv2..conv4: fused two-tap (2*cin, 64) weights with the PREVIOUS layer's
    # BN folded in: w' = diag(scale_prev) @ w, b' = b + (w0 + w1) @ shift_prev.
    conv_slabs = []
    for i in (1, 2, 3):
        w, b = convs[i]["w"], convs[i]["b"]                # (64, cin, 2), (64,)
        cin = w.shape[1]
        scale_p, shift_p = bn_fold(convs[i - 1])
        w0 = (w[:, :, 0] * scale_p[None, :]).T             # (cin, 64)
        w1_ = (w[:, :, 1] * scale_p[None, :]).T
        b_eff = b + (w[:, :, 0] + w[:, :, 1]) @ shift_p
        slab = jnp.zeros((2 * C_OUT + 1, C_OUT), jnp.float32)
        slab = slab.at[:cin, :].set(w0)                    # tap t   (lanes 0..63)
        slab = slab.at[C_OUT:C_OUT + cin, :].set(w1_)      # tap t+1 (lanes 64..127)
        slab = slab.at[2 * C_OUT, :].set(b_eff)
        conv_slabs.append(slab)

    # dense (1536 -> 64): fold the channel-major flatten AND BN4 into a
    # (24*64 + 1, 64) slab:  d1[l*64 + c, o] = scale4[c] * W[o, c*24 + l].
    scale4, shift4 = bn_fold(convs[3])
    W = dense[0]["w"]                                      # (64, 1536)
    Wp = W.T.reshape(C_OUT, L_OUT, C_OUT).transpose(1, 0, 2)   # (24, 64, 64)
    Wp_eff = Wp * scale4[None, :, None]
    d1b_eff = dense[0]["b"] + jnp.einsum("lco,c->o", Wp, shift4)
    d1 = jnp.concatenate([Wp_eff.reshape(L_OUT * C_OUT, C_OUT),
                          d1b_eff.reshape(1, C_OUT)], axis=0)  # (1537, 64)

    # small MLP slab: (W.T, b) units zero-padded to 128 lanes / 8-aligned rows.
    mlp = jnp.zeros((MLP_ROWS, MLP_W), jnp.float32)
    for (ws, _we, br), layer in zip(_MLP_SECTS, dense[1:]):
        wt = layer["w"].T                                  # (fin, fout)
        fin, fout = wt.shape
        mlp = mlp.at[ws:ws + fin, :fout].set(wt)
        mlp = mlp.at[br, :fout].set(layer["b"])

    return (c1, conv_slabs[0], conv_slabs[1], conv_slabs[2], d1, mlp)


if __name__ == "__main__":
    key = jax.random.PRNGKey(0)
    k_x, k_p = jax.random.split(key)
    # PyTorch (N, C, L) input; L must be 28 so that 64 * 24 == 1536.
    x = jax.random.normal(k_x, (2, 1, L_IN), jnp.float32)
    params = init_params(k_p)
    kargs = pack_params(params)

    fwd = jax.jit(cnn20_forward)
    out = jax.block_until_ready(fwd(x, kargs))

    assert out.shape == (2, 1)
    assert bool(jnp.all(jnp.isfinite(out)))
    assert bool(jnp.all((out >= 0.0) & (out <= 1.0)))
    print("KERNEL_OK")
</pallas_src>

<mosaic_0001>
module attributes {stable_mosaic.version = 11 : i64} {
  func.func @cnn20_kernel(%arg0: i32, %arg1: memref<256x1xf32, #tpu.memory_space<vmem>>, %arg2: memref<3x64xf32, #tpu.memory_space<vmem>>, %arg3: memref<129x64xf32, #tpu.memory_space<vmem>>, %arg4: memref<129x64xf32, #tpu.memory_space<vmem>>, %arg5: memref<129x64xf32, #tpu.memory_space<vmem>>, %arg6: memref<1537x64xf32, #tpu.memory_space<vmem>>, %arg7: memref<480x128xf32, #tpu.memory_space<vmem>>, %arg8: memref<8x1xf32, #tpu.memory_space<vmem>>) attributes {dimension_semantics = [#tpu.dimension_semantics<parallel>], iteration_bounds = array<i64: 1>, scalar_prefetch = 0 : i64, scratch_operands = 0 : i64, tpu.core_type = #tpu.core_type<tc>, window_params = [{transform_indices = @transform_0, window_bounds = array<i64: 256, 1>}, {pipeline_mode = #tpu.pipeline_mode<synchronous>, transform_indices = @transform_1, window_bounds = array<i64: 3, 64>}, {pipeline_mode = #tpu.pipeline_mode<synchronous>, transform_indices = @transform_2, window_bounds = array<i64: 129, 64>}, {pipeline_mode = #tpu.pipeline_mode<synchronous>, transform_indices = @transform_3, window_bounds = array<i64: 129, 64>}, {pipeline_mode = #tpu.pipeline_mode<synchronous>, transform_indices = @transform_4, window_bounds = array<i64: 129, 64>}, {pipeline_mode = #tpu.pipeline_mode<synchronous>, transform_indices = @transform_5, window_bounds = array<i64: 1537, 64>}, {pipeline_mode = #tpu.pipeline_mode<synchronous>, transform_indices = @transform_6, window_bounds = array<i64: 480, 128>}, {transform_indices = @transform_7, window_bounds = array<i64: 8, 1>}]} {
    %c0 = arith.constant 0 : index
    %c0_0 = arith.constant 0 : index
    %0 = vector.load %arg1[%c0, %c0_0] : memref<256x1xf32, #tpu.memory_space<vmem>>, vector<256x1xf32>
    %c0_1 = arith.constant 0 : index
    %c0_2 = arith.constant 0 : index
    %1 = vector.load %arg2[%c0_1, %c0_2] : memref<3x64xf32, #tpu.memory_space<vmem>>, vector<1x64xf32>
    %c1 = arith.constant 1 : index
    %c0_3 = arith.constant 0 : index
    %2 = vector.load %arg2[%c1, %c0_3] : memref<3x64xf32, #tpu.memory_space<vmem>>, vector<1x64xf32>
    %c2 = arith.constant 2 : index
    %c0_4 = arith.constant 0 : index
    %3 = vector.load %arg2[%c2, %c0_4] : memref<3x64xf32, #tpu.memory_space<vmem>>, vector<1x64xf32>
    %4 = vector.extract_strided_slice %0 {offsets = [0, 0], sizes = [248, 1], strides = [1, 1]} : vector<256x1xf32> to vector<248x1xf32>
    %5 = vector.broadcast %4 : vector<248x1xf32> to vector<248x64xf32>
    %6 = vector.broadcast %1 : vector<1x64xf32> to vector<248x64xf32>
    %7 = arith.mulf %5, %6 : vector<248x64xf32>
    %8 = vector.extract_strided_slice %0 {offsets = [8, 0], sizes = [248, 1], strides = [1, 1]} : vector<256x1xf32> to vector<248x1xf32>
    %9 = vector.broadcast %8 : vector<248x1xf32> to vector<248x64xf32>
    %10 = vector.broadcast %2 : vector<1x64xf32> to vector<248x64xf32>
    %11 = arith.mulf %9, %10 : vector<248x64xf32>
    %12 = arith.addf %7, %11 : vector<248x64xf32>
    %13 = vector.broadcast %3 : vector<1x64xf32> to vector<248x64xf32>
    %14 = arith.addf %12, %13 : vector<248x64xf32>
    %cst = arith.constant 0.000000e+00 : f32
    %15 = vector.broadcast %cst : f32 to vector<248x64xf32>
    %16 = arith.maximumf %14, %15 : vector<248x64xf32>
    %17 = vector.extract_strided_slice %16 {offsets = [0, 0], sizes = [240, 64], strides = [1, 1]} : vector<248x64xf32> to vector<240x64xf32>
    %18 = vector.extract_strided_slice %16 {offsets = [8, 0], sizes = [240, 64], strides = [1, 1]} : vector<248x64xf32> to vector<240x64xf32>
    %19 = tpu.concatenate %17, %18 in 1 : vector<240x64xf32>, vector<240x64xf32> -> vector<240x128xf32>
    %c0_5 = arith.constant 0 : index
    %c0_6 = arith.constant 0 : index
    %20 = vector.load %arg3[%c0_5, %c0_6] : memref<129x64xf32, #tpu.memory_space<vmem>>, vector<128x64xf32>
    %c128 = arith.constant 128 : index
    %c0_7 = arith.constant 0 : index
    %21 = vector.load %arg3[%c128, %c0_7] : memref<129x64xf32, #tpu.memory_space<vmem>>, vector<1x64xf32>
    %cst_8 = arith.constant dense<0.000000e+00> : vector<240x64xf32>
    %22 = tpu.matmul %19, %20, %cst_8 {dimension_numbers = #tpu.dot_dimension_numbers<[1], [0], [0], [1], [0, 0, 1, 1], [], []>} : vector<240x128xf32>, vector<128x64xf32>, vector<240x64xf32> -> vector<240x64xf32>
    %23 = vector.broadcast %21 : vector<1x64xf32> to vector<240x64xf32>
    %24 = arith.addf %22, %23 : vector<240x64xf32>
    %cst_9 = arith.constant 0.000000e+00 : f32
    %25 = vector.broadcast %cst_9 : f32 to vector<240x64xf32>
    %26 = arith.maximumf %24, %25 : vector<240x64xf32>
    %27 = vector.extract_strided_slice %26 {offsets = [0, 0], sizes = [232, 64], strides = [1, 1]} : vector<240x64xf32> to vector<232x64xf32>
    %28 = vector.extract_strided_slice %26 {offsets = [8, 0], sizes = [232, 64], strides = [1, 1]} : vector<240x64xf32> to vector<232x64xf32>
    %29 = tpu.concatenate %27, %28 in 1 : vector<232x64xf32>, vector<232x64xf32> -> vector<232x128xf32>
    %c0_10 = arith.constant 0 : index
    %c0_11 = arith.constant 0 : index
    %30 = vector.load %arg4[%c0_10, %c0_11] : memref<129x64xf32, #tpu.memory_space<vmem>>, vector<128x64xf32>
    %c128_12 = arith.constant 128 : index
    %c0_13 = arith.constant 0 : index
    %31 = vector.load %arg4[%c128_12, %c0_13] : memref<129x64xf32, #tpu.memory_space<vmem>>, vector<1x64xf32>
    %cst_14 = arith.constant dense<0.000000e+00> : vector<232x64xf32>
    %32 = tpu.matmul %29, %30, %cst_14 {dimension_numbers = #tpu.dot_dimension_numbers<[1], [0], [0], [1], [0, 0, 1, 1], [], []>} : vector<232x128xf32>, vector<128x64xf32>, vector<232x64xf32> -> vector<232x64xf32>
    %33 = vector.broadcast %31 : vector<1x64xf32> to vector<232x64xf32>
    %34 = arith.addf %32, %33 : vector<232x64xf32>
    %cst_15 = arith.constant 0.000000e+00 : f32
    %35 = vector.broadcast %cst_15 : f32 to vector<232x64xf32>
    %36 = arith.maximumf %34, %35 : vector<232x64xf32>
    %37 = vector.extract_strided_slice %36 {offsets = [0, 0], sizes = [224, 64], strides = [1, 1]} : vector<232x64xf32> to vector<224x64xf32>
    %38 = vector.extract_strided_slice %36 {offsets = [8, 0], sizes = [224, 64], strides = [1, 1]} : vector<232x64xf32> to vector<224x64xf32>
    %39 = tpu.concatenate %37, %38 in 1 : vector<224x64xf32>, vector<224x64xf32> -> vector<224x128xf32>
    %c0_16 = arith.constant 0 : index
    %c0_17 = arith.constant 0 : index
    %40 = vector.load %arg5[%c0_16, %c0_17] : memref<129x64xf32, #tpu.memory_space<vmem>>, vector<128x64xf32>
    %c128_18 = arith.constant 128 : index
    %c0_19 = arith.constant 0 : index
    %41 = vector.load %arg5[%c128_18, %c0_19] : memref<129x64xf32, #tpu.memory_space<vmem>>, vector<1x64xf32>
    %cst_20 = arith.constant dense<0.000000e+00> : vector<224x64xf32>
    %42 = tpu.matmul %39, %40, %cst_20 {dimension_numbers = #tpu.dot_dimension_numbers<[1], [0], [0], [1], [0, 0, 1, 1], [], []>} : vector<224x128xf32>, vector<128x64xf32>, vector<224x64xf32> -> vector<224x64xf32>
    %43 = vector.broadcast %41 : vector<1x64xf32> to vector<224x64xf32>
    %44 = arith.addf %42, %43 : vector<224x64xf32>
    %cst_21 = arith.constant 0.000000e+00 : f32
    %45 = vector.broadcast %cst_21 : f32 to vector<224x64xf32>
    %46 = arith.maximumf %44, %45 : vector<224x64xf32>
    %cst_22 = arith.constant 0.000000e+00 : f32
    %47 = vector.broadcast %cst_22 : f32 to vector<8x64xf32>
    %cst_23 = arith.constant 0.000000e+00 : f32
    %48 = vector.broadcast %cst_23 : f32 to vector<8x64xf32>
    %cst_24 = arith.constant 0.000000e+00 : f32
    %49 = vector.broadcast %cst_24 : f32 to vector<8x64xf32>
    %cst_25 = arith.constant 0.000000e+00 : f32
    %50 = vector.broadcast %cst_25 : f32 to vector<8x64xf32>
    %51 = vector.extract_strided_slice %46 {offsets = [0, 0], sizes = [8, 64], strides = [1, 1]} : vector<224x64xf32> to vector<8x64xf32>
    %c0_26 = arith.constant 0 : index
    %c0_27 = arith.constant 0 : index
    %52 = vector.load %arg6[%c0_26, %c0_27] : memref<1537x64xf32, #tpu.memory_space<vmem>>, vector<64x64xf32>
    %cst_28 = arith.constant dense<0.000000e+00> : vector<8x64xf32>
    %53 = tpu.matmul %51, %52, %cst_28 {dimension_numbers = #tpu.dot_dimension_numbers<[1], [0], [0], [1], [0, 0, 1, 1], [], []>} : vector<8x64xf32>, vector<64x64xf32>, vector<8x64xf32> -> vector<8x64xf32>
    %54 = arith.addf %47, %53 : vector<8x64xf32>
    %55 = vector.extract_strided_slice %46 {offsets = [8, 0], sizes = [8, 64], strides = [1, 1]} : vector<224x64xf32> to vector<8x64xf32>
    %c64 = arith.constant 64 : index
    %c0_29 = arith.constant 0 : index
    %56 = vector.load %arg6[%c64, %c0_29] : memref<1537x64xf32, #tpu.memory_space<vmem>>, vector<64x64xf32>
    %cst_30 = arith.constant dense<0.000000e+00> : vector<8x64xf32>
    %57 = tpu.matmul %55, %56, %cst_30 {dimension_numbers = #tpu.dot_dimension_numbers<[1], [0], [0], [1], [0, 0, 1, 1], [], []>} : vector<8x64xf32>, vector<64x64xf32>, vector<8x64xf32> -> vector<8x64xf32>
    %58 = arith.addf %48, %57 : vector<8x64xf32>
    %59 = vector.extract_strided_slice %46 {offsets = [16, 0], sizes = [8, 64], strides = [1, 1]} : vector<224x64xf32> to vector<8x64xf32>
    %c128_31 = arith.constant 128 : index
    %c0_32 = arith.constant 0 : index
    %60 = vector.load %arg6[%c128_31, %c0_32] : memref<1537x64xf32, #tpu.memory_space<vmem>>, vector<64x64xf32>
    %cst_33 = arith.constant dense<0.000000e+00> : vector<8x64xf32>
    %61 = tpu.matmul %59, %60, %cst_33 {dimension_numbers = #tpu.dot_dimension_numbers<[1], [0], [0], [1], [0, 0, 1, 1], [], []>} : vector<8x64xf32>, vector<64x64xf32>, vector<8x64xf32> -> vector<8x64xf32>
    %62 = arith.addf %49, %61 : vector<8x64xf32>
    %63 = vector.extract_strided_slice %46 {offsets = [24, 0], sizes = [8, 64], strides = [1, 1]} : vector<224x64xf32> to vector<8x64xf32>
    %c192 = arith.constant 192 : index
    %c0_34 = arith.constant 0 : index
    %64 = vector.load %arg6[%c192, %c0_34] : memref<1537x64xf32, #tpu.memory_space<vmem>>, vector<64x64xf32>
    %cst_35 = arith.constant dense<0.000000e+00> : vector<8x64xf32>
    %65 = tpu.matmul %63, %64, %cst_35 {dimension_numbers = #tpu.dot_dimension_numbers<[1], [0], [0], [1], [0, 0, 1, 1], [], []>} : vector<8x64xf32>, vector<64x64xf32>, vector<8x64xf32> -> vector<8x64xf32>
    %66 = arith.addf %50, %65 : vector<8x64xf32>
    %67 = vector.extract_strided_slice %46 {offsets = [32, 0], sizes = [8, 64], strides = [1, 1]} : vector<224x64xf32> to vector<8x64xf32>
    %c256 = arith.constant 256 : index
    %c0_36 = arith.constant 0 : index
    %68 = vector.load %arg6[%c256, %c0_36] : memref<1537x64xf32, #tpu.memory_space<vmem>>, vector<64x64xf32>
    %cst_37 = arith.constant dense<0.000000e+00> : vector<8x64xf32>
    %69 = tpu.matmul %67, %68, %cst_37 {dimension_numbers = #tpu.dot_dimension_numbers<[1], [0], [0], [1], [0, 0, 1, 1], [], []>} : vector<8x64xf32>, vector<64x64xf32>, vector<8x64xf32> -> vector<8x64xf32>
    %70 = arith.addf %54, %69 : vector<8x64xf32>
    %71 = vector.extract_strided_slice %46 {offsets = [40, 0], sizes = [8, 64], strides = [1, 1]} : vector<224x64xf32> to vector<8x64xf32>
    %c320 = arith.constant 320 : index
    %c0_38 = arith.constant 0 : index
    %72 = vector.load %arg6[%c320, %c0_38] : memref<1537x64xf32, #tpu.memory_space<vmem>>, vector<64x64xf32>
    %cst_39 = arith.constant dense<0.000000e+00> : vector<8x64xf32>
    %73 = tpu.matmul %71, %72, %cst_39 {dimension_numbers = #tpu.dot_dimension_numbers<[1], [0], [0], [1], [0, 0, 1, 1], [], []>} : vector<8x64xf32>, vector<64x64xf32>, vector<8x64xf32> -> vector<8x64xf32>
    %74 = arith.addf %58, %73 : vector<8x64xf32>
    %75 = vector.extract_strided_slice %46 {offsets = [48, 0], sizes = [8, 64], strides = [1, 1]} : vector<224x64xf32> to vector<8x64xf32>
    %c384 = arith.constant 384 : index
    %c0_40 = arith.constant 0 : index
    %76 = vector.load %arg6[%c384, %c0_40] : memref<1537x64xf32, #tpu.memory_space<vmem>>, vector<64x64xf32>
    %cst_41 = arith.constant dense<0.000000e+00> : vector<8x64xf32>
    %77 = tpu.matmul %75, %76, %cst_41 {dimension_numbers = #tpu.dot_dimension_numbers<[1], [0], [0], [1], [0, 0, 1, 1], [], []>} : vector<8x64xf32>, vector<64x64xf32>, vector<8x64xf32> -> vector<8x64xf32>
    %78 = arith.addf %62, %77 : vector<8x64xf32>
    %79 = vector.extract_strided_slice %46 {offsets = [56, 0], sizes = [8, 64], strides = [1, 1]} : vector<224x64xf32> to vector<8x64xf32>
    %c448 = arith.constant 448 : index
    %c0_42 = arith.constant 0 : index
    %80 = vector.load %arg6[%c448, %c0_42] : memref<1537x64xf32, #tpu.memory_space<vmem>>, vector<64x64xf32>
    %cst_43 = arith.constant dense<0.000000e+00> : vector<8x64xf32>
    %81 = tpu.matmul %79, %80, %cst_43 {dimension_numbers = #tpu.dot_dimension_numbers<[1], [0], [0], [1], [0, 0, 1, 1], [], []>} : vector<8x64xf32>, vector<64x64xf32>, vector<8x64xf32> -> vector<8x64xf32>
    %82 = arith.addf %66, %81 : vector<8x64xf32>
    %83 = vector.extract_strided_slice %46 {offsets = [64, 0], sizes = [8, 64], strides = [1, 1]} : vector<224x64xf32> to vector<8x64xf32>
    %c512 = arith.constant 512 : index
    %c0_44 = arith.constant 0 : index
    %84 = vector.load %arg6[%c512, %c0_44] : memref<1537x64xf32, #tpu.memory_space<vmem>>, vector<64x64xf32>
    %cst_45 = arith.constant dense<0.000000e+00> : vector<8x64xf32>
    %85 = tpu.matmul %83, %84, %cst_45 {dimension_numbers = #tpu.dot_dimension_numbers<[1], [0], [0], [1], [0, 0, 1, 1], [], []>} : vector<8x64xf32>, vector<64x64xf32>, vector<8x64xf32> -> vector<8x64xf32>
    %86 = arith.addf %70, %85 : vector<8x64xf32>
    %87 = vector.extract_strided_slice %46 {offsets = [72, 0], sizes = [8, 64], strides = [1, 1]} : vector<224x64xf32> to vector<8x64xf32>
    %c576 = arith.constant 576 : index
    %c0_46 = arith.constant 0 : index
    %88 = vector.load %arg6[%c576, %c0_46] : memref<1537x64xf32, #tpu.memory_space<vmem>>, vector<64x64xf32>
    %cst_47 = arith.constant dense<0.000000e+00> : vector<8x64xf32>
    %89 = tpu.matmul %87, %88, %cst_47 {dimension_numbers = #tpu.dot_dimension_numbers<[1], [0], [0], [1], [0, 0, 1, 1], [], []>} : vector<8x64xf32>, vector<64x64xf32>, vector<8x64xf32> -> vector<8x64xf32>
    %90 = arith.addf %74, %89 : vector<8x64xf32>
    %91 = vector.extract_strided_slice %46 {offsets = [80, 0], sizes = [8, 64], strides = [1, 1]} : vector<224x64xf32> to vector<8x64xf32>
    %c640 = arith.constant 640 : index
    %c0_48 = arith.constant 0 : index
    %92 = vector.load %arg6[%c640, %c0_48] : memref<1537x64xf32, #tpu.memory_space<vmem>>, vector<64x64xf32>
    %cst_49 = arith.constant dense<0.000000e+00> : vector<8x64xf32>
    %93 = tpu.matmul %91, %92, %cst_49 {dimension_numbers = #tpu.dot_dimension_numbers<[1], [0], [0], [1], [0, 0, 1, 1], [], []>} : vector<8x64xf32>, vector<64x64xf32>, vector<8x64xf32> -> vector<8x64xf32>
    %94 = arith.addf %78, %93 : vector<8x64xf32>
    %95 = vector.extract_strided_slice %46 {offsets = [88, 0], sizes = [8, 64], strides = [1, 1]} : vector<224x64xf32> to vector<8x64xf32>
    %c704 = arith.constant 704 : index
    %c0_50 = arith.constant 0 : index
    %96 = vector.load %arg6[%c704, %c0_50] : memref<1537x64xf32, #tpu.memory_space<vmem>>, vector<64x64xf32>
    %cst_51 = arith.constant dense<0.000000e+00> : vector<8x64xf32>
    %97 = tpu.matmul %95, %96, %cst_51 {dimension_numbers = #tpu.dot_dimension_numbers<[1], [0], [0], [1], [0, 0, 1, 1], [], []>} : vector<8x64xf32>, vector<64x64xf32>, vector<8x64xf32> -> vector<8x64xf32>
    %98 = arith.addf %82, %97 : vector<8x64xf32>
    %99 = vector.extract_strided_slice %46 {offsets = [96, 0], sizes = [8, 64], strides = [1, 1]} : vector<224x64xf32> to vector<8x64xf32>
    %c768 = arith.constant 768 : index
    %c0_52 = arith.constant 0 : index
    %100 = vector.load %arg6[%c768, %c0_52] : memref<1537x64xf32, #tpu.memory_space<vmem>>, vector<64x64xf32>
    %cst_53 = arith.constant dense<0.000000e+00> : vector<8x64xf32>
    %101 = tpu.matmul %99, %100, %cst_53 {dimension_numbers = #tpu.dot_dimension_numbers<[1], [0], [0], [1], [0, 0, 1, 1], [], []>} : vector<8x64xf32>, vector<64x64xf32>, vector<8x64xf32> -> vector<8x64xf32>
    %102 = arith.addf %86, %101 : vector<8x64xf32>
    %103 = vector.extract_strided_slice %46 {offsets = [104, 0], sizes = [8, 64], strides = [1, 1]} : vector<224x64xf32> to vector<8x64xf32>
    %c832 = arith.constant 832 : index
    %c0_54 = arith.constant 0 : index
    %104 = vector.load %arg6[%c832, %c0_54] : memref<1537x64xf32, #tpu.memory_space<vmem>>, vector<64x64xf32>
    %cst_55 = arith.constant dense<0.000000e+00> : vector<8x64xf32>
    %105 = tpu.matmul %103, %104, %cst_55 {dimension_numbers = #tpu.dot_dimension_numbers<[1], [0], [0], [1], [0, 0, 1, 1], [], []>} : vector<8x64xf32>, vector<64x64xf32>, vector<8x64xf32> -> vector<8x64xf32>
    %106 = arith.addf %90, %105 : vector<8x64xf32>
    %107 = vector.extract_strided_slice %46 {offsets = [112, 0], sizes = [8, 64], strides = [1, 1]} : vector<224x64xf32> to vector<8x64xf32>
    %c896 = arith.constant 896 : index
    %c0_56 = arith.constant 0 : index
    %108 = vector.load %arg6[%c896, %c0_56] : memref<1537x64xf32, #tpu.memory_space<vmem>>, vector<64x64xf32>
    %cst_57 = arith.constant dense<0.000000e+00> : vector<8x64xf32>
    %109 = tpu.matmul %107, %108, %cst_57 {dimension_numbers = #tpu.dot_dimension_numbers<[1], [0], [0], [1], [0, 0, 1, 1], [], []>} : vector<8x64xf32>, vector<64x64xf32>, vector<8x64xf32> -> vector<8x64xf32>
    %110 = arith.addf %94, %109 : vector<8x64xf32>
    %111 = vector.extract_strided_slice %46 {offsets = [120, 0], sizes = [8, 64], strides = [1, 1]} : vector<224x64xf32> to vector<8x64xf32>
    %c960 = arith.constant 960 : index
    %c0_58 = arith.constant 0 : index
    %112 = vector.load %arg6[%c960, %c0_58] : memref<1537x64xf32, #tpu.memory_space<vmem>>, vector<64x64xf32>
    %cst_59 = arith.constant dense<0.000000e+00> : vector<8x64xf32>
    %113 = tpu.matmul %111, %112, %cst_59 {dimension_numbers = #tpu.dot_dimension_numbers<[1], [0], [0], [1], [0, 0, 1, 1], [], []>} : vector<8x64xf32>, vector<64x64xf32>, vector<8x64xf32> -> vector<8x64xf32>
    %114 = arith.addf %98, %113 : vector<8x64xf32>
    %115 = vector.extract_strided_slice %46 {offsets = [128, 0], sizes = [8, 64], strides = [1, 1]} : vector<224x64xf32> to vector<8x64xf32>
    %c1024 = arith.constant 1024 : index
    %c0_60 = arith.constant 0 : index
    %116 = vector.load %arg6[%c1024, %c0_60] : memref<1537x64xf32, #tpu.memory_space<vmem>>, vector<64x64xf32>
    %cst_61 = arith.constant dense<0.000000e+00> : vector<8x64xf32>
    %117 = tpu.matmul %115, %116, %cst_61 {dimension_numbers = #tpu.dot_dimension_numbers<[1], [0], [0], [1], [0, 0, 1, 1], [], []>} : vector<8x64xf32>, vector<64x64xf32>, vector<8x64xf32> -> vector<8x64xf32>
    %118 = arith.addf %102, %117 : vector<8x64xf32>
    %119 = vector.extract_strided_slice %46 {offsets = [136, 0], sizes = [8, 64], strides = [1, 1]} : vector<224x64xf32> to vector<8x64xf32>
    %c1088 = arith.constant 1088 : index
    %c0_62 = arith.constant 0 : index
    %120 = vector.load %arg6[%c1088, %c0_62] : memref<1537x64xf32, #tpu.memory_space<vmem>>, vector<64x64xf32>
    %cst_63 = arith.constant dense<0.000000e+00> : vector<8x64xf32>
    %121 = tpu.matmul %119, %120, %cst_63 {dimension_numbers = #tpu.dot_dimension_numbers<[1], [0], [0], [1], [0, 0, 1, 1], [], []>} : vector<8x64xf32>, vector<64x64xf32>, vector<8x64xf32> -> vector<8x64xf32>
    %122 = arith.addf %106, %121 : vector<8x64xf32>
    %123 = vector.extract_strided_slice %46 {offsets = [144, 0], sizes = [8, 64], strides = [1, 1]} : vector<224x64xf32> to vector<8x64xf32>
    %c1152 = arith.constant 1152 : index
    %c0_64 = arith.constant 0 : index
    %124 = vector.load %arg6[%c1152, %c0_64] : memref<1537x64xf32, #tpu.memory_space<vmem>>, vector<64x64xf32>
    %cst_65 = arith.constant dense<0.000000e+00> : vector<8x64xf32>
    %125 = tpu.matmul %123, %124, %cst_65 {dimension_numbers = #tpu.dot_dimension_numbers<[1], [0], [0], [1], [0, 0, 1, 1], [], []>} : vector<8x64xf32>, vector<64x64xf32>, vector<8x64xf32> -> vector<8x64xf32>
    %126 = arith.addf %110, %125 : vector<8x64xf32>
    %127 = vector.extract_strided_slice %46 {offsets = [152, 0], sizes = [8, 64], strides = [1, 1]} : vector<224x64xf32> to vector<8x64xf32>
    %c1216 = arith.constant 1216 : index
    %c0_66 = arith.constant 0 : index
    %128 = vector.load %arg6[%c1216, %c0_66] : memref<1537x64xf32, #tpu.memory_space<vmem>>, vector<64x64xf32>
    %cst_67 = arith.constant dense<0.000000e+00> : vector<8x64xf32>
    %129 = tpu.matmul %127, %128, %cst_67 {dimension_numbers = #tpu.dot_dimension_numbers<[1], [0], [0], [1], [0, 0, 1, 1], [], []>} : vector<8x64xf32>, vector<64x64xf32>, vector<8x64xf32> -> vector<8x64xf32>
    %130 = arith.addf %114, %129 : vector<8x64xf32>
    %131 = vector.extract_strided_slice %46 {offsets = [160, 0], sizes = [8, 64], strides = [1, 1]} : vector<224x64xf32> to vector<8x64xf32>
    %c1280 = arith.constant 1280 : index
    %c0_68 = arith.constant 0 : index
    %132 = vector.load %arg6[%c1280, %c0_68] : memref<1537x64xf32, #tpu.memory_space<vmem>>, vector<64x64xf32>
    %cst_69 = arith.constant dense<0.000000e+00> : vector<8x64xf32>
    %133 = tpu.matmul %131, %132, %cst_69 {dimension_numbers = #tpu.dot_dimension_numbers<[1], [0], [0], [1], [0, 0, 1, 1], [], []>} : vector<8x64xf32>, vector<64x64xf32>, vector<8x64xf32> -> vector<8x64xf32>
    %134 = arith.addf %118, %133 : vector<8x64xf32>
    %135 = vector.extract_strided_slice %46 {offsets = [168, 0], sizes = [8, 64], strides = [1, 1]} : vector<224x64xf32> to vector<8x64xf32>
    %c1344 = arith.constant 1344 : index
    %c0_70 = arith.constant 0 : index
    %136 = vector.load %arg6[%c1344, %c0_70] : memref<1537x64xf32, #tpu.memory_space<vmem>>, vector<64x64xf32>
    %cst_71 = arith.constant dense<0.000000e+00> : vector<8x64xf32>
    %137 = tpu.matmul %135, %136, %cst_71 {dimension_numbers = #tpu.dot_dimension_numbers<[1], [0], [0], [1], [0, 0, 1, 1], [], []>} : vector<8x64xf32>, vector<64x64xf32>, vector<8x64xf32> -> vector<8x64xf32>
    %138 = arith.addf %122, %137 : vector<8x64xf32>
    %139 = vector.extract_strided_slice %46 {offsets = [176, 0], sizes = [8, 64], strides = [1, 1]} : vector<224x64xf32> to vector<8x64xf32>
    %c1408 = arith.constant 1408 : index
    %c0_72 = arith.constant 0 : index
    %140 = vector.load %arg6[%c1408, %c0_72] : memref<1537x64xf32, #tpu.memory_space<vmem>>, vector<64x64xf32>
    %cst_73 = arith.constant dense<0.000000e+00> : vector<8x64xf32>
    %141 = tpu.matmul %139, %140, %cst_73 {dimension_numbers = #tpu.dot_dimension_numbers<[1], [0], [0], [1], [0, 0, 1, 1], [], []>} : vector<8x64xf32>, vector<64x64xf32>, vector<8x64xf32> -> vector<8x64xf32>
    %142 = arith.addf %126, %141 : vector<8x64xf32>
    %143 = vector.extract_strided_slice %46 {offsets = [184, 0], sizes = [8, 64], strides = [1, 1]} : vector<224x64xf32> to vector<8x64xf32>
    %c1472 = arith.constant 1472 : index
    %c0_74 = arith.constant 0 : index
    %144 = vector.load %arg6[%c1472, %c0_74] : memref<1537x64xf32, #tpu.memory_space<vmem>>, vector<64x64xf32>
    %cst_75 = arith.constant dense<0.000000e+00> : vector<8x64xf32>
    %145 = tpu.matmul %143, %144, %cst_75 {dimension_numbers = #tpu.dot_dimension_numbers<[1], [0], [0], [1], [0, 0, 1, 1], [], []>} : vector<8x64xf32>, vector<64x64xf32>, vector<8x64xf32> -> vector<8x64xf32>
    %146 = arith.addf %130, %145 : vector<8x64xf32>
    %c1536 = arith.constant 1536 : index
    %c0_76 = arith.constant 0 : index
    %147 = vector.load %arg6[%c1536, %c0_76] : memref<1537x64xf32, #tpu.memory_space<vmem>>, vector<1x64xf32>
    %148 = arith.addf %134, %138 : vector<8x64xf32>
    %149 = arith.addf %148, %142 : vector<8x64xf32>
    %150 = arith.addf %149, %146 : vector<8x64xf32>
    %151 = vector.broadcast %147 : vector<1x64xf32> to vector<8x64xf32>
    %152 = arith.addf %150, %151 : vector<8x64xf32>
    %cst_77 = arith.constant 0.000000e+00 : f32
    %153 = vector.broadcast %cst_77 : f32 to vector<8x64xf32>
    %154 = arith.maximumf %152, %153 : vector<8x64xf32>
    %c0_78 = arith.constant 0 : index
    %c0_79 = arith.constant 0 : index
    %155 = vector.load %arg7[%c0_78, %c0_79] : memref<480x128xf32, #tpu.memory_space<vmem>>, vector<64x128xf32>
    %c64_80 = arith.constant 64 : index
    %c0_81 = arith.constant 0 : index
    %156 = vector.load %arg7[%c64_80, %c0_81] : memref<480x128xf32, #tpu.memory_space<vmem>>, vector<1x128xf32>
    %cst_82 = arith.constant dense<0.000000e+00> : vector<8x128xf32>
    %157 = tpu.matmul %154, %155, %cst_82 {dimension_numbers = #tpu.dot_dimension_numbers<[1], [0], [0], [1], [0, 0, 1, 1], [], []>} : vector<8x64xf32>, vector<64x128xf32>, vector<8x128xf32> -> vector<8x128xf32>
    %158 = vector.broadcast %156 : vector<1x128xf32> to vector<8x128xf32>
    %159 = arith.addf %157, %158 : vector<8x128xf32>
    %cst_83 = arith.constant 0.000000e+00 : f32
    %160 = vector.broadcast %cst_83 : f32 to vector<8x128xf32>
    %161 = arith.maximumf %159, %160 : vector<8x128xf32>
    %c72 = arith.constant 72 : index
    %c0_84 = arith.constant 0 : index
    %162 = vector.load %arg7[%c72, %c0_84] : memref<480x128xf32, #tpu.memory_space<vmem>>, vector<128x128xf32>
    %c200 = arith.constant 200 : index
    %c0_85 = arith.constant 0 : index
    %163 = vector.load %arg7[%c200, %c0_85] : memref<480x128xf32, #tpu.memory_space<vmem>>, vector<1x128xf32>
    %cst_86 = arith.constant dense<0.000000e+00> : vector<8x128xf32>
    %164 = tpu.matmul %161, %162, %cst_86 {dimension_numbers = #tpu.dot_dimension_numbers<[1], [0], [0], [1], [0, 0, 1, 1], [], []>} : vector<8x128xf32>, vector<128x128xf32>, vector<8x128xf32> -> vector<8x128xf32>
    %165 = vector.broadcast %163 : vector<1x128xf32> to vector<8x128xf32>
    %166 = arith.addf %164, %165 : vector<8x128xf32>
    %cst_87 = arith.constant 0.000000e+00 : f32
    %167 = vector.broadcast %cst_87 : f32 to vector<8x128xf32>
    %168 = arith.maximumf %166, %167 : vector<8x128xf32>
    %c208 = arith.constant 208 : index
    %c0_88 = arith.constant 0 : index
    %169 = vector.load %arg7[%c208, %c0_88] : memref<480x128xf32, #tpu.memory_space<vmem>>, vector<128x128xf32>
    %c336 = arith.constant 336 : index
    %c0_89 = arith.constant 0 : index
    %170 = vector.load %arg7[%c336, %c0_89] : memref<480x128xf32, #tpu.memory_space<vmem>>, vector<1x128xf32>
    %cst_90 = arith.constant dense<0.000000e+00> : vector<8x128xf32>
    %171 = tpu.matmul %168, %169, %cst_90 {dimension_numbers = #tpu.dot_dimension_numbers<[1], [0], [0], [1], [0, 0, 1, 1], [], []>} : vector<8x128xf32>, vector<128x128xf32>, vector<8x128xf32> -> vector<8x128xf32>
    %172 = vector.broadcast %170 : vector<1x128xf32> to vector<8x128xf32>
    %173 = arith.addf %171, %172 : vector<8x128xf32>
    %cst_91 = arith.constant 0.000000e+00 : f32
    %174 = vector.broadcast %cst_91 : f32 to vector<8x128xf32>
    %175 = arith.maximumf %173, %174 : vector<8x128xf32>
    %c344 = arith.constant 344 : index
    %c0_92 = arith.constant 0 : index
    %176 = vector.load %arg7[%c344, %c0_92] : memref<480x128xf32, #tpu.memory_space<vmem>>, vector<128x128xf32>
    %c472 = arith.constant 472 : index
    %c0_93 = arith.constant 0 : index
    %177 = vector.load %arg7[%c472, %c0_93] : memref<480x128xf32, #tpu.memory_space<vmem>>, vector<1x128xf32>
    %cst_94 = arith.constant dense<0.000000e+00> : vector<8x128xf32>
    %178 = tpu.matmul %175, %176, %cst_94 {dimension_numbers = #tpu.dot_dimension_numbers<[1], [0], [0], [1], [0, 0, 1, 1], [], []>} : vector<8x128xf32>, vector<128x128xf32>, vector<8x128xf32> -> vector<8x128xf32>
    %179 = vector.broadcast %177 : vector<1x128xf32> to vector<8x128xf32>
    %180 = arith.addf %178, %179 : vector<8x128xf32>
    %181 = vector.extract_strided_slice %180 {offsets = [0, 0], sizes = [8, 1], strides = [1, 1]} : vector<8x128xf32> to vector<8x1xf32>
    %cst_95 = arith.constant 5.000000e-01 : f32
    %182 = vector.broadcast %cst_95 : f32 to vector<8x1xf32>
    %183 = arith.mulf %182, %181 : vector<8x1xf32>
    %184 = math.tanh %183 : vector<8x1xf32>
    %cst_96 = arith.constant 1.000000e+00 : f32
    %185 = vector.broadcast %cst_96 : f32 to vector<8x1xf32>
    %186 = arith.addf %185, %184 : vector<8x1xf32>
    %cst_97 = arith.constant 5.000000e-01 : f32
    %187 = vector.broadcast %cst_97 : f32 to vector<8x1xf32>
    %188 = arith.mulf %187, %186 : vector<8x1xf32>
    %c0_98 = arith.constant 0 : index
    %c0_99 = arith.constant 0 : index
    %189 = vector.load %arg8[%c0_98, %c0_99] : memref<8x1xf32, #tpu.memory_space<vmem>>, vector<8x1xf32>
    tpu.vector_store %arg8[%c0_98, %c0_99], %188 {strides = array<i32>} : memref<8x1xf32, #tpu.memory_space<vmem>>, vector<8x1xf32>,
    return
  }
  func.func @transform_0(%arg0: i32) -> (i32, i32) {
    %c0_i32 = arith.constant 0 : i32
    %c0_i32_0 = arith.constant 0 : i32
    return %arg0, %c0_i32 : i32, i32
  }
  func.func @transform_1(%arg0: i32) -> (i32, i32) {
    %c0_i32 = arith.constant 0 : i32
    %c0_i32_0 = arith.constant 0 : i32
    %c0_i32_1 = arith.constant 0 : i32
    return %c0_i32, %c0_i32_0 : i32, i32
  }
  func.func @transform_2(%arg0: i32) -> (i32, i32) {
    %c0_i32 = arith.constant 0 : i32
    %c0_i32_0 = arith.constant 0 : i32
    %c0_i32_1 = arith.constant 0 : i32
    return %c0_i32, %c0_i32_0 : i32, i32
  }
  func.func @transform_3(%arg0: i32) -> (i32, i32) {
    %c0_i32 = arith.constant 0 : i32
    %c0_i32_0 = arith.constant 0 : i32
    %c0_i32_1 = arith.constant 0 : i32
    return %c0_i32, %c0_i32_0 : i32, i32
  }
  func.func @transform_4(%arg0: i32) -> (i32, i32) {
    %c0_i32 = arith.constant 0 : i32
    %c0_i32_0 = arith.constant 0 : i32
    %c0_i32_1 = arith.constant 0 : i32
    return %c0_i32, %c0_i32_0 : i32, i32
  }
  func.func @transform_5(%arg0: i32) -> (i32, i32) {
    %c0_i32 = arith.constant 0 : i32
    %c0_i32_0 = arith.constant 0 : i32
    %c0_i32_1 = arith.constant 0 : i32
    return %c0_i32, %c0_i32_0 : i32, i32
  }
  func.func @transform_6(%arg0: i32) -> (i32, i32) {
    %c0_i32 = arith.constant 0 : i32
    %c0_i32_0 = arith.constant 0 : i32
    %c0_i32_1 = arith.constant 0 : i32
    return %c0_i32, %c0_i32_0 : i32, i32
  }
  func.func @transform_7(%arg0: i32) -> (i32, i32) {
    %c0_i32 = arith.constant 0 : i32
    %c0_i32_0 = arith.constant 0 : i32
    return %arg0, %c0_i32 : i32, i32
  }
}

</mosaic_0001>

<bundles_post_ra>
// kernel: cnn20_forward.1
= control target key start
LH: loop header
LB: loop body
LE: loop exit
PB: predicated region body
PF: predicated region fallthrough
CT: control target
= control target key end

     0   :  { %v5389_v0 = vmov 0   ;;  %vm508_vm0 = vcmask 523264   ;;  %vm5392_vm1 = vmmov 0   ;;  %vm3932_vm2 = vcmask 7168   ;;  %s7804_s0 = inlined_call_operand.vmem [shape: f32[256,1], index: 0, kind: input, shape index: {}]   ;;  %s7805_s2 = inlined_call_operand.vmem [shape: f32[129,64], index: 2, kind: input, shape index: {}]   ;;  %s7806_s1 = inlined_call_operand.vmem [shape: f32[3,64], index: 1, kind: input, shape index: {}]   ;;  %s7807_s3 = inlined_call_operand.vmem [shape: f32[129,64], index: 3, kind: input, shape index: {}]   ;;  %s7808_s4 = inlined_call_operand.vmem [shape: f32[129,64], index: 4, kind: input, shape index: {}]   ;;  %s7809_s5 = inlined_call_operand.vmem [shape: f32[1537,64], index: 5, kind: input, shape index: {}]   ;;  %s7810_s6 = inlined_call_operand.vmem [shape: f32[480,128], index: 6, kind: input, shape index: {}]   ;;  %s7811_s7 = inlined_call_operand.vmem [shape: f32[8,1], index: 7, kind: output, shape index: {}]  }
   0x1   :  { %5240 = vset.pattern.permute.xlu1 %v5389_v0  ;;  %5239 = vset.pattern.permute.xlu0 %v5389_v0  ;;  %v29_v1 = vld [vmem:[%s7804_s0 + $0x18] sm:$0xff]  ;;  %v27_v2 = vld [vmem:[%s7804_s0 + $0x8] sm:$0xff]  ;;  %v30_v3 = vld [vmem:[%s7804_s0 + $0x20] sm:$0xff] }
   0x2   :  { %78 = vperm.xlu1 %5240, %v29_v1   ;;  %68 = vperm.xlu0 %5239, %v27_v2   ;;  %v28_v4 = vld [vmem:[%s7804_s0 + $0x10] sm:$0xff]  ;;  %v31_v6 = vld [vmem:[%s7804_s0 + $0x28] sm:$0xff]  ;;  %v34_v7 = vld [vmem:[%s7804_s0 + $0x40] sm:$0xff] }
   0x3   :  { %v32_v5 = vld [vmem:[%s7804_s0 + $0x30] sm:$0xff]  ;;  %v33_v8 = vld [vmem:[%s7804_s0 + $0x38] sm:$0xff]  ;;  %v35_v10 = vld [vmem:[%s7804_s0 + $0x48] sm:$0xff] }
   0x4   :  { %v36_v9 = vld [vmem:[%s7804_s0 + $0x50] sm:$0xff]  ;;  %v37_v11 = vld [vmem:[%s7804_s0 + $0x58] sm:$0xff]  ;;  %v26_v12 = vld [vmem:[%s7804_s0] sm:$0xff] }
   0x5   :  { %v554_v13 = vld [vmem:[%s7805_s2 + $0x78] sm:$0xff]  ;;  %v553_v14 = vld [vmem:[%s7805_s2 + $0x70] sm:$0xff]  ;;  %v552_v15 = vld [vmem:[%s7805_s2 + $0x68] sm:$0xff] }
   0x6   :  { %83 = vperm.xlu1 %5240, %v30_v3   ;;  %73 = vperm.xlu0 %5239, %v28_v4   ;;  %v551_v16 = vld [vmem:[%s7805_s2 + $0x60] sm:$0xff]  ;;  %v550_v17 = vld [vmem:[%s7805_s2 + $0x58] sm:$0xff]  ;;  %v549_v18 = vld [vmem:[%s7805_s2 + $0x50] sm:$0xff] }
   0x7   :  { %4385 = vmatprep.subr.mxu0 %v554_v13  ;;  %v548_v19 = vld [vmem:[%s7805_s2 + $0x48] sm:$0xff]  ;;  %v547_v20 = vld [vmem:[%s7805_s2 + $0x40] sm:$0xff]  ;;  %v546_v21 = vld [vmem:[%s7805_s2 + $0x38] sm:$0xff] }
   0x8   :  { %4386 = vmatpush3.msra.mxu0 %v554_v13  ;;  %v545_v22 = vld [vmem:[%s7805_s2 + $0x30] sm:$0xff]  ;;  %v544_v23 = vld [vmem:[%s7805_s2 + $0x28] sm:$0xff]  ;;  %v543_v24 = vld [vmem:[%s7805_s2 + $0x20] sm:$0xff] }
   0x9   :  { %4387 = vmatprep.subr.mxu0 %v553_v14  ;;  %v542_v25 = vld [vmem:[%s7805_s2 + $0x18] sm:$0xff]  ;;  %v541_v26 = vld [vmem:[%s7805_s2 + $0x10] sm:$0xff]  ;;  %v5516_v29 = vld [vmem:[%s7806_s1] ss:$0 sm:$0xff] }
   0xa   :  { %93 = vperm.xlu1 %5240, %v32_v5   ;;  %88 = vperm.xlu0 %5239, %v31_v6   ;;  %v5521_v30 = vld [vmem:[%s7806_s1 + $0x1] ss:$0 sm:$0xff]  ;;  %v540_v31 = vld [vmem:[%s7805_s2 + $0x8] sm:$0xff]  ;;  %v5539_v41 = vld [vmem:[%s7806_s1 + $0x2] ss:$0 sm:$0xff]  ;;  %s5390_s1 = smov 64  }
   0xb   :  { %4388 = vmatpush3.msra.mxu0 %v553_v14  ;;  %v539_v33 = vld [vmem:[%s7805_s2] sm:$0xff] }
   0xc   :  { %4389 = vmatprep.subr.mxu0 %v552_v15 }
   0xd   :  { %4390 = vmatpush3.msra.mxu0 %v552_v15 }
   0xe   :  { %103 = vperm.xlu1 %5240, %v34_v7   ;;  %98 = vperm.xlu0 %5239, %v33_v8  }
   0xf   :  { %4391 = vmatprep.subr.mxu0 %v551_v16 }
  0x10   :  { %4392 = vmatpush3.msra.mxu0 %v551_v16 }
  0x11   :  { %4393 = vmatprep.subr.mxu0 %v550_v17 }
  0x12   :  { %113 = vperm.xlu1 %5240, %v36_v9   ;;  %108 = vperm.xlu0 %5239, %v35_v10  }
  0x13   :  { %4394 = vmatpush3.msra.mxu0 %v550_v17 }
  0x14   :  { %4395 = vmatprep.subr.mxu0 %v549_v18 }
  0x15   :  { %4396 = vmatpush3.msra.mxu0 %v549_v18 }
  0x16   :  { %118 = vperm.xlu0 %5239, %v37_v11   ;;  %63 = vperm.xlu1 %5240, %v26_v12  }
  0x17   :  { %4397 = vmatprep.subr.mxu0 %v548_v19 }
  0x18   :  { %4398 = vmatpush3.msra.mxu0 %v548_v19 }
  0x19   :  { %4399 = vmatprep.subr.mxu0 %v547_v20 }
  0x1a   :  { %4400 = vmatpush3.msra.mxu0 %v547_v20  ;;  %v38_v20 = vld [vmem:[%s7804_s0 + $0x60] sm:$0xff] }
  0x1b   :  { %4401 = vmatprep.subr.mxu0 %v546_v21 }
  0x1c   :  { %4402 = vmatpush3.msra.mxu0 %v546_v21 }
  0x1d   :  { %4403 = vmatprep.subr.mxu0 %v545_v22 }
  0x1e   :  { %4404 = vmatpush3.msra.mxu0 %v545_v22 }
  0x1f   :  { %4405 = vmatprep.subr.mxu0 %v544_v23 }
  0x20   :  { %4406 = vmatpush3.msra.mxu0 %v544_v23 }
  0x21   :  { %4407 = vmatprep.subr.mxu0 %v543_v24 }
  0x22   :  { %4408 = vmatpush3.msra.mxu0 %v543_v24 }
  0x23   :  { %4409 = vmatprep.subr.mxu0 %v542_v25 }
  0x24   :  { %4410 = vmatpush3.msra.mxu0 %v542_v25  ;;  %v39_v25 = vld [vmem:[%s7804_s0 + $0x68] sm:$0xff] }
  0x25   :  { %4411 = vmatprep.subr.mxu0 %v541_v26 }
  0x26   :  { %4412 = vmatpush3.msra.mxu0 %v541_v26 }
  0x27   :  { %4413 = vmatprep.subr.mxu0 %v540_v31 }
  0x28   :  { %4414 = vmatpush3.msra.mxu0 %v540_v31 }
  0x29   :  { %4415 = vmatprep.subr.mxu0 %v539_v33 }
  0x2a   :  { %4416 = vmatpush3.msra.mxu0 %v539_v33 }
  0x7d   :  { %v79_v27 = vpop.permute.xlu1 %78  ;;  %v5511_v28 = vpop.permute.xlu0 %68 }
  0x7e   :  { %v262_v32 = vmul.f32 %v5521_v30, %v79_v27  ;;  %v223_v34 = vmul.f32 %v5516_v29, %v79_v27  ;;  %v221_v37 = vmul.f32 %v5516_v29, %v5511_v28 }
  0x81   :  { %v84_v35 = vpop.permute.xlu1 %83  ;;  %v74_v36 = vpop.permute.xlu0 %73 }
  0x82   :  { %v263_v38 = vmul.f32 %v5521_v30, %v84_v35  ;;  %v222_v39 = vmul.f32 %v5516_v29, %v74_v36  ;;  %v261_v40 = vmul.f32 %v5521_v30, %v74_v36  ;;  %v224_v49 = vmul.f32 %v5516_v29, %v84_v35  ;;  %v41_v36 = vld [vmem:[%s7804_s0 + $0x78] sm:$0xff] }
  0x84   :  { %v292_v42 = vadd.f32 %v261_v40, %v221_v37  ;;  %v293_v43 = vadd.f32 %v262_v32, %v222_v39  ;;  %v294_v44 = vadd.f32 %v263_v38, %v223_v34  ;;  %v40_v34 = vld [vmem:[%s7804_s0 + $0x70] sm:$0xff]  ;;  %v42_v38 = vld [vmem:[%s7804_s0 + $0x80] sm:$0xff]  ;;  %v43_v39 = vld [vmem:[%s7804_s0 + $0x88] sm:$0xff] }
  0x85   :  { %v94_v45 = vpop.permute.xlu1 %93  ;;  %v89_v46 = vpop.permute.xlu0 %88 }
  0x86   :  { %v5542_v47 = vadd.f32 %v5539_v41, %v292_v42  ;;  %v5545_v48 = vadd.f32 %v5539_v41, %v293_v43  ;;  %v265_v50 = vmul.f32 %v5521_v30, %v94_v45  ;;  %v225_v51 = vmul.f32 %v5516_v29, %v89_v46 }
  0x87   :  { %v264_v52 = vmul.f32 %v5521_v30, %v89_v46  ;;  %v5554_v55 = vadd.f32 %v5539_v41, %v294_v44  ;;  %v226_v60 = vmul.f32 %v5516_v29, %v94_v45  ;;  %v44_v44 = vld [vmem:[%s7804_s0 + $0x90] sm:$0xff]  ;;  %v45_v45 = vld [vmem:[%s7804_s0 + $0x98] sm:$0xff]  ;;  %v46_v46 = vld [vmem:[%s7804_s0 + $0xa0] sm:$0xff] }
  0x88   :  { %v358_v53 = vmax.f32 %v5542_v47, 0.0  ;;  %v359_v54 = vmax.f32 %v5545_v48, 0.0  ;;  %v296_v57 = vadd.f32 %v265_v50, %v225_v51  ;;  %v48_v50 = vld [vmem:[%s7804_s0 + $0xb0] sm:$0xff] }
  0x89   :  { %v295_v56 = vadd.f32 %v264_v52, %v224_v49  ;;  %v104_v58 = vpop.permute.xlu1 %103  ;;  %v99_v59 = vpop.permute.xlu0 %98  ;;  %v360_v6 = vmax.f32 %v5554_v55, 0.0  ;;  %v47_v49 = vld [vmem:[%s7804_s0 + $0xa8] sm:$0xff] }
  0x8a   :  { %v267_v61 = vmul.f32 %v5521_v30, %v104_v58  ;;  %v227_v62 = vmul.f32 %v5516_v29, %v99_v59  ;;  %v266_v63 = vmul.f32 %v5521_v30, %v99_v59  ;;  %v5241_v1 = vpack.i.bf16 %v359_v54, %v358_v53 }
  0x8b   :  { %v5561_v0 = vadd.f32 %v5539_v41, %v295_v56  ;;  %v5568_v2 = vadd.f32 %v5539_v41, %v296_v57  ;;  %v228_v9 = vmul.f32 %v5516_v29, %v104_v58  ;;  %v260_v56 = vmul.f32 %v5521_v30, %v5511_v28 }
  0x8c   :  { %v297_v3 = vadd.f32 %v266_v63, %v226_v60  ;;  %v298_v4 = vadd.f32 %v267_v61, %v227_v62  ;;  %5242 = vrot.lane.b32.xlu0 %v5241_v1, %s5390_s1 }
  0x8d   :  { %v109_v5 = vpop.permute.xlu0 %108  ;;  %v361_v7 = vmax.f32 %v5561_v0, 0.0  ;;  %v362_v12 = vmax.f32 %v5568_v2, 0.0  ;;  %v114_v15 = vpop.permute.xlu1 %113 }
  0x8e   :  { %v5574_v8 = vadd.f32 %v5539_v41, %v297_v3  ;;  %v268_v10 = vmul.f32 %v5521_v30, %v109_v5  ;;  %v5585_v14 = vadd.f32 %v5539_v41, %v298_v4  ;;  %v230_v22 = vmul.f32 %v5516_v29, %v114_v15 }
  0x8f   :  { %v5246_v11 = vpack.i.bf16 %v361_v7, %v360_v6  ;;  %v269_v23 = vmul.f32 %v5521_v30, %v114_v15  ;;  %v229_v24 = vmul.f32 %v5516_v29, %v109_v5 }
  0x90   :  { %v363_v13 = vmax.f32 %v5574_v8, 0.0  ;;  %v299_v16 = vadd.f32 %v268_v10, %v228_v9  ;;  %v364_v26 = vmax.f32 %v5585_v14, 0.0 }
  0x91   :  { %5247 = vrot.lane.b32.xlu1 %v5246_v11, %s5390_s1  ;;  %v5588_v17 = vpop.permute.xlu0 %118  ;;  %v300_v33 = vadd.f32 %v269_v23, %v229_v24  ;;  %v64_v51 = vpop.permute.xlu1 %63 }
  0x92   :  { %v270_v18 = vmul.f32 %v5521_v30, %v5588_v17  ;;  %v5251_v19 = vpack.i.bf16 %v363_v13, %v362_v12  ;;  %v5600_v21 = vadd.f32 %v5539_v41, %v299_v16  ;;  %v220_v52 = vmul.f32 %v5516_v29, %v64_v51 }
  0x93   :  { %v5626_v37 = vadd.f32 %v5539_v41, %v300_v33 }
  0x94   :  { %5252 = vrot.lane.b32.xlu0 %v5251_v19, %s5390_s1  ;;  %v365_v27 = vmax.f32 %v5600_v21, 0.0  ;;  %v301_v31 = vadd.f32 %v270_v18, %v230_v22  ;;  %v291_v57 = vadd.f32 %v260_v56, %v220_v52  ;;  %v51_v21 = vld [vmem:[%s7804_s0 + $0xc8] sm:$0xff] }
  0x95   :  { %123 = vperm.xlu1 %5240, %v38_v20   ;;  %v366_v42 = vmax.f32 %v5626_v37, 0.0 }
  0x96   :  { %v5256_v32 = vpack.i.bf16 %v365_v27, %v364_v26  ;;  %v5620_v35 = vadd.f32 %v5539_v41, %v301_v31  ;;  %v326_v58 = vadd.f32 %v5539_v41, %v291_v57 }
  0x98   :  { %128 = vperm.xlu0 %5239, %v39_v25   ;;  %v367_v40 = vmax.f32 %v5620_v35, 0.0  ;;  %v357_v62 = vmax.f32 %v326_v58, 0.0  ;;  %v49_v58 = vld [vmem:[%s7804_s0 + $0xb8] sm:$0xff] }
  0x99   :  { %5257 = vrot.lane.b32.xlu1 %v5256_v32, %s5390_s1 }
  0x9a   :  { %v5261_v43 = vpack.i.bf16 %v367_v40, %v366_v42 }
  0x9c   :  { %133 = vperm.xlu0 %5239, %v40_v34  }
  0x9d   :  { %138 = vperm.xlu1 %5240, %v41_v36  }
  0xa0   :  { %143 = vperm.xlu0 %5239, %v42_v38  }
  0xa1   :  { %148 = vperm.xlu1 %5240, %v43_v39  }
  0xa4   :  { %5262 = vrot.lane.b32.xlu0 %v5261_v43, %s5390_s1 }
  0xa5   :  { %153 = vperm.xlu1 %5240, %v44_v44  }
  0xa8   :  { %158 = vperm.xlu0 %5239, %v45_v45  }
  0xa9   :  { %163 = vperm.xlu1 %5240, %v46_v46  }
  0xac   :  { %168 = vperm.xlu0 %5239, %v47_v49  }
  0xb0   :  { %173 = vperm.xlu0 %5239, %v48_v50  }
  0xfe   :  { %v5243_v59 = vpop.permute.xlu0 %5242 }
  0xff   :  { %v5245_v60 = vunpack.i.h.bf16 %v5243_v59  ;;  %v5244_v61 = vunpack.i.l.bf16 %v5243_v59 }
 0x101   :  { %v509_v63 = vsel %vm508_vm0, %v357_v62, %v5244_v61  ;;  %v510_v1 = vsel %vm508_vm0, %v358_v53, %v5245_v60 }
 0x102   :  { %4417 = vmatprep.mubr.f32.mxu0 %v509_v63 }
 0x103   :  { %v5248_v3 = vpop.permute.xlu1 %5247  ;;  %4418 = vmatmul.mubr.f32.vlgmr.msra.gmra.mxu0 %v510_v1 }
 0x104   :  { %v5250_v4 = vunpack.i.h.bf16 %v5248_v3  ;;  %v5249_v5 = vunpack.i.l.bf16 %v5248_v3 }
 0x106   :  { %v5253_v28 = vpop.permute.xlu0 %5252  ;;  %v511_v9 = vsel %vm508_vm0, %v359_v54, %v5249_v5  ;;  %v512_v10 = vsel %vm508_vm0, %v360_v6, %v5250_v4  ;;  %v231_v54 = vmul.f32 %v5516_v29, %v5588_v17 }
 0x107   :  { %v5255_v11 = vunpack.i.h.bf16 %v5253_v28  ;;  %v5254_v15 = vunpack.i.l.bf16 %v5253_v28  ;;  %4420 = vmatprep.mubr.f32.mxu0 %v511_v9 }
 0x108   :  { %4421 = vmatmul.mubr.f32.gmra.mxu0 %v512_v10 }
 0x109   :  { %v513_v47 = vsel %vm508_vm0, %v361_v7, %v5254_v15  ;;  %v514_v53 = vsel %vm508_vm0, %v362_v12, %v5255_v11  ;;  %v50_v15 = vld [vmem:[%s7804_s0 + $0xc0] sm:$0xff] }
 0x10a   :  { %4423 = vmatprep.mubr.f32.mxu0 %v513_v47 }
 0x10c   :  { %4424 = vmatmul.mubr.f32.gmra.mxu0 %v514_v53 }
 0x110   :  { %v124_v48 = vpop.permute.xlu1 %123 }
 0x111   :  { %v271_v55 = vmul.f32 %v5521_v30, %v124_v48  ;;  %v232_v18 = vmul.f32 %v5516_v29, %v124_v48 }
 0x113   :  { %v302_v6 = vadd.f32 %v271_v55, %v231_v54  ;;  %v129_v16 = vpop.permute.xlu0 %128 }
 0x114   :  { %v272_v0 = vmul.f32 %v5521_v30, %v129_v16  ;;  %v5258_v19 = vpop.permute.xlu1 %5257  ;;  %v233_v24 = vmul.f32 %v5516_v29, %v129_v16 }
 0x115   :  { %v5260_v7 = vunpack.i.h.bf16 %v5258_v19  ;;  %v5259_v20 = vunpack.i.l.bf16 %v5258_v19  ;;  %v5682_v2 = vadd.f32 %v5539_v41, %v302_v6 }
 0x116   :  { %v303_v12 = vadd.f32 %v272_v0, %v232_v18  ;;  %v52_v18 = vld [vmem:[%s7804_s0 + $0xd0] sm:$0xff] }
 0x117   :  { %v134_v22 = vpop.permute.xlu0 %133  ;;  %v515_v17 = vsel %vm508_vm0, %v363_v13, %v5259_v20  ;;  %v516_v23 = vsel %vm508_vm0, %v364_v26, %v5260_v7  ;;  %v368_v13 = vmax.f32 %v5682_v2, 0.0 }
 0x118   :  { %v5692_v25 = vadd.f32 %v5539_v41, %v303_v12  ;;  %v234_v31 = vmul.f32 %v5516_v29, %v134_v22  ;;  %v273_v32 = vmul.f32 %v5521_v30, %v134_v22  ;;  %v139_v33 = vpop.permute.xlu1 %138  ;;  %4426 = vmatprep.mubr.f32.mxu0 %v515_v17  ;;  %v53_v17 = vld [vmem:[%s7804_s0 + $0xd8] sm:$0xff] }
 0x119   :  { %v274_v34 = vmul.f32 %v5521_v30, %v139_v33  ;;  %4427 = vmatmul.mubr.f32.gmra.mxu0 %v516_v23  ;;  %v235_v26 = vmul.f32 %v5516_v29, %v139_v33 }
 0x11a   :  { %v304_v8 = vadd.f32 %v273_v32, %v233_v24  ;;  %v369_v14 = vmax.f32 %v5692_v25, 0.0  ;;  %v54_v32 = vld [vmem:[%s7804_s0 + $0xe0] sm:$0xff] }
 0x11b   :  { %v305_v36 = vadd.f32 %v274_v34, %v234_v31  ;;  %v144_v38 = vpop.permute.xlu0 %143  ;;  %v55_v34 = vld [vmem:[%s7804_s0 + $0xe8] sm:$0xff] }
 0x11c   :  { %v5701_v39 = vadd.f32 %v5539_v41, %v304_v8  ;;  %v236_v43 = vmul.f32 %v5516_v29, %v144_v38  ;;  %v275_v44 = vmul.f32 %v5521_v30, %v144_v38  ;;  %v149_v45 = vpop.permute.xlu1 %148  ;;  %v5266_v46 = vpack.i.bf16 %v369_v14, %v368_v13 }
 0x11d   :  { %v5710_v49 = vadd.f32 %v5539_v41, %v305_v36  ;;  %v276_v50 = vmul.f32 %v5521_v30, %v149_v45  ;;  %v237_v1 = vmul.f32 %v5516_v29, %v149_v45  ;;  %v57_v36 = vld [vmem:[%s7804_s0 + $0xf8] sm:$0xff] }
 0x11e   :  { %v306_v51 = vadd.f32 %v275_v44, %v235_v26  ;;  %5267 = vrot.lane.b32.xlu1 %v5266_v46, %s5390_s1  ;;  %v370_v52 = vmax.f32 %v5701_v39, 0.0  ;;  %v56_v26 = vld [vmem:[%s7804_s0 + $0xf0] sm:$0xff] }
 0x11f   :  { %v307_v56 = vadd.f32 %v276_v50, %v236_v43  ;;  %v5263_v57 = vpop.permute.xlu0 %5262  ;;  %v371_v59 = vmax.f32 %v5710_v49, 0.0  ;;  %v964_v39 = vld [vmem:[%s7807_s3 + $0x70] sm:$0xff] }
 0x120   :  { %v5720_v60 = vadd.f32 %v5539_v41, %v306_v51  ;;  %v5265_v61 = vunpack.i.h.bf16 %v5263_v57  ;;  %v5264_v62 = vunpack.i.l.bf16 %v5263_v57  ;;  %v154_v63 = vpop.permute.xlu1 %153 }
 0x121   :  { %v5724_v3 = vadd.f32 %v5539_v41, %v307_v56  ;;  %v277_v4 = vmul.f32 %v5521_v30, %v154_v63  ;;  %v5271_v5 = vpack.i.bf16 %v371_v59, %v370_v52  ;;  %v238_v47 = vmul.f32 %v5516_v29, %v154_v63 }
 0x122   :  { %178 = vperm.xlu1 %5240, %v49_v58   ;;  %v517_v28 = vsel %vm508_vm0, %v365_v27, %v5264_v62  ;;  %v518_v9 = vsel %vm508_vm0, %v366_v42, %v5265_v61  ;;  %v372_v27 = vmax.f32 %v5720_v60, 0.0 }
 0x123   :  { %v308_v10 = vadd.f32 %v277_v4, %v237_v1  ;;  %5272 = vrot.lane.b32.xlu0 %v5271_v5, %s5390_s1  ;;  %v159_v11 = vpop.permute.xlu0 %158  ;;  %4429 = vmatprep.mubr.f32.mxu0 %v517_v28  ;;  %v373_v37 = vmax.f32 %v5724_v3, 0.0  ;;  %v965_v4 = vld [vmem:[%s7807_s3 + $0x78] sm:$0xff] }
 0x124   :  { %v278_v53 = vmul.f32 %v5521_v30, %v159_v11  ;;  %4430 = vmatmul.mubr.f32.gmra.mxu0 %v518_v9  ;;  %v164_v54 = vpop.permute.xlu1 %163  ;;  %v239_v19 = vmul.f32 %v5516_v29, %v159_v11  ;;  %v963_v9 = vld [vmem:[%s7807_s3 + $0x68] sm:$0xff] }
 0x125   :  { %v5749_v42 = vadd.f32 %v5539_v41, %v308_v10  ;;  %v5276_v0 = vpack.i.bf16 %v373_v37, %v372_v27  ;;  %v240_v7 = vmul.f32 %v5516_v29, %v164_v54  ;;  %v279_v20 = vmul.f32 %v5521_v30, %v164_v54  ;;  %v962_v54 = vld [vmem:[%s7807_s3 + $0x60] sm:$0xff] }
 0x126   :  { %v309_v48 = vadd.f32 %v278_v53, %v238_v47  ;;  %183 = vperm.xlu1 %5240, %v50_v15  }
 0x127   :  { %188 = vperm.xlu0 %5239, %v51_v21   ;;  %v169_v55 = vpop.permute.xlu0 %168  ;;  %v374_v12 = vmax.f32 %v5749_v42, 0.0  ;;  %v310_v31 = vadd.f32 %v279_v20, %v239_v19 }
 0x128   :  { %v5752_v6 = vadd.f32 %v5539_v41, %v309_v48  ;;  %v280_v16 = vmul.f32 %v5521_v30, %v169_v55 }
 0x129   :  { %v5786_v8 = vadd.f32 %v5539_v41, %v310_v31 }
 0x12a   :  { %5277 = vrot.lane.b32.xlu1 %v5276_v0, %s5390_s1  ;;  %v375_v22 = vmax.f32 %v5752_v6, 0.0  ;;  %v311_v23 = vadd.f32 %v280_v16, %v240_v7  ;;  %v961_v0 = vld [vmem:[%s7807_s3 + $0x58] sm:$0xff] }
 0x12b   :  { %193 = vperm.xlu0 %5239, %v52_v18   ;;  %v376_v43 = vmax.f32 %v5786_v8, 0.0  ;;  %v174_v46 = vpop.permute.xlu0 %173  ;;  %v5981_v8 = vld [vmem:[%s7805_s2 + $0x80] ss:$0 sm:$0xff] }
 0x12c   :  { %v5281_v24 = vpack.i.bf16 %v375_v22, %v374_v12  ;;  %v5780_v33 = vadd.f32 %v5539_v41, %v311_v23  ;;  %v281_v63 = vmul.f32 %v5521_v30, %v174_v46  ;;  %v242_v25 = vmul.f32 %v5516_v29, %v174_v46 }
 0x12e   :  { %198 = vperm.xlu1 %5240, %v53_v17   ;;  %v377_v38 = vmax.f32 %v5780_v33, 0.0 }
 0x12f   :  { %5282 = vrot.lane.b32.xlu0 %v5281_v24, %s5390_s1 }
 0x130   :  { %v5286_v44 = vpack.i.bf16 %v377_v38, %v376_v43 }
 0x132   :  { %203 = vperm.xlu1 %5240, %v54_v32  }
 0x133   :  { %208 = vperm.xlu0 %5239, %v55_v34  }
 0x136   :  { %213 = vperm.xlu1 %5240, %v56_v26  }
 0x137   :  { %253 = vperm.xlu0 %5239, %v57_v36   ;;  %v960_v36 = vld [vmem:[%s7807_s3 + $0x50] sm:$0xff] }
 0x13a   :  { %5287 = vrot.lane.b32.xlu1 %v5286_v44, %s5390_s1  ;;  %v959_v44 = vld [vmem:[%s7807_s3 + $0x48] sm:$0xff] }
 0x190   :  { %v5268_v45 = vpop.permute.xlu1 %5267 }
 0x191   :  { %v5270_v50 = vunpack.i.h.bf16 %v5268_v45  ;;  %v5269_v51 = vunpack.i.l.bf16 %v5268_v45 }
 0x193   :  { %v519_v56 = vsel %vm508_vm0, %v367_v40, %v5269_v51  ;;  %v520_v57 = vsel %vm508_vm0, %v368_v13, %v5270_v50  ;;  %v241_v40 = vmul.f32 %v5516_v29, %v169_v55  ;;  %v5391_v13 = vmov 0.0  }
 0x194   :  { %4432 = vmatprep.mubr.f32.mxu0 %v519_v56  ;;  %4462 = vmatprep.subr.mxu1 %v5391_v13 }
 0x195   :  { %v5273_v58 = vpop.permute.xlu0 %5272  ;;  %4433 = vmatmul.mubr.f32.gmra.mxu0 %v520_v57  ;;  %v312_v2 = vadd.f32 %v281_v63, %v241_v40  ;;  %4463 = vmatpush3.msra.mxu1 %v965_v4 }
 0x196   :  { %v5275_v61 = vunpack.i.h.bf16 %v5273_v58  ;;  %v5274_v62 = vunpack.i.l.bf16 %v5273_v58  ;;  %4464 = vmatprep.subr.mxu1 %v5391_v13  ;;  %4494 = vmatprep.mubr.msk.f32.mxu1 %vm5392_vm1, %v5391_v13 }
 0x197   :  { %4465 = vmatpush3.msra.mxu1 %v964_v39 }
 0x198   :  { %v521_v1 = vsel %vm508_vm0, %v369_v14, %v5274_v62  ;;  %v522_v35 = vsel %vm508_vm0, %v370_v52, %v5275_v61  ;;  %v5826_v52 = vadd.f32 %v5539_v41, %v312_v2  ;;  %4466 = vmatprep.subr.mxu1 %v5391_v13  ;;  %v958_v62 = vld [vmem:[%s7807_s3 + $0x40] sm:$0xff] }
 0x199   :  { %4435 = vmatprep.mubr.f32.mxu0 %v521_v1  ;;  %4467 = vmatpush3.msra.mxu1 %v963_v9 }
 0x19a   :  { %4436 = vmatmul.mubr.f32.gmra.mxu0 %v522_v35  ;;  %4468 = vmatprep.subr.mxu1 %v5391_v13  ;;  %v378_v16 = vmax.f32 %v5826_v52, 0.0  ;;  %v957_v35 = vld [vmem:[%s7807_s3 + $0x38] sm:$0xff] }
 0x19b   :  { %4469 = vmatpush3.msra.mxu1 %v962_v54 }
 0x19c   :  { %4470 = vmatprep.subr.mxu1 %v5391_v13 }
 0x19d   :  { %v179_v5 = vpop.permute.xlu1 %178  ;;  %4471 = vmatpush3.msra.mxu1 %v961_v0 }
 0x19e   :  { %v282_v14 = vmul.f32 %v5521_v30, %v179_v5  ;;  %v243_v11 = vmul.f32 %v5516_v29, %v179_v5  ;;  %4472 = vmatprep.subr.mxu1 %v5391_v13 }
 0x19f   :  { %4473 = vmatpush3.msra.mxu1 %v960_v36 }
 0x1a0   :  { %v313_v28 = vadd.f32 %v282_v14, %v242_v25  ;;  %4474 = vmatprep.subr.mxu1 %v5391_v13 }
 0x1a1   :  { %v184_v10 = vpop.permute.xlu1 %183  ;;  %4475 = vmatpush3.msra.mxu1 %v959_v44 }
 0x1a2   :  { %v5834_v15 = vadd.f32 %v5539_v41, %v313_v28  ;;  %v189_v47 = vpop.permute.xlu0 %188  ;;  %v244_v53 = vmul.f32 %v5516_v29, %v184_v10  ;;  %v283_v21 = vmul.f32 %v5521_v30, %v184_v10  ;;  %4476 = vmatprep.subr.mxu1 %v5391_v13  ;;  %v955_v10 = vld [vmem:[%s7807_s3 + $0x28] sm:$0xff] }
 0x1a3   :  { %v284_v48 = vmul.f32 %v5521_v30, %v189_v47  ;;  %v245_v32 = vmul.f32 %v5516_v29, %v189_v47  ;;  %4477 = vmatpush3.msra.mxu1 %v958_v62 }
 0x1a4   :  { %v314_v55 = vadd.f32 %v283_v21, %v243_v11  ;;  %v379_v18 = vmax.f32 %v5834_v15, 0.0  ;;  %4478 = vmatprep.subr.mxu1 %v5391_v13 }
 0x1a5   :  { %v315_v19 = vadd.f32 %v284_v48, %v244_v53  ;;  %v5278_v7 = vpop.permute.xlu1 %5277  ;;  %4479 = vmatpush3.msra.mxu1 %v957_v35 }
 0x1a6   :  { %v5850_v20 = vadd.f32 %v5539_v41, %v314_v55  ;;  %v194_v17 = vpop.permute.xlu0 %193  ;;  %v5280_v23 = vunpack.i.h.bf16 %v5278_v7  ;;  %v5279_v24 = vunpack.i.l.bf16 %v5278_v7  ;;  %v5291_v31 = vpack.i.bf16 %v379_v18, %v378_v16  ;;  %4480 = vmatprep.subr.mxu1 %v5391_v13 }
 0x1a7   :  { %v5858_v34 = vadd.f32 %v5539_v41, %v315_v19  ;;  %v285_v26 = vmul.f32 %v5521_v30, %v194_v17  ;;  %v246_v58 = vmul.f32 %v5516_v29, %v194_v17  ;;  %v954_v17 = vld [vmem:[%s7807_s3 + $0x20] sm:$0xff] }
 0x1a8   :  { %5292 = vrot.lane.b32.xlu0 %v5291_v31, %s5390_s1  ;;  %v523_v45 = vsel %vm508_vm0, %v371_v59, %v5279_v24  ;;  %v524_v46 = vsel %vm508_vm0, %v372_v27, %v5280_v23  ;;  %v380_v50 = vmax.f32 %v5850_v20, 0.0  ;;  %v953_v24 = vld [vmem:[%s7807_s3 + $0x18] sm:$0xff] }
 0x1a9   :  { %v316_v51 = vadd.f32 %v285_v26, %v245_v32  ;;  %v199_v56 = vpop.permute.xlu1 %198  ;;  %4438 = vmatprep.mubr.f32.mxu0 %v523_v45  ;;  %v381_v57 = vmax.f32 %v5858_v34, 0.0  ;;  %v952_v26 = vld [vmem:[%s7807_s3 + $0x10] sm:$0xff] }
 0x1aa   :  { %v5283_v61 = vpop.permute.xlu0 %5282  ;;  %v286_v49 = vmul.f32 %v5521_v30, %v199_v56  ;;  %4439 = vmatmul.mubr.f32.gmra.mxu0 %v524_v46  ;;  %v247_v40 = vmul.f32 %v5516_v29, %v199_v56 }
 0x1ab   :  { %v5285_v59 = vunpack.i.h.bf16 %v5283_v61  ;;  %v5284_v60 = vunpack.i.l.bf16 %v5283_v61  ;;  %v5296_v27 = vpack.i.bf16 %v381_v57, %v380_v50  ;;  %v5889_v63 = vadd.f32 %v5539_v41, %v316_v51 }
 0x1ac   :  { %v317_v1 = vadd.f32 %v286_v49, %v246_v58 }
 0x1ad   :  { %5297 = vrot.lane.b32.xlu1 %v5296_v27, %s5390_s1  ;;  %v204_v2 = vpop.permute.xlu1 %203  ;;  %v525_v4 = vsel %vm508_vm0, %v373_v37, %v5284_v60  ;;  %v526_v5 = vsel %vm508_vm0, %v374_v12, %v5285_v59  ;;  %v956_v37 = vld [vmem:[%s7807_s3 + $0x30] sm:$0xff]  ;;  %v382_v12 = vmax.f32 %v5889_v63, 0.0 }
 0x1ae   :  { %v5904_v25 = vadd.f32 %v5539_v41, %v317_v1  ;;  %v209_v14 = vpop.permute.xlu0 %208  ;;  %v248_v39 = vmul.f32 %v5516_v29, %v204_v2  ;;  %v287_v28 = vmul.f32 %v5521_v30, %v204_v2  ;;  %4441 = vmatprep.mubr.f32.mxu0 %v525_v4  ;;  %4481 = vmatpush3.msra.mxu1 %v956_v37 }
 0x1af   :  { %v288_v3 = vmul.f32 %v5521_v30, %v209_v14  ;;  %4442 = vmatmul.mubr.f32.gmra.mxu0 %v526_v5  ;;  %v249_v11 = vmul.f32 %v5516_v29, %v209_v14  ;;  %4482 = vmatprep.subr.mxu1 %v5391_v13 }
 0x1b0   :  { %v318_v42 = vadd.f32 %v287_v28, %v247_v40  ;;  %v383_v9 = vmax.f32 %v5904_v25, 0.0  ;;  %4483 = vmatpush3.msra.mxu1 %v955_v10 }
 0x1b1   :  { %v319_v47 = vadd.f32 %v288_v3, %v248_v39  ;;  %v214_v53 = vpop.permute.xlu1 %213  ;;  %4484 = vmatprep.subr.mxu1 %v5391_v13 }
 0x1b2   :  { %v5921_v21 = vadd.f32 %v5539_v41, %v318_v42  ;;  %v254_v48 = vpop.permute.xlu0 %253  ;;  %v250_v54 = vmul.f32 %v5516_v29, %v214_v53  ;;  %v289_v55 = vmul.f32 %v5521_v30, %v214_v53  ;;  %v5301_v0 = vpack.i.bf16 %v383_v9, %v382_v12  ;;  %4485 = vmatpush3.msra.mxu1 %v954_v17 }
 0x1b3   :  { %v5930_v19 = vadd.f32 %v5539_v41, %v319_v47  ;;  %v290_v7 = vmul.f32 %v5521_v30, %v254_v48  ;;  %4486 = vmatprep.subr.mxu1 %v5391_v13 }
 0x1b4   :  { %v320_v29 = vadd.f32 %v289_v55, %v249_v11  ;;  %5302 = vrot.lane.b32.xlu0 %v5301_v0, %s5390_s1  ;;  %v384_v23 = vmax.f32 %v5921_v21, 0.0  ;;  %4487 = vmatpush3.msra.mxu1 %v953_v24 }
 0x1b5   :  { %v321_v31 = vadd.f32 %v290_v7, %v250_v54  ;;  %v5288_v32 = vpop.permute.xlu1 %5287  ;;  %v385_v30 = vmax.f32 %v5930_v19, 0.0  ;;  %4488 = vmatprep.subr.mxu1 %v5391_v13 }
 0x1b6   :  { %v5948_v36 = vadd.f32 %v5539_v41, %v320_v29  ;;  %v5290_v44 = vunpack.i.h.bf16 %v5288_v32  ;;  %v5289_v45 = vunpack.i.l.bf16 %v5288_v32  ;;  %4489 = vmatpush3.msra.mxu1 %v952_v26 }
 0x1b7   :  { %v356_v46 = vadd.f32 %v5539_v41, %v321_v31  ;;  %v5306_v51 = vpack.i.bf16 %v385_v30, %v384_v23  ;;  %v951_v41 = vld [vmem:[%s7807_s3 + $0x8] sm:$0xff]  ;;  %4490 = vmatprep.subr.mxu1 %v5391_v13 }
 0x1b8   :  { %v527_v56 = vsel %vm508_vm0, %v375_v22, %v5289_v45  ;;  %v528_v58 = vsel %vm508_vm0, %v376_v43, %v5290_v44  ;;  %v386_v61 = vmax.f32 %v5948_v36, 0.0  ;;  %4491 = vmatpush3.msra.mxu1 %v951_v41  ;;  %v950_v22 = vld [vmem:[%s7807_s3] sm:$0xff] }
 0x1b9   :  { %5307 = vrot.lane.b32.xlu1 %v5306_v51, %s5390_s1  ;;  %4444 = vmatprep.mubr.f32.mxu0 %v527_v56  ;;  %v387_v49 = vmax.f32 %v356_v46, 0.0 }
 0x1ba   :  { %4445 = vmatmul.mubr.f32.gmra.mxu0 %v528_v58  ;;  %4492 = vmatprep.subr.mxu1 %v5391_v13 }
 0x1bb   :  { %v5311_v6 = vpack.i.bf16 %v387_v49, %v386_v61  ;;  %4493 = vmatpush3.msra.mxu1 %v950_v22 }
 0x1bc   :  { %4674 = vmatprep.subr.mxu1 %v5391_v13 }
 0x1bd   :  { %5312 = vrot.lane.b32.xlu0 %v5311_v6, %s5390_s1 }
 0x1c3   :  { %v4419_v43 = vpop.f32.mrf.mxu0 }
 0x1c4   :  { %v5984_v59 = vadd.f32 %v4419_v43, %v5981_v8 }
 0x1c5   :  { %v5986_v60 = vpop.f32.mrf.mxu0 }
 0x1c6   :  { %v776_v27 = vmax.f32 %v5984_v59, 0.0  ;;  %v627_v25 = vadd.f32 %v5981_v8, %v5986_v60 }
 0x1c8   :  { %v4422_v62 = vpop.f32.mrf.mxu0  ;;  %834 = vrot.lane.b32.xlu1 %v776_v27, %s5390_s1 }
 0x1c9   :  { %v5990_v1 = vadd.f32 %v4422_v62, %v5981_v8 }
 0x1ca   :  { %v636_v35 = vpop.f32.mrf.mxu0 }
 0x1cb   :  { %v778_v40 = vmax.f32 %v5990_v1, 0.0  ;;  %v5997_v2 = vadd.f32 %v5981_v8, %v636_v35 }
 0x1cc   :  { %v4425_v4 = vpop.f32.mrf.mxu0 }
 0x1cd   :  { %v777_v5 = vmax.f32 %v5997_v2, 0.0  ;;  %v6001_v14 = vadd.f32 %v4425_v4, %v5981_v8  ;;  %838 = vrot.lane.b32.xlu1 %v778_v40, %s5390_s1 }
 0x1ce   :  { %v646_v39 = vpop.f32.mrf.mxu0 }
 0x1cf   :  { %v780_v28 = vmax.f32 %v6001_v14, 0.0  ;;  %v6008_v3 = vadd.f32 %v5981_v8, %v646_v39  ;;  %836 = vrot.lane.b32.xlu0 %v777_v5, %s5390_s1 }
 0x1d1   :  { %v779_v37 = vmax.f32 %v6008_v3, 0.0  ;;  %842 = vrot.lane.b32.xlu1 %v780_v28, %s5390_s1 }
 0x1d3   :  { %840 = vrot.lane.b32.xlu0 %v779_v37, %s5390_s1 }
 0x1d9   :  { %v4428_v42 = vpop.f32.mrf.mxu0 }
 0x1da   :  { %v6021_v10 = vadd.f32 %v4428_v42, %v5981_v8 }
 0x1db   :  { %v656_v11 = vpop.f32.mrf.mxu0 }
 0x1dc   :  { %v782_v47 = vmax.f32 %v6021_v10, 0.0  ;;  %v6025_v53 = vadd.f32 %v5981_v8, %v656_v11 }
 0x1de   :  { %v781_v48 = vmax.f32 %v6025_v53, 0.0  ;;  %846 = vrot.lane.b32.xlu1 %v782_v47, %s5390_s1 }
 0x1e0   :  { %844 = vrot.lane.b32.xlu0 %v781_v48, %s5390_s1 }
 0x1e4   :  { %v4431_v54 = vpop.f32.mrf.mxu0 }
 0x1e5   :  { %v6035_v55 = vadd.f32 %v4431_v54, %v5981_v8 }
 0x1e6   :  { %v666_v0 = vpop.f32.mrf.mxu0 }
 0x1e7   :  { %v784_v7 = vmax.f32 %v6035_v55, 0.0  ;;  %v6039_v17 = vadd.f32 %v5981_v8, %v666_v0 }
 0x1e9   :  { %v783_v29 = vmax.f32 %v6039_v17, 0.0  ;;  %850 = vrot.lane.b32.xlu1 %v784_v7, %s5390_s1 }
 0x1eb   :  { %848 = vrot.lane.b32.xlu0 %v783_v29, %s5390_s1 }
 0x21a   :  { %v5293_v24 = vpop.permute.xlu0 %5292 }
 0x21b   :  { %v5295_v31 = vunpack.i.h.bf16 %v5293_v24  ;;  %v5294_v32 = vunpack.i.l.bf16 %v5293_v24 }
 0x21d   :  { %v529_v26 = vsel %vm508_vm0, %v377_v38, %v5294_v32  ;;  %v530_v44 = vsel %vm508_vm0, %v378_v16, %v5295_v31 }
 0x21e   :  { %4447 = vmatprep.mubr.f32.mxu0 %v529_v26 }
 0x21f   :  { %v5298_v45 = vpop.permute.xlu1 %5297  ;;  %4448 = vmatmul.mubr.f32.gmra.mxu0 %v530_v44 }
 0x220   :  { %v5300_v46 = vunpack.i.h.bf16 %v5298_v45  ;;  %v5299_v51 = vunpack.i.l.bf16 %v5298_v45 }
 0x222   :  { %v531_v56 = vsel %vm508_vm0, %v379_v18, %v5299_v51  ;;  %v532_v58 = vsel %vm508_vm0, %v380_v50, %v5300_v46 }
 0x223   :  { %4450 = vmatprep.mubr.f32.mxu0 %v531_v56 }
 0x224   :  { %4451 = vmatmul.mubr.f32.gmra.mxu0 %v532_v58 }
 0x226   :  { %v5303_v33 = vpop.permute.xlu0 %5302 }
 0x227   :  { %v5305_v38 = vunpack.i.h.bf16 %v5303_v33  ;;  %v5304_v52 = vunpack.i.l.bf16 %v5303_v33 }
 0x229   :  { %v533_v16 = vsel %vm508_vm0, %v381_v57, %v5304_v52  ;;  %v534_v41 = vsel %vm508_vm0, %v382_v12, %v5305_v38 }
 0x22a   :  { %4453 = vmatprep.mubr.f32.mxu0 %v533_v16 }
 0x22b   :  { %v5308_v15 = vpop.permute.xlu1 %5307  ;;  %4454 = vmatmul.mubr.f32.gmra.mxu0 %v534_v41 }
 0x22c   :  { %v5310_v18 = vunpack.i.h.bf16 %v5308_v15  ;;  %v5309_v20 = vunpack.i.l.bf16 %v5308_v15 }
 0x22e   :  { %v535_v50 = vsel %vm508_vm0, %v383_v9, %v5309_v20  ;;  %v536_v49 = vsel %vm508_vm0, %v384_v23, %v5310_v18  ;;  %v775_v9 = vmax.f32 %v627_v25, 0.0 }
 0x22f   :  { %v5313_v34 = vpop.permute.xlu0 %5312  ;;  %4456 = vmatprep.mubr.f32.mxu0 %v535_v50 }
 0x230   :  { %v5315_v57 = vunpack.i.h.bf16 %v5313_v34  ;;  %v5314_v6 = vunpack.i.l.bf16 %v5313_v34  ;;  %4457 = vmatmul.mubr.f32.gmra.mxu0 %v536_v49 }
 0x232   :  { %v537_v63 = vsel %vm508_vm0, %v385_v30, %v5314_v6  ;;  %v538_v12 = vsel %vm508_vm0, %v386_v61, %v5315_v57 }
 0x233   :  { %4459 = vmatprep.mubr.f32.mxu0 %v537_v63 }
 0x234   :  { %4460 = vmatmul.mubr.f32.gmra.mxu0 %v538_v12 }
 0x23a   :  { %v835_v21 = vpop.permute.xlu1 %834 }
 0x23b   :  { %v921_v23 = vsel %vm508_vm0, %v775_v9, %v835_v21  ;;  %v1365_v21 = vld [vmem:[%s7808_s4 + $0x78] sm:$0xff] }
 0x23c   :  { %4495 = vmatmul.mubr.f32.vlgmr.msra.gmra.mxu1 %v921_v23  ;;  %4581 = vmatprep.subr.mxu0 %v1365_v21 }
 0x23d   :  { %4497 = vmatprep.mubr.msk.f32.mxu1 %vm5392_vm1, %v5391_v13  ;;  %4582 = vmatpush3.msra.mxu0 %v1365_v21 }
 0x23f   :  { %v839_v36 = vpop.permute.xlu1 %838 }
 0x240   :  { %v923_v61 = vsel %vm508_vm0, %v777_v5, %v839_v36  ;;  %v1364_v36 = vld [vmem:[%s7808_s4 + $0x70] sm:$0xff] }
 0x241   :  { %v837_v19 = vpop.permute.xlu0 %836  ;;  %4583 = vmatprep.subr.mxu0 %v1364_v36 }
 0x242   :  { %v922_v30 = vsel %vm508_vm0, %v776_v27, %v837_v19  ;;  %4584 = vmatpush3.msra.mxu0 %v1364_v36 }
 0x243   :  { %4498 = vmatmul.mubr.f32.gmra.mxu1 %v922_v30  ;;  %v843_v59 = vpop.permute.xlu1 %842 }
 0x244   :  { %4500 = vmatprep.mubr.msk.f32.mxu1 %vm5392_vm1, %v5391_v13  ;;  %v925_v60 = vsel %vm508_vm0, %v779_v37, %v843_v59 }
 0x245   :  { %v841_v22 = vpop.permute.xlu0 %840 }
 0x246   :  { %v924_v43 = vsel %vm508_vm0, %v778_v40, %v841_v22 }
 0x247   :  { %4501 = vmatmul.mubr.f32.gmra.mxu1 %v923_v61 }
 0x248   :  { %4503 = vmatprep.mubr.msk.f32.mxu1 %vm5392_vm1, %v5391_v13 }
 0x24b   :  { %4504 = vmatmul.mubr.f32.gmra.mxu1 %v924_v43 }
 0x24c   :  { %4506 = vmatprep.mubr.msk.f32.mxu1 %vm5392_vm1, %v5391_v13 }
 0x24f   :  { %4507 = vmatmul.mubr.f32.gmra.mxu1 %v925_v60 }
 0x250   :  { %4509 = vmatprep.mubr.msk.f32.mxu1 %vm5392_vm1, %v5391_v13  ;;  %v847_v1 = vpop.permute.xlu1 %846 }
 0x251   :  { %v927_v4 = vsel %vm508_vm0, %v781_v48, %v847_v1 }
 0x252   :  { %v845_v27 = vpop.permute.xlu0 %844 }
 0x253   :  { %v926_v62 = vsel %vm508_vm0, %v780_v28, %v845_v27  ;;  %v1363_v27 = vld [vmem:[%s7808_s4 + $0x68] sm:$0xff] }
 0x254   :  { %4510 = vmatmul.mubr.f32.gmra.mxu1 %v926_v62  ;;  %4585 = vmatprep.subr.mxu0 %v1363_v27 }
 0x255   :  { %v4434_v35 = vpop.f32.mrf.mxu0  ;;  %4512 = vmatprep.mubr.msk.f32.mxu1 %vm5392_vm1, %v5391_v13  ;;  %4586 = vmatpush3.msra.mxu0 %v1363_v27 }
 0x256   :  { %v682_v40 = vadd.f32 %v4434_v35, %v5981_v8 }
 0x257   :  { %v676_v2 = vpop.f32.mrf.mxu0 }
 0x258   :  { %v786_v5 = vmax.f32 %v682_v40, 0.0  ;;  %v677_v39 = vadd.f32 %v5981_v8, %v676_v2  ;;  %4513 = vmatmul.mubr.f32.gmra.mxu1 %v927_v4  ;;  %v1362_v40 = vld [vmem:[%s7808_s4 + $0x60] sm:$0xff]  ;;  %v1361_v4 = vld [vmem:[%s7808_s4 + $0x58] sm:$0xff] }
 0x259   :  { %4515 = vmatprep.mubr.msk.f32.mxu1 %vm5392_vm1, %v5391_v13  ;;  %4587 = vmatprep.subr.mxu0 %v1362_v40 }
 0x25a   :  { %v785_v14 = vmax.f32 %v677_v39, 0.0  ;;  %v4437_v28 = vpop.f32.mrf.mxu0  ;;  %854 = vrot.lane.b32.xlu1 %v786_v5, %s5390_s1  ;;  %4588 = vmatpush3.msra.mxu0 %v1362_v40 }
 0x25b   :  { %v6117_v3 = vadd.f32 %v4437_v28, %v5981_v8  ;;  %v851_v54 = vpop.permute.xlu1 %850  ;;  %4589 = vmatprep.subr.mxu0 %v1361_v4 }
 0x25c   :  { %v686_v37 = vpop.f32.mrf.mxu0  ;;  %852 = vrot.lane.b32.xlu0 %v785_v14, %s5390_s1  ;;  %v929_v24 = vsel %vm508_vm0, %v783_v29, %v851_v54  ;;  %4590 = vmatpush3.msra.mxu0 %v1361_v4  ;;  %v1359_v54 = vld [vmem:[%s7808_s4 + $0x48] sm:$0xff] }
 0x25d   :  { %v788_v42 = vmax.f32 %v6117_v3, 0.0  ;;  %v687_v11 = vadd.f32 %v5981_v8, %v686_v37  ;;  %v849_v53 = vpop.permute.xlu0 %848 }
 0x25e   :  { %v928_v48 = vsel %vm508_vm0, %v782_v47, %v849_v53 }
 0x25f   :  { %v787_v0 = vmax.f32 %v687_v11, 0.0  ;;  %858 = vrot.lane.b32.xlu1 %v788_v42, %s5390_s1  ;;  %4516 = vmatmul.mubr.f32.gmra.mxu1 %v928_v48 }
 0x260   :  { %4518 = vmatprep.mubr.msk.f32.mxu1 %vm5392_vm1, %v5391_v13 }
 0x261   :  { %856 = vrot.lane.b32.xlu0 %v787_v0, %s5390_s1 }
 0x263   :  { %4519 = vmatmul.mubr.f32.gmra.mxu1 %v929_v24 }
 0x264   :  { %4521 = vmatprep.mubr.msk.f32.mxu1 %vm5392_vm1, %v5391_v13 }
 0x26a   :  { %v4440_v10 = vpop.f32.mrf.mxu0 }
 0x26b   :  { %v6137_v47 = vadd.f32 %v4440_v10, %v5981_v8 }
 0x26c   :  { %v696_v31 = vpop.f32.mrf.mxu0 }
 0x26d   :  { %v790_v32 = vmax.f32 %v6137_v47, 0.0  ;;  %v6141_v26 = vadd.f32 %v5981_v8, %v696_v31 }
 0x26f   :  { %v789_v44 = vmax.f32 %v6141_v26, 0.0  ;;  %v4443_v45 = vpop.f32.mrf.mxu0  ;;  %862 = vrot.lane.b32.xlu1 %v790_v32, %s5390_s1 }
 0x270   :  { %v6148_v17 = vadd.f32 %v4443_v45, %v5981_v8 }
 0x271   :  { %v706_v29 = vpop.f32.mrf.mxu0  ;;  %860 = vrot.lane.b32.xlu0 %v789_v44, %s5390_s1 }
 0x272   :  { %v792_v46 = vmax.f32 %v6148_v17, 0.0  ;;  %v6153_v51 = vadd.f32 %v5981_v8, %v706_v29 }
 0x274   :  { %v791_v56 = vmax.f32 %v6153_v51, 0.0  ;;  %866 = vrot.lane.b32.xlu1 %v792_v46, %s5390_s1 }
 0x276   :  { %864 = vrot.lane.b32.xlu0 %v791_v56, %s5390_s1 }
 0x27a   :  { %v4446_v58 = vpop.f32.mrf.mxu0 }
 0x27b   :  { %v6163_v33 = vadd.f32 %v4446_v58, %v5981_v8 }
 0x27c   :  { %v716_v38 = vpop.f32.mrf.mxu0 }
 0x27d   :  { %v794_v52 = vmax.f32 %v6163_v33, 0.0  ;;  %v6167_v16 = vadd.f32 %v5981_v8, %v716_v38 }
 0x27f   :  { %v793_v41 = vmax.f32 %v6167_v16, 0.0  ;;  %870 = vrot.lane.b32.xlu1 %v794_v52, %s5390_s1  ;;  %v1354_v16 = vld [vmem:[%s7808_s4 + $0x20] sm:$0xff] }
 0x281   :  { %868 = vrot.lane.b32.xlu0 %v793_v41, %s5390_s1 }
 0x2cc   :  { %v855_v20 = vpop.permute.xlu1 %854 }
 0x2cd   :  { %v931_v50 = vsel %vm508_vm0, %v785_v14, %v855_v20  ;;  %v1353_v20 = vld [vmem:[%s7808_s4 + $0x18] sm:$0xff] }
 0x2ce   :  { %v853_v15 = vpop.permute.xlu0 %852 }
 0x2cf   :  { %v930_v18 = vsel %vm508_vm0, %v784_v7, %v853_v15  ;;  %v1356_v15 = vld [vmem:[%s7808_s4 + $0x30] sm:$0xff] }
 0x2d0   :  { %4522 = vmatmul.mubr.f32.gmra.mxu1 %v930_v18 }
 0x2d1   :  { %4524 = vmatprep.mubr.msk.f32.mxu1 %vm5392_vm1, %v5391_v13  ;;  %v859_v57 = vpop.permute.xlu1 %858 }
 0x2d2   :  { %v933_v55 = vsel %vm508_vm0, %v787_v0, %v859_v57 }
 0x2d3   :  { %v857_v49 = vpop.permute.xlu0 %856 }
 0x2d4   :  { %4525 = vmatmul.mubr.f32.gmra.mxu1 %v931_v50  ;;  %v932_v34 = vsel %vm508_vm0, %v786_v5, %v857_v49  ;;  %v1352_v49 = vld [vmem:[%s7808_s4 + $0x10] sm:$0xff] }
 0x2d5   :  { %4527 = vmatprep.mubr.msk.f32.mxu1 %vm5392_vm1, %v5391_v13 }
 0x2d8   :  { %4528 = vmatmul.mubr.f32.gmra.mxu1 %v932_v34  ;;  %v1351_v34 = vld [vmem:[%s7808_s4 + $0x8] sm:$0xff] }
 0x2d9   :  { %4530 = vmatprep.mubr.msk.f32.mxu1 %vm5392_vm1, %v5391_v13 }
 0x2dc   :  { %4531 = vmatmul.mubr.f32.gmra.mxu1 %v933_v55  ;;  %v1350_v55 = vld [vmem:[%s7808_s4] sm:$0xff] }
 0x2dd   :  { %4533 = vmatprep.mubr.msk.f32.mxu1 %vm5392_vm1, %v5391_v13 }
 0x2df   :  { %v4449_v7 = vpop.f32.mrf.mxu0 }
 0x2e0   :  { %v6191_v6 = vadd.f32 %v4449_v7, %v5981_v8  ;;  %v6336_v7 = vld [vmem:[%s7807_s3 + $0x80] ss:$0 sm:$0xff] }
 0x2e1   :  { %v726_v63 = vpop.f32.mrf.mxu0  ;;  %v863_v61 = vpop.permute.xlu1 %862 }
 0x2e2   :  { %v796_v12 = vmax.f32 %v6191_v6, 0.0  ;;  %v6195_v25 = vadd.f32 %v5981_v8, %v726_v63  ;;  %v935_v62 = vsel %vm508_vm0, %v789_v44, %v863_v61 }
 0x2e3   :  { %v861_v9 = vpop.permute.xlu0 %860 }
 0x2e4   :  { %v795_v23 = vmax.f32 %v6195_v25, 0.0  ;;  %v4452_v19 = vpop.f32.mrf.mxu0  ;;  %874 = vrot.lane.b32.xlu1 %v796_v12, %s5390_s1  ;;  %v934_v30 = vsel %vm508_vm0, %v788_v42, %v861_v9  ;;  %v1360_v42 = vld [vmem:[%s7808_s4 + $0x50] sm:$0xff] }
 0x2e5   :  { %v6211_v22 = vadd.f32 %v4452_v19, %v5981_v8  ;;  %4534 = vmatmul.mubr.f32.gmra.mxu1 %v934_v30  ;;  %4591 = vmatprep.subr.mxu0 %v1360_v42 }
 0x2e6   :  { %v736_v43 = vpop.f32.mrf.mxu0  ;;  %872 = vrot.lane.b32.xlu0 %v795_v23, %s5390_s1  ;;  %4536 = vmatprep.mubr.msk.f32.mxu1 %vm5392_vm1, %v5391_v13  ;;  %v867_v14 = vpop.permute.xlu1 %866 }
 0x2e7   :  { %v798_v59 = vmax.f32 %v6211_v22, 0.0  ;;  %v6220_v60 = vadd.f32 %v5981_v8, %v736_v43  ;;  %v937_v48 = vsel %vm508_vm0, %v791_v56, %v867_v14  ;;  %4592 = vmatpush3.msra.mxu0 %v1360_v42  ;;  %v1357_v56 = vld [vmem:[%s7808_s4 + $0x38] sm:$0xff] }
 0x2e8   :  { %v865_v35 = vpop.permute.xlu0 %864  ;;  %4593 = vmatprep.subr.mxu0 %v1359_v54 }
 0x2e9   :  { %v797_v1 = vmax.f32 %v6220_v60, 0.0  ;;  %878 = vrot.lane.b32.xlu1 %v798_v59, %s5390_s1  ;;  %4537 = vmatmul.mubr.f32.gmra.mxu1 %v935_v62  ;;  %v936_v39 = vsel %vm508_vm0, %v790_v32, %v865_v35  ;;  %v1358_v32 = vld [vmem:[%s7808_s4 + $0x40] sm:$0xff] }
 0x2ea   :  { %4539 = vmatprep.mubr.msk.f32.mxu1 %vm5392_vm1, %v5391_v13  ;;  %4594 = vmatpush3.msra.mxu0 %v1359_v54 }
 0x2eb   :  { %876 = vrot.lane.b32.xlu0 %v797_v1, %s5390_s1  ;;  %v4455_v2 = vpop.f32.mrf.mxu0  ;;  %4595 = vmatprep.subr.mxu0 %v1358_v32 }
 0x2ec   :  { %v6242_v5 = vadd.f32 %v4455_v2, %v5981_v8  ;;  %4596 = vmatpush3.msra.mxu0 %v1358_v32 }
 0x2ed   :  { %v746_v28 = vpop.f32.mrf.mxu0  ;;  %4540 = vmatmul.mubr.f32.gmra.mxu1 %v936_v39  ;;  %4597 = vmatprep.subr.mxu0 %v1357_v56 }
 0x2ee   :  { %v800_v3 = vmax.f32 %v6242_v5, 0.0  ;;  %v6249_v37 = vadd.f32 %v5981_v8, %v746_v28  ;;  %4542 = vmatprep.mubr.msk.f32.mxu1 %vm5392_vm1, %v5391_v13  ;;  %4598 = vmatpush3.msra.mxu0 %v1357_v56 }
 0x2ef   :  { %4599 = vmatprep.subr.mxu0 %v1356_v15 }
 0x2f0   :  { %v799_v11 = vmax.f32 %v6249_v37, 0.0  ;;  %v4458_v53 = vpop.f32.mrf.mxu0  ;;  %882 = vrot.lane.b32.xlu1 %v800_v3, %s5390_s1  ;;  %4600 = vmatpush3.msra.mxu0 %v1356_v15 }
 0x2f1   :  { %v6267_v0 = vadd.f32 %v4458_v53, %v5981_v8  ;;  %4543 = vmatmul.mubr.f32.gmra.mxu1 %v937_v48  ;;  %v871_v45 = vpop.permute.xlu1 %870 }
 0x2f2   :  { %v756_v24 = vpop.f32.mrf.mxu0  ;;  %880 = vrot.lane.b32.xlu0 %v799_v11, %s5390_s1  ;;  %4545 = vmatprep.mubr.msk.f32.mxu1 %vm5392_vm1, %v5391_v13  ;;  %v939_v38 = vsel %vm508_vm0, %v793_v41, %v871_v45 }
 0x2f3   :  { %v802_v10 = vmax.f32 %v6267_v0, 0.0  ;;  %v6276_v47 = vadd.f32 %v5981_v8, %v756_v24  ;;  %v869_v31 = vpop.permute.xlu0 %868 }
 0x2f4   :  { %v4461_v26 = vpop.f32.mrf.mxu0  ;;  %v938_v44 = vsel %vm508_vm0, %v792_v46, %v869_v31 }
 0x2f5   :  { %v801_v29 = vmax.f32 %v6276_v47, 0.0  ;;  %v772_v51 = vadd.f32 %v4461_v26, %v5981_v8  ;;  %886 = vrot.lane.b32.xlu1 %v802_v10, %s5390_s1  ;;  %4546 = vmatmul.mubr.f32.gmra.mxu1 %v938_v44 }
 0x2f6   :  { %v766_v58 = vpop.f32.mrf.mxu0  ;;  %4548 = vmatprep.mubr.msk.f32.mxu1 %vm5392_vm1, %v5391_v13 }
 0x2f7   :  { %v804_v17 = vmax.f32 %v772_v51, 0.0  ;;  %v6295_v46 = vadd.f32 %v5981_v8, %v766_v58  ;;  %884 = vrot.lane.b32.xlu0 %v801_v29, %s5390_s1  ;;  %v1355_v8 = vld [vmem:[%s7808_s4 + $0x28] sm:$0xff] }
 0x2f8   :  { %4601 = vmatprep.subr.mxu0 %v1355_v8 }
 0x2f9   :  { %v803_v18 = vmax.f32 %v6295_v46, 0.0  ;;  %890 = vrot.lane.b32.xlu1 %v804_v17, %s5390_s1  ;;  %4549 = vmatmul.mubr.f32.gmra.mxu1 %v939_v38 }
 0x2fa   :  { %4551 = vmatprep.mubr.msk.f32.mxu1 %vm5392_vm1, %v5391_v13  ;;  %4602 = vmatpush3.msra.mxu0 %v1355_v8 }
 0x2fb   :  { %888 = vrot.lane.b32.xlu0 %v803_v18, %s5390_s1  ;;  %4603 = vmatprep.subr.mxu0 %v1354_v16 }
 0x2fc   :  { %v6319_v41 = vpop.f32.mrf.mxu1  ;;  %4604 = vmatpush3.msra.mxu0 %v1354_v16 }
 0x2fd   :  { %4605 = vmatprep.subr.mxu0 %v1353_v20 }
 0x2fe   :  { %v4496_v50 = vpop.f32.mrf.mxu1  ;;  %4606 = vmatpush3.msra.mxu0 %v1353_v20 }
 0x2ff   :  { %4607 = vmatprep.subr.mxu0 %v1352_v49 }
 0x300   :  { %4608 = vmatpush3.msra.mxu0 %v1352_v49 }
 0x301   :  { %4609 = vmatprep.subr.mxu0 %v1351_v34 }
 0x302   :  { %4610 = vmatpush3.msra.mxu0 %v1351_v34 }
 0x303   :  { %v1042_v57 = vpop.f32.mrf.mxu1  ;;  %4611 = vmatprep.subr.mxu0 %v1350_v55 }
 0x304   :  { %v6339_v9 = vadd.f32 %v6336_v7, %v1042_v57  ;;  %4612 = vmatpush3.msra.mxu0 %v1350_v55 }
 0x305   :  { %v4499_v63 = vpop.f32.mrf.mxu1  ;;  %4655 = vmatprep.subr.mxu0 %v5391_v13 }
 0x306   :  { %v1182_v36 = vmax.f32 %v6339_v9, 0.0 }
 0x307   :  { %v1047_v21 = vpop.f32.mrf.mxu1 }
 0x308   :  { %v6342_v19 = vadd.f32 %v6336_v7, %v1047_v21 }
 0x309   :  { %v4502_v30 = vpop.f32.mrf.mxu1 }
 0x30a   :  { %v1183_v61 = vmax.f32 %v6342_v19, 0.0 }
 0x30b   :  { %v1052_v43 = vpop.f32.mrf.mxu1 }
 0x30c   :  { %v5316_v27 = vpack.i.bf16 %v1183_v61, %v1182_v36  ;;  %v6352_v35 = vadd.f32 %v6336_v7, %v1052_v43 }
 0x30d   :  { %v4505_v62 = vpop.f32.mrf.mxu1 }
 0x30e   :  { %5317 = vrot.lane.b32.xlu0 %v5316_v27, %s5390_s1  ;;  %v1184_v39 = vmax.f32 %v6352_v35, 0.0 }
 0x30f   :  { %v1057_v40 = vpop.f32.mrf.mxu1 }
 0x310   :  { %v6356_v2 = vadd.f32 %v6336_v7, %v1057_v40 }
 0x311   :  { %v4508_v4 = vpop.f32.mrf.mxu1 }
 0x312   :  { %v1185_v14 = vmax.f32 %v6356_v2, 0.0 }
 0x314   :  { %v5321_v28 = vpack.i.bf16 %v1185_v14, %v1184_v39  ;;  %v1062_v42 = vpop.f32.mrf.mxu1 }
 0x315   :  { %v6366_v48 = vadd.f32 %v6336_v7, %v1062_v42 }
 0x316   :  { %5322 = vrot.lane.b32.xlu1 %v5321_v28, %s5390_s1  ;;  %v4511_v53 = vpop.f32.mrf.mxu1 }
 0x317   :  { %v1186_v32 = vmax.f32 %v6366_v48, 0.0 }
 0x318   :  { %v1067_v54 = vpop.f32.mrf.mxu1 }
 0x319   :  { %v6369_v24 = vadd.f32 %v6336_v7, %v1067_v54 }
 0x31a   :  { %v4514_v31 = vpop.f32.mrf.mxu1 }
 0x31b   :  { %v1187_v26 = vmax.f32 %v6369_v24, 0.0 }
 0x31d   :  { %v5326_v44 = vpack.i.bf16 %v1187_v26, %v1186_v32 }
 0x31f   :  { %5327 = vrot.lane.b32.xlu0 %v5326_v44, %s5390_s1  ;;  %v1072_v45 = vpop.f32.mrf.mxu1 }
 0x320   :  { %v6379_v56 = vadd.f32 %v6336_v7, %v1072_v45 }
 0x321   :  { %v4517_v51 = vpop.f32.mrf.mxu1 }
 0x322   :  { %v1188_v15 = vmax.f32 %v6379_v56, 0.0 }
 0x323   :  { %v1077_v58 = vpop.f32.mrf.mxu1 }
 0x324   :  { %v6382_v17 = vadd.f32 %v6336_v7, %v1077_v58 }
 0x325   :  { %v4520_v38 = vpop.f32.mrf.mxu1 }
 0x326   :  { %v1189_v8 = vmax.f32 %v6382_v17, 0.0 }
 0x328   :  { %v5331_v16 = vpack.i.bf16 %v1189_v8, %v1188_v15 }
 0x32a   :  { %5332 = vrot.lane.b32.xlu1 %v5331_v16, %s5390_s1 }
 0x356   :  { %v875_v49 = vpop.permute.xlu1 %874 }
 0x357   :  { %v941_v34 = vsel %vm508_vm0, %v795_v23, %v875_v49 }
 0x358   :  { %v873_v20 = vpop.permute.xlu0 %872 }
 0x359   :  { %v940_v50 = vsel %vm508_vm0, %v794_v52, %v873_v20 }
 0x35a   :  { %4552 = vmatmul.mubr.f32.gmra.mxu1 %v940_v50 }
 0x35b   :  { %4554 = vmatprep.mubr.msk.f32.mxu1 %vm5392_vm1, %v5391_v13  ;;  %v879_v55 = vpop.permute.xlu1 %878 }
 0x35c   :  { %v943_v52 = vsel %vm508_vm0, %v797_v1, %v879_v55 }
 0x35d   :  { %v877_v57 = vpop.permute.xlu0 %876 }
 0x35e   :  { %4555 = vmatmul.mubr.f32.gmra.mxu1 %v941_v34  ;;  %v942_v33 = vsel %vm508_vm0, %v796_v12, %v877_v57 }
 0x35f   :  { %4557 = vmatprep.mubr.msk.f32.mxu1 %vm5392_vm1, %v5391_v13 }
 0x362   :  { %4558 = vmatmul.mubr.f32.gmra.mxu1 %v942_v33  ;;  %v883_v23 = vpop.permute.xlu1 %882 }
 0x363   :  { %4560 = vmatprep.mubr.msk.f32.mxu1 %vm5392_vm1, %v5391_v13  ;;  %v945_v12 = vsel %vm508_vm0, %v799_v11, %v883_v23 }
 0x364   :  { %v881_v25 = vpop.permute.xlu0 %880 }
 0x365   :  { %v944_v6 = vsel %vm508_vm0, %v798_v59, %v881_v25 }
 0x366   :  { %4561 = vmatmul.mubr.f32.gmra.mxu1 %v943_v52 }
 0x367   :  { %4563 = vmatprep.mubr.msk.f32.mxu1 %vm5392_vm1, %v5391_v13  ;;  %v887_v1 = vpop.permute.xlu1 %886 }
 0x368   :  { %v947_v59 = vsel %vm508_vm0, %v801_v29, %v887_v1 }
 0x369   :  { %v885_v60 = vpop.permute.xlu0 %884 }
 0x36a   :  { %4564 = vmatmul.mubr.f32.gmra.mxu1 %v944_v6  ;;  %v946_v22 = vsel %vm508_vm0, %v800_v3, %v885_v60  ;;  %v1038_v3 = vadd.f32 %v6336_v7, %v6319_v41 }
 0x36b   :  { %4566 = vmatprep.mubr.msk.f32.mxu1 %vm5392_vm1, %v5391_v13  ;;  %v891_v11 = vpop.permute.xlu1 %890 }
 0x36c   :  { %v949_v47 = vsel %vm508_vm0, %v803_v18, %v891_v11  ;;  %v1181_v0 = vmax.f32 %v1038_v3, 0.0 }
 0x36d   :  { %v889_v37 = vpop.permute.xlu0 %888 }
 0x36e   :  { %4567 = vmatmul.mubr.f32.gmra.mxu1 %v945_v12  ;;  %v948_v5 = vsel %vm508_vm0, %v802_v10, %v889_v37 }
 0x36f   :  { %4569 = vmatprep.mubr.msk.f32.mxu1 %vm5392_vm1, %v5391_v13 }
 0x372   :  { %4570 = vmatmul.mubr.f32.gmra.mxu1 %v946_v22 }
 0x373   :  { %4572 = vmatprep.mubr.msk.f32.mxu1 %vm5392_vm1, %v5391_v13 }
 0x376   :  { %4573 = vmatmul.mubr.f32.gmra.mxu1 %v947_v59 }
 0x377   :  { %4575 = vmatprep.mubr.msk.f32.mxu1 %vm5392_vm1, %v5391_v13 }
 0x37a   :  { %4576 = vmatmul.mubr.f32.gmra.mxu1 %v948_v5 }
 0x37b   :  { %4578 = vmatprep.mubr.msk.f32.mxu1 %vm5392_vm1, %v5391_v13 }
 0x37e   :  { %4579 = vmatmul.mubr.f32.gmra.mxu1 %v949_v47 }
 0x37f   :  { %4690 = vmatprep.mubr.msk.f32.mxu1 %vm5392_vm1, %v5391_v13 }
 0x380   :  { %v5318_v29 = vpop.permute.xlu0 %5317 }
 0x381   :  { %v5320_v63 = vunpack.i.h.bf16 %v5318_v29  ;;  %v5319_v10 = vunpack.i.l.bf16 %v5318_v29 }
 0x383   :  { %v1322_v21 = vsel %vm508_vm0, %v1181_v0, %v5319_v10  ;;  %v1323_v30 = vsel %vm508_vm0, %v1182_v36, %v5320_v63  ;;  %v1603_v10 = vld [vmem:[%s7809_s5 + $0x38] sm:$0xff] }
 0x384   :  { %4613 = vmatprep.mubr.f32.mxu0 %v1322_v21  ;;  %4675 = vmatpush3.msra.mxu1 %v1603_v10 }
 0x385   :  { %4614 = vmatmul.mubr.f32.vlgmr.msra.gmra.mxu0 %v1323_v30  ;;  %4676 = vmatprep.subr.mxu1 %v5391_v13 }
 0x388   :  { %v5323_v41 = vpop.permute.xlu1 %5322 }
 0x389   :  { %v5325_v46 = vunpack.i.h.bf16 %v5323_v41  ;;  %v5324_v43 = vunpack.i.l.bf16 %v5323_v41  ;;  %v1602_v41 = vld [vmem:[%s7809_s5 + $0x30] sm:$0xff] }
 0x38a   :  { %4677 = vmatpush3.msra.mxu1 %v1602_v41 }
 0x38b   :  { %v1324_v18 = vsel %vm508_vm0, %v1183_v61, %v5324_v43  ;;  %v1325_v27 = vsel %vm508_vm0, %v1184_v39, %v5325_v46  ;;  %4678 = vmatprep.subr.mxu1 %v5391_v13  ;;  %v1601_v43 = vld [vmem:[%s7809_s5 + $0x28] sm:$0xff] }
 0x38c   :  { %4616 = vmatprep.mubr.f32.mxu0 %v1324_v18  ;;  %4679 = vmatpush3.msra.mxu1 %v1601_v43  ;;  %v1600_v18 = vld [vmem:[%s7809_s5 + $0x20] sm:$0xff] }
 0x38d   :  { %4617 = vmatmul.mubr.f32.gmra.mxu0 %v1325_v27  ;;  %4680 = vmatprep.subr.mxu1 %v5391_v13  ;;  %v1599_v27 = vld [vmem:[%s7809_s5 + $0x18] sm:$0xff] }
 0x38e   :  { %4681 = vmatpush3.msra.mxu1 %v1600_v18  ;;  %v1632_v18 = vld [vmem:[%s7809_s5 + $0x120] sm:$0xff] }
 0x38f   :  { %4682 = vmatprep.subr.mxu1 %v5391_v13 }
 0x390   :  { %v1082_v62 = vpop.f32.mrf.mxu1  ;;  %4683 = vmatpush3.msra.mxu1 %v1599_v27 }
 0x391   :  { %v5328_v40 = vpop.permute.xlu0 %5327  ;;  %v6454_v28 = vadd.f32 %v6336_v7, %v1082_v62  ;;  %4684 = vmatprep.subr.mxu1 %v5391_v13  ;;  %v1598_v62 = vld [vmem:[%s7809_s5 + $0x10] sm:$0xff] }
 0x392   :  { %v5330_v9 = vunpack.i.h.bf16 %v5328_v40  ;;  %v5329_v4 = vunpack.i.l.bf16 %v5328_v40  ;;  %v4523_v36 = vpop.f32.mrf.mxu1  ;;  %4685 = vmatpush3.msra.mxu1 %v1598_v62  ;;  %v1597_v40 = vld [vmem:[%s7809_s5 + $0x8] sm:$0xff] }
 0x393   :  { %v1190_v53 = vmax.f32 %v6454_v28, 0.0  ;;  %4686 = vmatprep.subr.mxu1 %v5391_v13 }
 0x394   :  { %v1087_v42 = vpop.f32.mrf.mxu1  ;;  %v1326_v19 = vsel %vm508_vm0, %v1185_v14, %v5329_v4  ;;  %v1327_v61 = vsel %vm508_vm0, %v1186_v32, %v5330_v9  ;;  %4687 = vmatpush3.msra.mxu1 %v1597_v40  ;;  %v1596_v9 = vld [vmem:[%s7809_s5] sm:$0xff] }
 0x395   :  { %v6463_v35 = vadd.f32 %v6336_v7, %v1087_v42  ;;  %4619 = vmatprep.mubr.f32.mxu0 %v1326_v19  ;;  %4688 = vmatprep.subr.mxu1 %v5391_v13 }
 0x396   :  { %4620 = vmatmul.mubr.f32.gmra.mxu0 %v1327_v61  ;;  %v4526_v39 = vpop.f32.mrf.mxu1  ;;  %4689 = vmatpush3.msra.mxu1 %v1596_v9 }
 0x397   :  { %v1191_v54 = vmax.f32 %v6463_v35, 0.0  ;;  %4712 = vmatprep.subr.mxu1 %v5391_v13 }
 0x398   :  { %v1092_v31 = vpop.f32.mrf.mxu1 }
 0x399   :  { %v5336_v2 = vpack.i.bf16 %v1191_v54, %v1190_v53  ;;  %v6472_v48 = vadd.f32 %v6336_v7, %v1092_v31 }
 0x39a   :  { %v4529_v14 = vpop.f32.mrf.mxu1 }
 0x39b   :  { %5337 = vrot.lane.b32.xlu0 %v5336_v2, %s5390_s1  ;;  %v1192_v16 = vmax.f32 %v6472_v48, 0.0 }
 0x39c   :  { %v5333_v32 = vpop.permute.xlu1 %5332  ;;  %v1097_v44 = vpop.f32.mrf.mxu1 }
 0x39d   :  { %v5335_v45 = vunpack.i.h.bf16 %v5333_v32  ;;  %v5334_v51 = vunpack.i.l.bf16 %v5333_v32  ;;  %v6476_v58 = vadd.f32 %v6336_v7, %v1097_v44  ;;  %v1634_v44 = vld [vmem:[%s7809_s5 + $0x130] sm:$0xff] }
 0x39e   :  { %v4532_v38 = vpop.f32.mrf.mxu1 }
 0x39f   :  { %v1193_v20 = vmax.f32 %v6476_v58, 0.0  ;;  %v1328_v50 = vsel %vm508_vm0, %v1187_v26, %v5334_v51  ;;  %v1329_v49 = vsel %vm508_vm0, %v1188_v15, %v5335_v45 }
 0x3a0   :  { %4622 = vmatprep.mubr.f32.mxu0 %v1328_v50 }
 0x3a1   :  { %v5341_v34 = vpack.i.bf16 %v1193_v20, %v1192_v16  ;;  %4623 = vmatmul.mubr.f32.gmra.mxu0 %v1329_v49 }
 0x3a3   :  { %5342 = vrot.lane.b32.xlu1 %v5341_v34, %s5390_s1 }
 0x3a5   :  { %v1102_v57 = vpop.f32.mrf.mxu1 }
 0x3a6   :  { %v6492_v55 = vadd.f32 %v6336_v7, %v1102_v57 }
 0x3a7   :  { %v4535_v33 = vpop.f32.mrf.mxu1 }
 0x3a8   :  { %v1194_v15 = vmax.f32 %v6492_v55, 0.0 }
 0x3a9   :  { %v1107_v24 = vpop.f32.mrf.mxu1 }
 0x3aa   :  { %v6495_v26 = vadd.f32 %v6336_v7, %v1107_v24 }
 0x3ab   :  { %v4538_v56 = vpop.f32.mrf.mxu1 }
 0x3ac   :  { %v1195_v52 = vmax.f32 %v6495_v26, 0.0 }
 0x3ad   :  { %v1112_v25 = vpop.f32.mrf.mxu1 }
 0x3ae   :  { %v5346_v6 = vpack.i.bf16 %v1195_v52, %v1194_v15  ;;  %v6504_v12 = vadd.f32 %v6336_v7, %v1112_v25 }
 0x3af   :  { %v4541_v23 = vpop.f32.mrf.mxu1 }
 0x3b0   :  { %5347 = vrot.lane.b32.xlu0 %v5346_v6, %s5390_s1  ;;  %v1196_v59 = vmax.f32 %v6504_v12, 0.0 }
 0x3b1   :  { %v1117_v60 = vpop.f32.mrf.mxu1 }
 0x3b2   :  { %v6508_v22 = vadd.f32 %v6336_v7, %v1117_v60  ;;  %v1633_v60 = vld [vmem:[%s7809_s5 + $0x128] sm:$0xff] }
 0x3b3   :  { %v4544_v1 = vpop.f32.mrf.mxu1 }
 0x3b4   :  { %v1197_v37 = vmax.f32 %v6508_v22, 0.0  ;;  %v1630_v22 = vld [vmem:[%s7809_s5 + $0x110] sm:$0xff] }
 0x3b5   :  { %v1122_v5 = vpop.f32.mrf.mxu1 }
 0x3b6   :  { %v5351_v11 = vpack.i.bf16 %v1197_v37, %v1196_v59  ;;  %v6517_v47 = vadd.f32 %v6336_v7, %v1122_v5 }
 0x3b7   :  { %v4547_v3 = vpop.f32.mrf.mxu1 }
 0x3b8   :  { %5352 = vrot.lane.b32.xlu1 %v5351_v11, %s5390_s1  ;;  %v1198_v21 = vmax.f32 %v6517_v47, 0.0 }
 0x3b9   :  { %v1127_v29 = vpop.f32.mrf.mxu1 }
 0x3ba   :  { %v6521_v0 = vadd.f32 %v6336_v7, %v1127_v29 }
 0x3bb   :  { %v4550_v63 = vpop.f32.mrf.mxu1 }
 0x3bc   :  { %v1199_v30 = vmax.f32 %v6521_v0, 0.0 }
 0x3be   :  { %v5356_v46 = vpack.i.bf16 %v1199_v30, %v1198_v21 }
 0x3c0   :  { %5357 = vrot.lane.b32.xlu0 %v5356_v46, %s5390_s1 }
 0x40d   :  { %v5338_v4 = vpop.permute.xlu0 %5337 }
 0x40e   :  { %v5340_v36 = vunpack.i.h.bf16 %v5338_v4  ;;  %v5339_v42 = vunpack.i.l.bf16 %v5338_v4  ;;  %v1631_v4 = vld [vmem:[%s7809_s5 + $0x118] sm:$0xff] }
 0x410   :  { %v1330_v19 = vsel %vm508_vm0, %v1189_v8, %v5339_v42  ;;  %v1331_v61 = vsel %vm508_vm0, %v1190_v53, %v5340_v36  ;;  %v1635_v8 = vld [vmem:[%s7809_s5 + $0x138] sm:$0xff] }
 0x411   :  { %4625 = vmatprep.mubr.f32.mxu0 %v1330_v19  ;;  %4656 = vmatpush3.msra.mxu0 %v1635_v8 }
 0x412   :  { %4626 = vmatmul.mubr.f32.gmra.mxu0 %v1331_v61  ;;  %4657 = vmatprep.subr.mxu0 %v5391_v13 }
 0x413   :  { %4658 = vmatpush3.msra.mxu0 %v1634_v44 }
 0x414   :  { %4659 = vmatprep.subr.mxu0 %v5391_v13 }
 0x415   :  { %v5343_v39 = vpop.permute.xlu1 %5342  ;;  %4660 = vmatpush3.msra.mxu0 %v1633_v60  ;;  %v1607_v60 = vld [vmem:[%s7809_s5 + $0x58] sm:$0xff] }
 0x416   :  { %v5345_v31 = vunpack.i.h.bf16 %v5343_v39  ;;  %v5344_v2 = vunpack.i.l.bf16 %v5343_v39  ;;  %4661 = vmatprep.subr.mxu0 %v5391_v13 }
 0x417   :  { %4662 = vmatpush3.msra.mxu0 %v1632_v18  ;;  %v1615_v18 = vld [vmem:[%s7809_s5 + $0x98] sm:$0xff] }
 0x418   :  { %v1332_v14 = vsel %vm508_vm0, %v1191_v54, %v5344_v2  ;;  %v1333_v32 = vsel %vm508_vm0, %v1192_v16, %v5345_v31  ;;  %4663 = vmatprep.subr.mxu0 %v5391_v13 }
 0x419   :  { %4628 = vmatprep.mubr.f32.mxu0 %v1332_v14  ;;  %4664 = vmatpush3.msra.mxu0 %v1631_v4  ;;  %v1627_v4 = vld [vmem:[%s7809_s5 + $0xf8] sm:$0xff] }
 0x41a   :  { %v1132_v17 = vpop.f32.mrf.mxu1  ;;  %4629 = vmatmul.mubr.f32.gmra.mxu0 %v1333_v32  ;;  %4665 = vmatprep.subr.mxu0 %v5391_v13  ;;  %v1629_v32 = vld [vmem:[%s7809_s5 + $0x108] sm:$0xff] }
 0x41b   :  { %v6578_v53 = vadd.f32 %v6336_v7, %v1132_v17  ;;  %4666 = vmatpush3.msra.mxu0 %v1630_v22  ;;  %v1628_v17 = vld [vmem:[%s7809_s5 + $0x100] sm:$0xff]  ;;  %v1622_v22 = vld [vmem:[%s7809_s5 + $0xd0] sm:$0xff] }
 0x41c   :  { %v4553_v28 = vpop.f32.mrf.mxu1  ;;  %4667 = vmatprep.subr.mxu0 %v5391_v13 }
 0x41d   :  { %v1200_v45 = vmax.f32 %v6578_v53, 0.0  ;;  %4668 = vmatpush3.msra.mxu0 %v1629_v32 }
 0x41e   :  { %v1137_v35 = vpop.f32.mrf.mxu1  ;;  %4669 = vmatprep.subr.mxu0 %v5391_v13 }
 0x41f   :  { %v6582_v54 = vadd.f32 %v6336_v7, %v1137_v35  ;;  %4670 = vmatpush3.msra.mxu0 %v1628_v17  ;;  %v2333_v17 = vld [vmem:[%s7809_s5 + $0x278] sm:$0xff] }
 0x420   :  { %v4556_v48 = vpop.f32.mrf.mxu1  ;;  %4693 = vmatprep.subr.mxu0 %v5391_v13 }
 0x421   :  { %v1201_v51 = vmax.f32 %v6582_v54, 0.0 }
 0x422   :  { %v5348_v38 = vpop.permute.xlu0 %5347  ;;  %v1142_v16 = vpop.f32.mrf.mxu1 }
 0x423   :  { %v5361_v50 = vpack.i.bf16 %v1201_v51, %v1200_v45  ;;  %v5350_v49 = vunpack.i.h.bf16 %v5348_v38  ;;  %v5349_v34 = vunpack.i.l.bf16 %v5348_v38  ;;  %v6595_v33 = vadd.f32 %v6336_v7, %v1142_v16 }
 0x424   :  { %v4559_v57 = vpop.f32.mrf.mxu1 }
 0x425   :  { %5362 = vrot.lane.b32.xlu1 %v5361_v50, %s5390_s1  ;;  %v1334_v24 = vsel %vm508_vm0, %v1193_v20, %v5349_v34  ;;  %v1335_v56 = vsel %vm508_vm0, %v1194_v15, %v5350_v49  ;;  %v1202_v1 = vmax.f32 %v6595_v33, 0.0  ;;  %v6687_v49 = vld [vmem:[%s7808_s4 + $0x80] ss:$0 sm:$0xff] }
 0x426   :  { %v1147_v25 = vpop.f32.mrf.mxu1  ;;  %4631 = vmatprep.mubr.f32.mxu0 %v1334_v24  ;;  %v1611_v24 = vld [vmem:[%s7809_s5 + $0x78] sm:$0xff] }
 0x427   :  { %v6605_v6 = vadd.f32 %v6336_v7, %v1147_v25  ;;  %4632 = vmatmul.mubr.f32.gmra.mxu0 %v1335_v56  ;;  %v1610_v56 = vld [vmem:[%s7809_s5 + $0x70] sm:$0xff]  ;;  %v1609_v25 = vld [vmem:[%s7809_s5 + $0x68] sm:$0xff] }
 0x428   :  { %v4562_v23 = vpop.f32.mrf.mxu1 }
 0x429   :  { %v1203_v58 = vmax.f32 %v6605_v6, 0.0  ;;  %v1608_v23 = vld [vmem:[%s7809_s5 + $0x60] sm:$0xff] }
 0x42a   :  { %v5353_v20 = vpop.permute.xlu1 %5352  ;;  %v1152_v55 = vpop.f32.mrf.mxu1 }
 0x42b   :  { %v5366_v15 = vpack.i.bf16 %v1203_v58, %v1202_v1  ;;  %v5355_v5 = vunpack.i.h.bf16 %v5353_v20  ;;  %v5354_v11 = vunpack.i.l.bf16 %v5353_v20  ;;  %v6618_v29 = vadd.f32 %v6336_v7, %v1152_v55  ;;  %v1606_v20 = vld [vmem:[%s7809_s5 + $0x50] sm:$0xff] }
 0x42c   :  { %v4565_v3 = vpop.f32.mrf.mxu1 }
 0x42d   :  { %5367 = vrot.lane.b32.xlu0 %v5366_v15, %s5390_s1  ;;  %v1336_v63 = vsel %vm508_vm0, %v1195_v52, %v5354_v11  ;;  %v1337_v10 = vsel %vm508_vm0, %v1196_v59, %v5355_v5  ;;  %v1204_v27 = vmax.f32 %v6618_v29, 0.0  ;;  %v1605_v15 = vld [vmem:[%s7809_s5 + $0x48] sm:$0xff]  ;;  %v1604_v5 = vld [vmem:[%s7809_s5 + $0x40] sm:$0xff]  ;;  %v1619_v3 = vld [vmem:[%s7809_s5 + $0xb8] sm:$0xff] }
 0x42e   :  { %v1157_v41 = vpop.f32.mrf.mxu1  ;;  %4634 = vmatprep.mubr.f32.mxu0 %v1336_v63  ;;  %v1618_v63 = vld [vmem:[%s7809_s5 + $0xb0] sm:$0xff] }
 0x42f   :  { %v6628_v46 = vadd.f32 %v6336_v7, %v1157_v41  ;;  %4635 = vmatmul.mubr.f32.gmra.mxu0 %v1337_v10  ;;  %v1617_v10 = vld [vmem:[%s7809_s5 + $0xa8] sm:$0xff] }
 0x430   :  { %v4568_v43 = vpop.f32.mrf.mxu1 }
 0x431   :  { %v1205_v26 = vmax.f32 %v6628_v46, 0.0  ;;  %v1616_v43 = vld [vmem:[%s7809_s5 + $0xa0] sm:$0xff] }
 0x432   :  { %v5358_v52 = vpop.permute.xlu0 %5357  ;;  %v1162_v12 = vpop.f32.mrf.mxu1 }
 0x433   :  { %v5371_v59 = vpack.i.bf16 %v1205_v26, %v1204_v27  ;;  %v5360_v62 = vunpack.i.h.bf16 %v5358_v52  ;;  %v5359_v40 = vunpack.i.l.bf16 %v5358_v52  ;;  %v6644_v36 = vadd.f32 %v6336_v7, %v1162_v12  ;;  %v1614_v12 = vld [vmem:[%s7809_s5 + $0x90] sm:$0xff] }
 0x434   :  { %v4571_v9 = vpop.f32.mrf.mxu1 }
 0x435   :  { %5372 = vrot.lane.b32.xlu1 %v5371_v59, %s5390_s1  ;;  %v1338_v42 = vsel %vm508_vm0, %v1197_v37, %v5359_v40  ;;  %v1339_v19 = vsel %vm508_vm0, %v1198_v21, %v5360_v62  ;;  %v1206_v37 = vmax.f32 %v6644_v36, 0.0  ;;  %v1613_v62 = vld [vmem:[%s7809_s5 + $0x88] sm:$0xff]  ;;  %v1612_v40 = vld [vmem:[%s7809_s5 + $0x80] sm:$0xff]  ;;  %v1789_v36 = vld [vmem:[%s7809_s5 + $0x178] sm:$0xff] }
 0x436   :  { %v1167_v61 = vpop.f32.mrf.mxu1  ;;  %4637 = vmatprep.mubr.f32.mxu0 %v1338_v42  ;;  %v1626_v42 = vld [vmem:[%s7809_s5 + $0xf0] sm:$0xff] }
 0x437   :  { %v6655_v39 = vadd.f32 %v6336_v7, %v1167_v61  ;;  %4638 = vmatmul.mubr.f32.gmra.mxu0 %v1339_v19  ;;  %v1625_v19 = vld [vmem:[%s7809_s5 + $0xe8] sm:$0xff]  ;;  %v1624_v61 = vld [vmem:[%s7809_s5 + $0xe0] sm:$0xff] }
 0x438   :  { %v4574_v31 = vpop.f32.mrf.mxu1 }
 0x439   :  { %v1207_v47 = vmax.f32 %v6655_v39, 0.0  ;;  %v1623_v31 = vld [vmem:[%s7809_s5 + $0xd8] sm:$0xff]  ;;  %v1788_v39 = vld [vmem:[%s7809_s5 + $0x170] sm:$0xff] }
 0x43a   :  { %v1172_v21 = vpop.f32.mrf.mxu1 }
 0x43b   :  { %v5376_v2 = vpack.i.bf16 %v1207_v47, %v1206_v37  ;;  %v6674_v8 = vadd.f32 %v6336_v7, %v1172_v21 }
 0x43c   :  { %v4577_v14 = vpop.f32.mrf.mxu1 }
 0x43d   :  { %5377 = vrot.lane.b32.xlu0 %v5376_v2, %s5390_s1  ;;  %v1208_v44 = vmax.f32 %v6674_v8, 0.0  ;;  %v1621_v2 = vld [vmem:[%s7809_s5 + $0xc8] sm:$0xff]  ;;  %v1620_v14 = vld [vmem:[%s7809_s5 + $0xc0] sm:$0xff]  ;;  %v1785_v8 = vld [vmem:[%s7809_s5 + $0x158] sm:$0xff] }
 0x43e   :  { %v1177_v28 = vpop.f32.mrf.mxu1 }
 0x43f   :  { %v1178_v35 = vadd.f32 %v6336_v7, %v1177_v28  ;;  %v2332_v28 = vld [vmem:[%s7809_s5 + $0x270] sm:$0xff] }
 0x440   :  { %v4580_v48 = vpop.f32.mrf.mxu1 }
 0x441   :  { %v1209_v38 = vmax.f32 %v1178_v35, 0.0  ;;  %v2331_v35 = vld [vmem:[%s7809_s5 + $0x268] sm:$0xff]  ;;  %v2330_v48 = vld [vmem:[%s7809_s5 + $0x260] sm:$0xff] }
 0x443   :  { %v5381_v16 = vpack.i.bf16 %v1209_v38, %v1208_v44  ;;  %v2329_v38 = vld [vmem:[%s7809_s5 + $0x258] sm:$0xff] }
 0x445   :  { %v4615_v50 = vpop.f32.mrf.mxu0  ;;  %5382 = vrot.lane.b32.xlu1 %v5381_v16, %s5390_s1  ;;  %v2328_v16 = vld [vmem:[%s7809_s5 + $0x250] sm:$0xff] }
 0x446   :  { %v1443_v55 = vadd.f32 %v4615_v50, %v6687_v49  ;;  %v2327_v50 = vld [vmem:[%s7809_s5 + $0x248] sm:$0xff] }
 0x447   :  { %v1437_v34 = vpop.f32.mrf.mxu0 }
 0x448   :  { %v1438_v7 = vadd.f32 %v6687_v49, %v1437_v34  ;;  %v1573_v11 = vmax.f32 %v1443_v55, 0.0  ;;  %v2326_v34 = vld [vmem:[%s7809_s5 + $0x240] sm:$0xff] }
 0x44a   :  { %v1572_v57 = vmax.f32 %v1438_v7, 0.0 }
 0x44c   :  { %4691 = vmatmul.mubr.msk.f32.vlgmr.msra.gmra.mxu1 %vm508_vm0, %v1572_v57 }
 0x44d   :  { %4713 = vmatpush3.msra.mxu1 %v1611_v24  ;;  %4728 = vmatprep.mubr.msk.f32.mxu1 %vm5392_vm1, %v5391_v13  ;;  %v4618_v41 = vpop.f32.mrf.mxu0 }
 0x44e   :  { %4714 = vmatprep.subr.mxu1 %v5391_v13  ;;  %v1453_v21 = vadd.f32 %v4618_v41, %v6687_v49 }
 0x44f   :  { %4715 = vmatpush3.msra.mxu1 %v1610_v56  ;;  %v1447_v52 = vpop.f32.mrf.mxu0 }
 0x450   :  { %4716 = vmatprep.subr.mxu1 %v5391_v13  ;;  %v1448_v59 = vadd.f32 %v6687_v49, %v1447_v52  ;;  %v1575_v32 = vmax.f32 %v1453_v21, 0.0  ;;  %v1782_v52 = vld [vmem:[%s7809_s5 + $0x140] sm:$0xff]  ;;  %v2496_v21 = vld [vmem:[%s7809_s5 + $0x2f0] sm:$0xff] }
 0x451   :  { %4717 = vmatpush3.msra.mxu1 %v1609_v25 }
 0x452   :  { %4718 = vmatprep.subr.mxu1 %v5391_v13  ;;  %v1574_v9 = vmax.f32 %v1448_v59, 0.0  ;;  %v1943_v59 = vld [vmem:[%s7809_s5 + $0x1b8] sm:$0xff] }
 0x453   :  { %4719 = vmatpush3.msra.mxu1 %v1608_v23 }
 0x454   :  { %4720 = vmatprep.subr.mxu1 %v5391_v13 }
 0x455   :  { %4721 = vmatpush3.msra.mxu1 %v1607_v60 }
 0x456   :  { %4722 = vmatprep.subr.mxu1 %v5391_v13  ;;  %v4621_v6 = vpop.f32.mrf.mxu0 }
 0x457   :  { %4723 = vmatpush3.msra.mxu1 %v1606_v20  ;;  %v1463_v41 = vadd.f32 %v4621_v6, %v6687_v49  ;;  %v2251_v6 = vld [vmem:[%s7809_s5 + $0x238] sm:$0xff] }
 0x458   :  { %4724 = vmatprep.subr.mxu1 %v5391_v13 }
 0x459   :  { %4725 = vmatpush3.msra.mxu1 %v1605_v15 }
 0x45a   :  { %4726 = vmatprep.subr.mxu1 %v5391_v13 }
 0x45b   :  { %4727 = vmatpush3.msra.mxu1 %v1604_v5 }
 0x45c   :  { %4729 = vmatmul.mubr.msk.f32.vlgmr.msra.gmra.mxu1 %vm508_vm0, %v1573_v11  ;;  %4750 = vmatprep.subr.mxu1 %v5391_v13 }
 0x45d   :  { %4751 = vmatpush3.msra.mxu1 %v1619_v3  ;;  %4766 = vmatprep.mubr.msk.f32.mxu1 %vm5392_vm1, %v5391_v13 }
 0x45e   :  { %4752 = vmatprep.subr.mxu1 %v5391_v13 }
 0x45f   :  { %4753 = vmatpush3.msra.mxu1 %v1618_v63 }
 0x460   :  { %4754 = vmatprep.subr.mxu1 %v5391_v13 }
 0x461   :  { %4755 = vmatpush3.msra.mxu1 %v1617_v10 }
 0x462   :  { %4756 = vmatprep.subr.mxu1 %v5391_v13 }
 0x463   :  { %4757 = vmatpush3.msra.mxu1 %v1616_v43  ;;  %v1783_v43 = vld [vmem:[%s7809_s5 + $0x148] sm:$0xff] }
 0x464   :  { %4758 = vmatprep.subr.mxu1 %v5391_v13 }
 0x465   :  { %4759 = vmatpush3.msra.mxu1 %v1615_v18 }
 0x466   :  { %4760 = vmatprep.subr.mxu1 %v5391_v13 }
 0x467   :  { %4761 = vmatpush3.msra.mxu1 %v1614_v12  ;;  %v1577_v12 = vmax.f32 %v1463_v41, 0.0  ;;  %v2245_v41 = vld [vmem:[%s7809_s5 + $0x208] sm:$0xff] }
 0x468   :  { %4762 = vmatprep.subr.mxu1 %v5391_v13 }
 0x469   :  { %4763 = vmatpush3.msra.mxu1 %v1613_v62 }
 0x46a   :  { %4764 = vmatprep.subr.mxu1 %v5391_v13 }
 0x46b   :  { %4765 = vmatpush3.msra.mxu1 %v1612_v40  ;;  %v1942_v40 = vld [vmem:[%s7809_s5 + $0x1b0] sm:$0xff] }
 0x46c   :  { %4767 = vmatmul.mubr.msk.f32.vlgmr.msra.gmra.mxu1 %vm508_vm0, %v1574_v9  ;;  %4788 = vmatprep.subr.mxu1 %v5391_v13 }
 0x46d   :  { %4789 = vmatpush3.msra.mxu1 %v1627_v4  ;;  %4804 = vmatprep.mubr.msk.f32.mxu1 %vm5392_vm1, %v5391_v13  ;;  %v1941_v4 = vld [vmem:[%s7809_s5 + $0x1a8] sm:$0xff] }
 0x46e   :  { %4790 = vmatprep.subr.mxu1 %v5391_v13 }
 0x46f   :  { %4791 = vmatpush3.msra.mxu1 %v1626_v42 }
 0x470   :  { %4792 = vmatprep.subr.mxu1 %v5391_v13 }
 0x471   :  { %4793 = vmatpush3.msra.mxu1 %v1625_v19  ;;  %v1940_v19 = vld [vmem:[%s7809_s5 + $0x1a0] sm:$0xff] }
 0x472   :  { %4794 = vmatprep.subr.mxu1 %v5391_v13 }
 0x473   :  { %4795 = vmatpush3.msra.mxu1 %v1624_v61 }
 0x474   :  { %4796 = vmatprep.subr.mxu1 %v5391_v13 }
 0x475   :  { %4797 = vmatpush3.msra.mxu1 %v1623_v31  ;;  %v2497_v31 = vld [vmem:[%s7809_s5 + $0x2f8] sm:$0xff] }
 0x476   :  { %4798 = vmatprep.subr.mxu1 %v5391_v13 }
 0x477   :  { %4799 = vmatpush3.msra.mxu1 %v1622_v22  ;;  %v1939_v22 = vld [vmem:[%s7809_s5 + $0x198] sm:$0xff] }
 0x478   :  { %4800 = vmatprep.subr.mxu1 %v5391_v13 }
 0x479   :  { %4801 = vmatpush3.msra.mxu1 %v1621_v2  ;;  %v1938_v2 = vld [vmem:[%s7809_s5 + $0x190] sm:$0xff] }
 0x47a   :  { %4802 = vmatprep.subr.mxu1 %v5391_v13 }
 0x47b   :  { %4803 = vmatpush3.msra.mxu1 %v1620_v14  ;;  %v2495_v14 = vld [vmem:[%s7809_s5 + $0x2e8] sm:$0xff] }
 0x47c   :  { %4805 = vmatmul.mubr.msk.f32.vlgmr.msra.gmra.mxu1 %vm508_vm0, %v1575_v32  ;;  %4826 = vmatprep.subr.mxu1 %v5391_v13 }
 0x47d   :  { %4827 = vmatpush3.msra.mxu1 %v2333_v17  ;;  %4842 = vmatprep.mubr.msk.f32.mxu1 %vm5392_vm1, %v5391_v13  ;;  %v1937_v17 = vld [vmem:[%s7809_s5 + $0x188] sm:$0xff] }
 0x47e   :  { %4828 = vmatprep.subr.mxu1 %v5391_v13 }
 0x47f   :  { %4829 = vmatpush3.msra.mxu1 %v2332_v28  ;;  %v2494_v28 = vld [vmem:[%s7809_s5 + $0x2e0] sm:$0xff] }
 0x480   :  { %4830 = vmatprep.subr.mxu1 %v5391_v13 }
 0x481   :  { %4831 = vmatpush3.msra.mxu1 %v2331_v35  ;;  %v1936_v35 = vld [vmem:[%s7809_s5 + $0x180] sm:$0xff] }
 0x482   :  { %4832 = vmatprep.subr.mxu1 %v5391_v13 }
 0x483   :  { %4833 = vmatpush3.msra.mxu1 %v2330_v48 }
 0x484   :  { %4834 = vmatprep.subr.mxu1 %v5391_v13 }
 0x485   :  { %4835 = vmatpush3.msra.mxu1 %v2329_v38 }
 0x486   :  { %4836 = vmatprep.subr.mxu1 %v5391_v13 }
 0x487   :  { %4837 = vmatpush3.msra.mxu1 %v2328_v16  ;;  %v2493_v16 = vld [vmem:[%s7809_s5 + $0x2d8] sm:$0xff] }
 0x488   :  { %4838 = vmatprep.subr.mxu1 %v5391_v13 }
 0x489   :  { %4839 = vmatpush3.msra.mxu1 %v2327_v50  ;;  %v2097_v50 = vld [vmem:[%s7809_s5 + $0x1f8] sm:$0xff] }
 0x48a   :  { %4840 = vmatprep.subr.mxu1 %v5391_v13 }
 0x48b   :  { %4841 = vmatpush3.msra.mxu1 %v2326_v34 }
 0x48c   :  { %4864 = vmatprep.subr.mxu1 %v5391_v13 }
 0x497   :  { %v5363_v7 = vpop.permute.xlu1 %5362 }
 0x498   :  { %v5365_v57 = vunpack.i.h.bf16 %v5363_v7  ;;  %v5364_v24 = vunpack.i.l.bf16 %v5363_v7  ;;  %v2492_v7 = vld [vmem:[%s7809_s5 + $0x2d0] sm:$0xff] }
 0x49a   :  { %v1340_v56 = vsel %vm508_vm0, %v1199_v30, %v5364_v24  ;;  %v1341_v25 = vsel %vm508_vm0, %v1200_v45, %v5365_v57  ;;  %v2096_v57 = vld [vmem:[%s7809_s5 + $0x1f0] sm:$0xff] }
 0x49b   :  { %4640 = vmatprep.mubr.f32.mxu0 %v1340_v56  ;;  %v2491_v56 = vld [vmem:[%s7809_s5 + $0x2c8] sm:$0xff] }
 0x49c   :  { %4641 = vmatmul.mubr.f32.gmra.mxu0 %v1341_v25  ;;  %v2095_v25 = vld [vmem:[%s7809_s5 + $0x1e8] sm:$0xff] }
 0x49f   :  { %v5368_v23 = vpop.permute.xlu0 %5367 }
 0x4a0   :  { %v5370_v60 = vunpack.i.h.bf16 %v5368_v23  ;;  %v5369_v20 = vunpack.i.l.bf16 %v5368_v23  ;;  %v2490_v23 = vld [vmem:[%s7809_s5 + $0x2c0] sm:$0xff] }
 0x4a2   :  { %v1342_v55 = vsel %vm508_vm0, %v1201_v51, %v5369_v20  ;;  %v1343_v15 = vsel %vm508_vm0, %v1202_v1, %v5370_v60  ;;  %v2094_v60 = vld [vmem:[%s7809_s5 + $0x1e0] sm:$0xff] }
 0x4a3   :  { %4643 = vmatprep.mubr.f32.mxu0 %v1342_v55  ;;  %v2661_v55 = vld [vmem:[%s7809_s5 + $0x378] sm:$0xff] }
 0x4a4   :  { %4644 = vmatmul.mubr.f32.gmra.mxu0 %v1343_v15  ;;  %v2093_v15 = vld [vmem:[%s7809_s5 + $0x1d8] sm:$0xff] }
 0x4a7   :  { %v5373_v0 = vpop.permute.xlu1 %5372 }
 0x4a8   :  { %v5375_v30 = vunpack.i.h.bf16 %v5373_v0  ;;  %v5374_v53 = vunpack.i.l.bf16 %v5373_v0  ;;  %v2660_v0 = vld [vmem:[%s7809_s5 + $0x370] sm:$0xff] }
 0x4aa   :  { %v1344_v45 = vsel %vm508_vm0, %v1203_v58, %v5374_v53  ;;  %v1345_v5 = vsel %vm508_vm0, %v1204_v27, %v5375_v30  ;;  %v1457_v58 = vpop.f32.mrf.mxu0  ;;  %v2092_v30 = vld [vmem:[%s7809_s5 + $0x1d0] sm:$0xff]  ;;  %v2659_v53 = vld [vmem:[%s7809_s5 + $0x368] sm:$0xff] }
 0x4ab   :  { %4646 = vmatprep.mubr.f32.mxu0 %v1344_v45  ;;  %v1458_v63 = vadd.f32 %v6687_v49, %v1457_v58  ;;  %v2091_v45 = vld [vmem:[%s7809_s5 + $0x1c8] sm:$0xff] }
 0x4ac   :  { %4647 = vmatmul.mubr.f32.gmra.mxu0 %v1345_v5  ;;  %v6896_v18 = vpop.f32.mrf.mxu0 }
 0x4ad   :  { %v1473_v5 = vadd.f32 %v6896_v18, %v6687_v49  ;;  %v2822_v18 = vld [vmem:[%s7809_s5 + $0x3e0] sm:$0xff] }
 0x4ae   :  { %v1467_v62 = vpop.f32.mrf.mxu0 }
 0x4af   :  { %v5378_v54 = vpop.permute.xlu0 %5377  ;;  %v1468_v32 = vadd.f32 %v6687_v49, %v1467_v62  ;;  %v2821_v62 = vld [vmem:[%s7809_s5 + $0x3d8] sm:$0xff] }
 0x4b0   :  { %v5380_v51 = vunpack.i.h.bf16 %v5378_v54  ;;  %v5379_v33 = vunpack.i.l.bf16 %v5378_v54  ;;  %v2658_v54 = vld [vmem:[%s7809_s5 + $0x360] sm:$0xff] }
 0x4b1   :  { %v1578_v38 = vmax.f32 %v1468_v32, 0.0  ;;  %v2411_v32 = vld [vmem:[%s7809_s5 + $0x298] sm:$0xff] }
 0x4b2   :  { %v1346_v1 = vsel %vm508_vm0, %v1205_v26, %v5379_v33  ;;  %v1347_v11 = vsel %vm508_vm0, %v1206_v37, %v5380_v51  ;;  %v1576_v26 = vmax.f32 %v1458_v63, 0.0  ;;  %v1787_v37 = vld [vmem:[%s7809_s5 + $0x168] sm:$0xff]  ;;  %v2090_v51 = vld [vmem:[%s7809_s5 + $0x1c0] sm:$0xff] }
 0x4b3   :  { %4649 = vmatprep.mubr.f32.mxu0 %v1346_v1  ;;  %v1579_v1 = vmax.f32 %v1473_v5, 0.0  ;;  %v2655_v63 = vld [vmem:[%s7809_s5 + $0x348] sm:$0xff] }
 0x4b4   :  { %4650 = vmatmul.mubr.f32.gmra.mxu0 %v1347_v11  ;;  %v2657_v11 = vld [vmem:[%s7809_s5 + $0x358] sm:$0xff] }
 0x4b7   :  { %v5383_v29 = vpop.permute.xlu1 %5382 }
 0x4b8   :  { %v5385_v3 = vunpack.i.h.bf16 %v5383_v29  ;;  %v5384_v27 = vunpack.i.l.bf16 %v5383_v29  ;;  %v2656_v29 = vld [vmem:[%s7809_s5 + $0x350] sm:$0xff] }
 0x4ba   :  { %v1348_v10 = vsel %vm508_vm0, %v1207_v47, %v5384_v27  ;;  %v1349_v46 = vsel %vm508_vm0, %v1208_v44, %v5385_v3  ;;  %v1786_v47 = vld [vmem:[%s7809_s5 + $0x160] sm:$0xff]  ;;  %v1784_v44 = vld [vmem:[%s7809_s5 + $0x150] sm:$0xff] }
 0x4bb   :  { %4652 = vmatprep.mubr.f32.mxu0 %v1348_v10  ;;  %v2250_v3 = vld [vmem:[%s7809_s5 + $0x230] sm:$0xff]  ;;  %v2249_v10 = vld [vmem:[%s7809_s5 + $0x228] sm:$0xff] }
 0x4bc   :  { %4653 = vmatmul.mubr.f32.gmra.mxu0 %v1349_v46  ;;  %v2654_v46 = vld [vmem:[%s7809_s5 + $0x340] sm:$0xff] }
 0x4bd   :  { %4671 = vmatprep.mubr.msk.f32.mxu0 %vm5392_vm1, %v5391_v13 }
 0x4c0   :  { %4672 = vmatmul.mubr.msk.f32.vlgmr.msra.gmra.mxu0 %vm508_vm0, %v1576_v26  ;;  %v2248_v26 = vld [vmem:[%s7809_s5 + $0x220] sm:$0xff] }
 0x4c1   :  { %4694 = vmatpush3.msra.mxu0 %v1789_v36  ;;  %4709 = vmatprep.mubr.msk.f32.mxu0 %vm5392_vm1, %v5391_v13 }
 0x4c2   :  { %4695 = vmatprep.subr.mxu0 %v5391_v13 }
 0x4c3   :  { %4696 = vmatpush3.msra.mxu0 %v1788_v39  ;;  %v2825_v39 = vld [vmem:[%s7809_s5 + $0x3f8] sm:$0xff] }
 0x4c4   :  { %4697 = vmatprep.subr.mxu0 %v5391_v13 }
 0x4c5   :  { %4698 = vmatpush3.msra.mxu0 %v1787_v37  ;;  %v2247_v37 = vld [vmem:[%s7809_s5 + $0x218] sm:$0xff] }
 0x4c6   :  { %4699 = vmatprep.subr.mxu0 %v5391_v13 }
 0x4c7   :  { %4700 = vmatpush3.msra.mxu0 %v1786_v47  ;;  %v2824_v47 = vld [vmem:[%s7809_s5 + $0x3f0] sm:$0xff] }
 0x4c8   :  { %4701 = vmatprep.subr.mxu0 %v5391_v13 }
 0x4c9   :  { %4702 = vmatpush3.msra.mxu0 %v1785_v8  ;;  %v2246_v8 = vld [vmem:[%s7809_s5 + $0x210] sm:$0xff] }
 0x4ca   :  { %4703 = vmatprep.subr.mxu0 %v5391_v13 }
 0x4cb   :  { %4704 = vmatpush3.msra.mxu0 %v1784_v44  ;;  %v2823_v44 = vld [vmem:[%s7809_s5 + $0x3e8] sm:$0xff] }
 0x4cc   :  { %4705 = vmatprep.subr.mxu0 %v5391_v13 }
 0x4cd   :  { %4706 = vmatpush3.msra.mxu0 %v1783_v43 }
 0x4ce   :  { %4707 = vmatprep.subr.mxu0 %v5391_v13 }
 0x4cf   :  { %4708 = vmatpush3.msra.mxu0 %v1782_v52  ;;  %v2244_v52 = vld [vmem:[%s7809_s5 + $0x200] sm:$0xff] }
 0x4d0   :  { %4710 = vmatmul.mubr.msk.f32.vlgmr.msra.gmra.mxu0 %vm508_vm0, %v1577_v12  ;;  %4731 = vmatprep.subr.mxu0 %v5391_v13 }
 0x4d1   :  { %4732 = vmatpush3.msra.mxu0 %v1943_v59  ;;  %4747 = vmatprep.mubr.msk.f32.mxu0 %vm5392_vm1, %v5391_v13 }
 0x4d2   :  { %4733 = vmatprep.subr.mxu0 %v5391_v13  ;;  %v4627_v9 = vpop.f32.mrf.mxu0 }
 0x4d3   :  { %v1483_v42 = vadd.f32 %v4627_v9, %v6687_v49  ;;  %4734 = vmatpush3.msra.mxu0 %v1942_v40  ;;  %v2415_v40 = vld [vmem:[%s7809_s5 + $0x2b8] sm:$0xff] }
 0x4d4   :  { %4735 = vmatprep.subr.mxu0 %v5391_v13  ;;  %v6954_v48 = vpop.f32.mrf.mxu0 }
 0x4d5   :  { %v1581_v61 = vmax.f32 %v1483_v42, 0.0  ;;  %4736 = vmatpush3.msra.mxu0 %v1941_v4  ;;  %v1478_v43 = vadd.f32 %v6687_v49, %v6954_v48  ;;  %v2820_v4 = vld [vmem:[%s7809_s5 + $0x3d0] sm:$0xff] }
 0x4d6   :  { %4737 = vmatprep.subr.mxu0 %v5391_v13  ;;  %v2414_v42 = vld [vmem:[%s7809_s5 + $0x2b0] sm:$0xff] }
 0x4d7   :  { %4738 = vmatpush3.msra.mxu0 %v1940_v19  ;;  %4843 = vmatmul.mubr.msk.f32.vlgmr.msra.gmra.mxu1 %vm508_vm0, %v1581_v61  ;;  %v1580_v59 = vmax.f32 %v1478_v43, 0.0  ;;  %v2819_v61 = vld [vmem:[%s7809_s5 + $0x3c8] sm:$0xff]  ;;  %v3146_v43 = vld [vmem:[%s7809_s5 + $0x4c0] sm:$0xff] }
 0x4d8   :  { %4739 = vmatprep.subr.mxu0 %v5391_v13  ;;  %4865 = vmatpush3.msra.mxu1 %v2497_v31  ;;  %v2413_v31 = vld [vmem:[%s7809_s5 + $0x2a8] sm:$0xff] }
 0x4d9   :  { %4740 = vmatpush3.msra.mxu0 %v1939_v22  ;;  %4866 = vmatprep.subr.mxu1 %v5391_v13  ;;  %v2818_v22 = vld [vmem:[%s7809_s5 + $0x3c0] sm:$0xff] }
 0x4da   :  { %4741 = vmatprep.subr.mxu0 %v5391_v13  ;;  %4867 = vmatpush3.msra.mxu1 %v2496_v21  ;;  %v4630_v34 = vpop.f32.mrf.mxu0  ;;  %v2412_v21 = vld [vmem:[%s7809_s5 + $0x2a0] sm:$0xff] }
 0x4db   :  { %4742 = vmatpush3.msra.mxu0 %v1938_v2  ;;  %4868 = vmatprep.subr.mxu1 %v5391_v13  ;;  %v1493_v24 = vadd.f32 %v4630_v34, %v6687_v49  ;;  %v2986_v34 = vld [vmem:[%s7809_s5 + $0x460] sm:$0xff] }
 0x4dc   :  { %4743 = vmatprep.subr.mxu0 %v5391_v13  ;;  %4869 = vmatpush3.msra.mxu1 %v2495_v14  ;;  %v7027_v33 = vpop.f32.mrf.mxu0  ;;  %v2989_v14 = vld [vmem:[%s7809_s5 + $0x478] sm:$0xff] }
 0x4dd   :  { %4744 = vmatpush3.msra.mxu0 %v1937_v17  ;;  %4870 = vmatprep.subr.mxu1 %v5391_v13  ;;  %v1583_v20 = vmax.f32 %v1493_v24, 0.0 }
 0x4de   :  { %4745 = vmatprep.subr.mxu0 %v5391_v13  ;;  %4871 = vmatpush3.msra.mxu1 %v2494_v28  ;;  %v2988_v28 = vld [vmem:[%s7809_s5 + $0x470] sm:$0xff] }
 0x4df   :  { %4746 = vmatpush3.msra.mxu0 %v1936_v35  ;;  %4872 = vmatprep.subr.mxu1 %v5391_v13  ;;  %v2410_v35 = vld [vmem:[%s7809_s5 + $0x290] sm:$0xff] }
 0x4e0   :  { %4748 = vmatmul.mubr.msk.f32.vlgmr.msra.gmra.mxu0 %vm508_vm0, %v1578_v38  ;;  %4769 = vmatprep.subr.mxu0 %v5391_v13  ;;  %v2987_v38 = vld [vmem:[%s7809_s5 + $0x468] sm:$0xff] }
 0x4e1   :  { %4873 = vmatpush3.msra.mxu1 %v2493_v16  ;;  %4770 = vmatpush3.msra.mxu0 %v2097_v50  ;;  %v2409_v16 = vld [vmem:[%s7809_s5 + $0x288] sm:$0xff]  ;;  %v1488_v50 = vadd.f32 %v6687_v49, %v7027_v33  ;;  %v3153_v33 = vld [vmem:[%s7809_s5 + $0x4f8] sm:$0xff] }
 0x4e2   :  { %4874 = vmatprep.subr.mxu1 %v5391_v13  ;;  %4771 = vmatprep.subr.mxu0 %v5391_v13 }
 0x4e3   :  { %4875 = vmatpush3.msra.mxu1 %v2492_v7  ;;  %4772 = vmatpush3.msra.mxu0 %v2096_v57  ;;  %v2408_v7 = vld [vmem:[%s7809_s5 + $0x280] sm:$0xff]  ;;  %v1582_v24 = vmax.f32 %v1488_v50, 0.0  ;;  %v3067_v50 = vld [vmem:[%s7809_s5 + $0x498] sm:$0xff] }
 0x4e4   :  { %4876 = vmatprep.subr.mxu1 %v5391_v13  ;;  %4773 = vmatprep.subr.mxu0 %v5391_v13 }
 0x4e5   :  { %4877 = vmatpush3.msra.mxu1 %v2491_v56  ;;  %4774 = vmatpush3.msra.mxu0 %v2095_v25  ;;  %v2985_v56 = vld [vmem:[%s7809_s5 + $0x458] sm:$0xff] }
 0x4e6   :  { %4878 = vmatprep.subr.mxu1 %v5391_v13  ;;  %4775 = vmatprep.subr.mxu0 %v5391_v13  ;;  %v2579_v25 = vld [vmem:[%s7809_s5 + $0x338] sm:$0xff] }
 0x4e7   :  { %4879 = vmatpush3.msra.mxu1 %v2490_v23  ;;  %4880 = vmatprep.mubr.msk.f32.mxu1 %vm5392_vm1, %v5391_v13  ;;  %v4633_v58 = vpop.f32.mrf.mxu0 }
 0x4e8   :  { %4776 = vmatpush3.msra.mxu0 %v2094_v60  ;;  %4881 = vmatmul.mubr.msk.f32.vlgmr.msra.gmra.mxu1 %vm508_vm0, %v1583_v20  ;;  %v1503_v27 = vadd.f32 %v4633_v58, %v6687_v49  ;;  %v2984_v60 = vld [vmem:[%s7809_s5 + $0x450] sm:$0xff]  ;;  %v2573_v58 = vld [vmem:[%s7809_s5 + $0x308] sm:$0xff] }
 0x4e9   :  { %4902 = vmatprep.subr.mxu1 %v5391_v13  ;;  %4777 = vmatprep.subr.mxu0 %v5391_v13  ;;  %v7102_v12 = vpop.f32.mrf.mxu0  ;;  %v2578_v20 = vld [vmem:[%s7809_s5 + $0x330] sm:$0xff] }
 0x4ea   :  { %4903 = vmatpush3.msra.mxu1 %v2661_v55  ;;  %4778 = vmatpush3.msra.mxu0 %v2093_v15  ;;  %v1585_v36 = vmax.f32 %v1503_v27, 0.0  ;;  %v2983_v15 = vld [vmem:[%s7809_s5 + $0x448] sm:$0xff] }
 0x4eb   :  { %4904 = vmatprep.subr.mxu1 %v5391_v13  ;;  %4779 = vmatprep.subr.mxu0 %v5391_v13 }
 0x4ec   :  { %4905 = vmatpush3.msra.mxu1 %v2660_v0  ;;  %4780 = vmatpush3.msra.mxu0 %v2092_v30  ;;  %v2577_v0 = vld [vmem:[%s7809_s5 + $0x328] sm:$0xff]  ;;  %v2982_v30 = vld [vmem:[%s7809_s5 + $0x440] sm:$0xff] }
 0x4ed   :  { %4906 = vmatprep.subr.mxu1 %v5391_v13  ;;  %4781 = vmatprep.subr.mxu0 %v5391_v13 }
 0x4ee   :  { %4907 = vmatpush3.msra.mxu1 %v2659_v53  ;;  %4782 = vmatpush3.msra.mxu0 %v2091_v45  ;;  %v2576_v53 = vld [vmem:[%s7809_s5 + $0x320] sm:$0xff] }
 0x4ef   :  { %4908 = vmatprep.subr.mxu1 %v5391_v13  ;;  %4783 = vmatprep.subr.mxu0 %v5391_v13  ;;  %v4636_v9 = vpop.f32.mrf.mxu0 }
 0x4f0   :  { %4909 = vmatpush3.msra.mxu1 %v2658_v54  ;;  %4784 = vmatpush3.msra.mxu0 %v2090_v51  ;;  %v1513_v19 = vadd.f32 %v4636_v9, %v6687_v49  ;;  %v2575_v54 = vld [vmem:[%s7809_s5 + $0x318] sm:$0xff]  ;;  %v2905_v9 = vld [vmem:[%s7809_s5 + $0x428] sm:$0xff] }
 0x4f1   :  { %4785 = vmatprep.mubr.msk.f32.mxu0 %vm5392_vm1, %v5391_v13  ;;  %4910 = vmatprep.subr.mxu1 %v5391_v13  ;;  %v7179_v57 = vpop.f32.mrf.mxu0 }
 0x4f2   :  { %4786 = vmatmul.mubr.msk.f32.vlgmr.msra.gmra.mxu0 %vm508_vm0, %v1579_v1  ;;  %4807 = vmatprep.subr.mxu0 %v5391_v13  ;;  %v1587_v2 = vmax.f32 %v1513_v19, 0.0  ;;  %v2574_v1 = vld [vmem:[%s7809_s5 + $0x310] sm:$0xff]  ;;  %v2903_v19 = vld [vmem:[%s7809_s5 + $0x418] sm:$0xff] }
 0x4f3   :  { %4911 = vmatpush3.msra.mxu1 %v2657_v11  ;;  %4808 = vmatpush3.msra.mxu0 %v2251_v6  ;;  %v3152_v11 = vld [vmem:[%s7809_s5 + $0x4f0] sm:$0xff]  ;;  %v1498_v6 = vadd.f32 %v6687_v49, %v7102_v12  ;;  %v2737_v12 = vld [vmem:[%s7809_s5 + $0x388] sm:$0xff] }
 0x4f4   :  { %4912 = vmatprep.subr.mxu1 %v5391_v13  ;;  %4809 = vmatprep.subr.mxu0 %v5391_v13 }
 0x4f5   :  { %4913 = vmatpush3.msra.mxu1 %v2656_v29  ;;  %4810 = vmatpush3.msra.mxu0 %v2250_v3  ;;  %v3151_v29 = vld [vmem:[%s7809_s5 + $0x4e8] sm:$0xff]  ;;  %v2572_v3 = vld [vmem:[%s7809_s5 + $0x300] sm:$0xff]  ;;  %v1584_v27 = vmax.f32 %v1498_v6, 0.0  ;;  %v3312_v6 = vld [vmem:[%s7809_s5 + $0x550] sm:$0xff] }
 0x4f6   :  { %4914 = vmatprep.subr.mxu1 %v5391_v13  ;;  %4811 = vmatprep.subr.mxu0 %v5391_v13 }
 0x4f7   :  { %4915 = vmatpush3.msra.mxu1 %v2655_v63  ;;  %4812 = vmatpush3.msra.mxu0 %v2249_v10  ;;  %v4639_v23 = vpop.f32.mrf.mxu0  ;;  %v2743_v63 = vld [vmem:[%s7809_s5 + $0x3b8] sm:$0xff]  ;;  %v3150_v10 = vld [vmem:[%s7809_s5 + $0x4e0] sm:$0xff] }
 0x4f8   :  { %4916 = vmatprep.subr.mxu1 %v5391_v13  ;;  %4813 = vmatprep.subr.mxu0 %v5391_v13  ;;  %v1523_v55 = vadd.f32 %v4639_v23, %v6687_v49 }
 0x4f9   :  { %4917 = vmatpush3.msra.mxu1 %v2654_v46  ;;  %4918 = vmatprep.mubr.msk.f32.mxu1 %vm5392_vm1, %v5391_v13  ;;  %v2742_v46 = vld [vmem:[%s7809_s5 + $0x3b0] sm:$0xff] }
 0x4fa   :  { %4814 = vmatpush3.msra.mxu0 %v2248_v26  ;;  %4919 = vmatmul.mubr.msk.f32.vlgmr.msra.gmra.mxu1 %vm508_vm0, %v1585_v36  ;;  %v1589_v45 = vmax.f32 %v1523_v55, 0.0  ;;  %v3149_v26 = vld [vmem:[%s7809_s5 + $0x4d8] sm:$0xff]  ;;  %v2741_v36 = vld [vmem:[%s7809_s5 + $0x3a8] sm:$0xff] }
 0x4fb   :  { %4940 = vmatprep.subr.mxu1 %v5391_v13  ;;  %4815 = vmatprep.subr.mxu0 %v5391_v13 }
 0x4fc   :  { %4941 = vmatpush3.msra.mxu1 %v2825_v39  ;;  %4816 = vmatpush3.msra.mxu0 %v2247_v37  ;;  %v3148_v39 = vld [vmem:[%s7809_s5 + $0x4d0] sm:$0xff]  ;;  %v2740_v37 = vld [vmem:[%s7809_s5 + $0x3a0] sm:$0xff] }
 0x4fd   :  { %4942 = vmatprep.subr.mxu1 %v5391_v13  ;;  %4817 = vmatprep.subr.mxu0 %v5391_v13 }
 0x4fe   :  { %4943 = vmatpush3.msra.mxu1 %v2824_v47  ;;  %4818 = vmatpush3.msra.mxu0 %v2246_v8  ;;  %v3147_v8 = vld [vmem:[%s7809_s5 + $0x4c8] sm:$0xff] }
 0x4ff   :  { %4944 = vmatprep.subr.mxu1 %v5391_v13  ;;  %4819 = vmatprep.subr.mxu0 %v5391_v13 }
 0x500   :  { %4945 = vmatpush3.msra.mxu1 %v2823_v44  ;;  %4820 = vmatpush3.msra.mxu0 %v2245_v41  ;;  %v2739_v44 = vld [vmem:[%s7809_s5 + $0x398] sm:$0xff] }
 0x501   :  { %4946 = vmatprep.subr.mxu1 %v5391_v13  ;;  %4821 = vmatprep.subr.mxu0 %v5391_v13 }
 0x502   :  { %4947 = vmatpush3.msra.mxu1 %v2822_v18  ;;  %4822 = vmatpush3.msra.mxu0 %v2244_v52  ;;  %v2738_v18 = vld [vmem:[%s7809_s5 + $0x390] sm:$0xff]  ;;  %v1508_v52 = vadd.f32 %v6687_v49, %v7179_v57  ;;  %v3064_v57 = vld [vmem:[%s7809_s5 + $0x480] sm:$0xff] }
 0x503   :  { %4823 = vmatprep.mubr.msk.f32.mxu0 %vm5392_vm1, %v5391_v13  ;;  %4948 = vmatprep.subr.mxu1 %v5391_v13 }
 0x504   :  { %4824 = vmatmul.mubr.msk.f32.vlgmr.msra.gmra.mxu0 %vm508_vm0, %v1580_v59  ;;  %4845 = vmatprep.subr.mxu0 %v5391_v13  ;;  %v2736_v59 = vld [vmem:[%s7809_s5 + $0x380] sm:$0xff]  ;;  %v1586_v49 = vmax.f32 %v1508_v52, 0.0  ;;  %v3398_v52 = vld [vmem:[%s7809_s5 + $0x5b0] sm:$0xff] }
 0x505   :  { %4949 = vmatpush3.msra.mxu1 %v2821_v62  ;;  %4846 = vmatpush3.msra.mxu0 %v2415_v40  ;;  %v2907_v62 = vld [vmem:[%s7809_s5 + $0x438] sm:$0xff]  ;;  %v2906_v40 = vld [vmem:[%s7809_s5 + $0x430] sm:$0xff] }
 0x506   :  { %4950 = vmatprep.subr.mxu1 %v5391_v13  ;;  %4847 = vmatprep.subr.mxu0 %v5391_v13 }
 0x507   :  { %4951 = vmatpush3.msra.mxu1 %v2820_v4  ;;  %4848 = vmatpush3.msra.mxu0 %v2414_v42  ;;  %v2904_v4 = vld [vmem:[%s7809_s5 + $0x420] sm:$0xff] }
 0x508   :  { %4952 = vmatprep.subr.mxu1 %v5391_v13  ;;  %4849 = vmatprep.subr.mxu0 %v5391_v13 }
 0x509   :  { %4953 = vmatpush3.msra.mxu1 %v2819_v61  ;;  %4850 = vmatpush3.msra.mxu0 %v2413_v31  ;;  %v1517_v61 = vpop.f32.mrf.mxu0 }
 0x50a   :  { %4954 = vmatprep.subr.mxu1 %v5391_v13  ;;  %4851 = vmatprep.subr.mxu0 %v5391_v13 }
 0x50b   :  { %4955 = vmatpush3.msra.mxu1 %v2818_v22  ;;  %4956 = vmatprep.mubr.msk.f32.mxu1 %vm5392_vm1, %v5391_v13  ;;  %v2902_v22 = vld [vmem:[%s7809_s5 + $0x410] sm:$0xff] }
 0x50c   :  { %4852 = vmatpush3.msra.mxu0 %v2412_v21  ;;  %4957 = vmatmul.mubr.msk.f32.vlgmr.msra.gmra.mxu1 %vm508_vm0, %v1587_v2  ;;  %v7151_v17 = vpop.f32.mrf.mxu1  ;;  %v7349_v21 = vld [vmem:[%s7808_s4 + $0x80] ss:$0 sm:$0xff] }
 0x50d   :  { %4978 = vmatprep.subr.mxu1 %v5391_v13  ;;  %4853 = vmatprep.subr.mxu0 %v5391_v13  ;;  %v1518_v2 = vadd.f32 %v7349_v21, %v1517_v61 }
 0x50e   :  { %4979 = vmatpush3.msra.mxu1 %v2989_v14  ;;  %4854 = vmatpush3.msra.mxu0 %v2411_v32  ;;  %v4692_v48 = vpop.f32.mrf.mxu1  ;;  %v2901_v14 = vld [vmem:[%s7809_s5 + $0x408] sm:$0xff]  ;;  %v2900_v32 = vld [vmem:[%s7809_s5 + $0x400] sm:$0xff] }
 0x50f   :  { %4980 = vmatprep.subr.mxu1 %v5391_v13  ;;  %4855 = vmatprep.subr.mxu0 %v5391_v13  ;;  %v3070_v48 = vld [vmem:[%s7809_s5 + $0x4b0] sm:$0xff] }
 0x510   :  { %4981 = vmatpush3.msra.mxu1 %v2988_v28  ;;  %4856 = vmatpush3.msra.mxu0 %v2410_v35  ;;  %v1588_v28 = vmax.f32 %v1518_v2, 0.0  ;;  %v3071_v35 = vld [vmem:[%s7809_s5 + $0x4b8] sm:$0xff]  ;;  %v3475_v2 = vld [vmem:[%s7809_s5 + $0x5c8] sm:$0xff] }
 0x511   :  { %4982 = vmatprep.subr.mxu1 %v5391_v13  ;;  %4857 = vmatprep.subr.mxu0 %v5391_v13 }
 0x512   :  { %4983 = vmatpush3.msra.mxu1 %v2987_v38  ;;  %4858 = vmatpush3.msra.mxu0 %v2409_v16  ;;  %v3069_v38 = vld [vmem:[%s7809_s5 + $0x4a8] sm:$0xff]  ;;  %v3068_v16 = vld [vmem:[%s7809_s5 + $0x4a0] sm:$0xff] }
 0x513   :  { %4984 = vmatprep.subr.mxu1 %v5391_v13  ;;  %4859 = vmatprep.subr.mxu0 %v5391_v13 }
 0x514   :  { %4985 = vmatpush3.msra.mxu1 %v2986_v34  ;;  %4860 = vmatpush3.msra.mxu0 %v2408_v7  ;;  %v3066_v34 = vld [vmem:[%s7809_s5 + $0x490] sm:$0xff]  ;;  %v3065_v7 = vld [vmem:[%s7809_s5 + $0x488] sm:$0xff] }
 0x515   :  { %4861 = vmatprep.mubr.msk.f32.mxu0 %vm5392_vm1, %v5391_v13  ;;  %4986 = vmatprep.subr.mxu1 %v5391_v13 }
 0x516   :  { %4862 = vmatmul.mubr.msk.f32.vlgmr.msra.gmra.mxu0 %vm508_vm0, %v1582_v24  ;;  %4883 = vmatprep.subr.mxu0 %v5391_v13 }
 0x517   :  { %4987 = vmatpush3.msra.mxu1 %v2985_v56  ;;  %4884 = vmatpush3.msra.mxu0 %v2579_v25 }
 0x518   :  { %4988 = vmatprep.subr.mxu1 %v5391_v13  ;;  %4885 = vmatprep.subr.mxu0 %v5391_v13 }
 0x519   :  { %4989 = vmatpush3.msra.mxu1 %v2984_v60  ;;  %4886 = vmatpush3.msra.mxu0 %v2578_v20  ;;  %v3317_v20 = vld [vmem:[%s7809_s5 + $0x578] sm:$0xff] }
 0x51a   :  { %4990 = vmatprep.subr.mxu1 %v5391_v13  ;;  %4887 = vmatprep.subr.mxu0 %v5391_v13 }
 0x51b   :  { %4991 = vmatpush3.msra.mxu1 %v2983_v15  ;;  %4888 = vmatpush3.msra.mxu0 %v2577_v0  ;;  %v3235_v15 = vld [vmem:[%s7809_s5 + $0x538] sm:$0xff]  ;;  %v3316_v0 = vld [vmem:[%s7809_s5 + $0x570] sm:$0xff] }
 0x51c   :  { %4992 = vmatprep.subr.mxu1 %v5391_v13  ;;  %4889 = vmatprep.subr.mxu0 %v5391_v13  ;;  %v7219_v5 = vpop.f32.mrf.mxu1 }
 0x51d   :  { %4993 = vmatpush3.msra.mxu1 %v2982_v30  ;;  %4994 = vmatprep.mubr.msk.f32.mxu1 %vm5392_vm1, %v5391_v13  ;;  %v3234_v30 = vld [vmem:[%s7809_s5 + $0x530] sm:$0xff] }
 0x51e   :  { %4890 = vmatpush3.msra.mxu0 %v2576_v53  ;;  %4995 = vmatmul.mubr.msk.f32.vlgmr.msra.gmra.mxu1 %vm508_vm0, %v1589_v45  ;;  %v4730_v51 = vpop.f32.mrf.mxu1  ;;  %v3315_v53 = vld [vmem:[%s7809_s5 + $0x568] sm:$0xff] }
 0x51f   :  { %4891 = vmatprep.subr.mxu0 %v5391_v13  ;;  %4899 = vmatprep.mubr.msk.f32.mxu0 %vm5392_vm1, %v5391_v13  ;;  %v3233_v45 = vld [vmem:[%s7809_s5 + $0x528] sm:$0xff] }
 0x520   :  { %4892 = vmatpush3.msra.mxu0 %v2575_v54  ;;  %5016 = vmatprep.subr.mxu1 %v5391_v13  ;;  %v3314_v54 = vld [vmem:[%s7809_s5 + $0x560] sm:$0xff] }
 0x521   :  { %4893 = vmatprep.subr.mxu0 %v5391_v13  ;;  %5017 = vmatpush3.msra.mxu1 %v3153_v33  ;;  %v3232_v33 = vld [vmem:[%s7809_s5 + $0x520] sm:$0xff] }
 0x522   :  { %4894 = vmatpush3.msra.mxu0 %v2574_v1  ;;  %5018 = vmatprep.subr.mxu1 %v5391_v13  ;;  %v3313_v1 = vld [vmem:[%s7809_s5 + $0x558] sm:$0xff] }
 0x523   :  { %4895 = vmatprep.subr.mxu0 %v5391_v13  ;;  %5019 = vmatpush3.msra.mxu1 %v3152_v11  ;;  %v3231_v11 = vld [vmem:[%s7809_s5 + $0x518] sm:$0xff] }
 0x524   :  { %4896 = vmatpush3.msra.mxu0 %v2573_v58  ;;  %5020 = vmatprep.subr.mxu1 %v5391_v13 }
 0x525   :  { %4897 = vmatprep.subr.mxu0 %v5391_v13  ;;  %5021 = vmatpush3.msra.mxu1 %v3151_v29 }
 0x526   :  { %4898 = vmatpush3.msra.mxu0 %v2572_v3  ;;  %5022 = vmatprep.subr.mxu1 %v5391_v13  ;;  %v3230_v3 = vld [vmem:[%s7809_s5 + $0x510] sm:$0xff] }
 0x527   :  { %4900 = vmatmul.mubr.msk.f32.vlgmr.msra.gmra.mxu0 %vm508_vm0, %v1584_v27  ;;  %4921 = vmatprep.subr.mxu0 %v5391_v13  ;;  %v3311_v27 = vld [vmem:[%s7809_s5 + $0x548] sm:$0xff] }
 0x528   :  { %4922 = vmatpush3.msra.mxu0 %v2743_v63  ;;  %4937 = vmatprep.mubr.msk.f32.mxu0 %vm5392_vm1, %v5391_v13  ;;  %v3229_v63 = vld [vmem:[%s7809_s5 + $0x508] sm:$0xff] }
 0x529   :  { %4923 = vmatprep.subr.mxu0 %v5391_v13  ;;  %5023 = vmatpush3.msra.mxu1 %v3150_v10  ;;  %v3310_v10 = vld [vmem:[%s7809_s5 + $0x540] sm:$0xff] }
 0x52a   :  { %4924 = vmatpush3.msra.mxu0 %v2742_v46  ;;  %5024 = vmatprep.subr.mxu1 %v5391_v13 }
 0x52b   :  { %4925 = vmatprep.subr.mxu0 %v5391_v13  ;;  %5025 = vmatpush3.msra.mxu1 %v3149_v26 }
 0x52c   :  { %4926 = vmatpush3.msra.mxu0 %v2741_v36  ;;  %v7285_v47 = vpop.f32.mrf.mxu1  ;;  %5026 = vmatprep.subr.mxu1 %v5391_v13 }
 0x52d   :  { %4927 = vmatprep.subr.mxu0 %v5391_v13  ;;  %5027 = vmatpush3.msra.mxu1 %v3148_v39  ;;  %v3228_v39 = vld [vmem:[%s7809_s5 + $0x500] sm:$0xff] }
 0x52e   :  { %4928 = vmatpush3.msra.mxu0 %v2740_v37  ;;  %v4768_v41 = vpop.f32.mrf.mxu1  ;;  %5028 = vmatprep.subr.mxu1 %v5391_v13  ;;  %v3481_v37 = vld [vmem:[%s7809_s5 + $0x5f8] sm:$0xff] }
 0x52f   :  { %4929 = vmatprep.subr.mxu0 %v5391_v13  ;;  %5029 = vmatpush3.msra.mxu1 %v3147_v8  ;;  %v3399_v41 = vld [vmem:[%s7809_s5 + $0x5b8] sm:$0xff] }
 0x530   :  { %4930 = vmatpush3.msra.mxu0 %v2739_v44  ;;  %5030 = vmatprep.subr.mxu1 %v5391_v13 }
 0x531   :  { %4931 = vmatprep.subr.mxu0 %v5391_v13  ;;  %5031 = vmatpush3.msra.mxu1 %v3146_v43  ;;  %v3480_v43 = vld [vmem:[%s7809_s5 + $0x5f0] sm:$0xff] }
 0x532   :  { %4932 = vmatpush3.msra.mxu0 %v2738_v18  ;;  %5032 = vmatprep.mubr.msk.f32.mxu1 %vm5392_vm1, %v5391_v13 }
 0x533   :  { %4933 = vmatprep.subr.mxu0 %v5391_v13  ;;  %5054 = vmatprep.subr.mxu1 %v5391_v13 }
 0x534   :  { %4934 = vmatpush3.msra.mxu0 %v2737_v12  ;;  %v3479_v12 = vld [vmem:[%s7809_s5 + $0x5e8] sm:$0xff] }
 0x535   :  { %4935 = vmatprep.subr.mxu0 %v5391_v13 }
 0x536   :  { %4936 = vmatpush3.msra.mxu0 %v2736_v59 }
 0x537   :  { %4938 = vmatmul.mubr.msk.f32.vlgmr.msra.gmra.mxu0 %vm508_vm0, %v1586_v49  ;;  %4959 = vmatprep.subr.mxu0 %v5391_v13  ;;  %v3397_v49 = vld [vmem:[%s7809_s5 + $0x5a8] sm:$0xff] }
 0x538   :  { %4960 = vmatpush3.msra.mxu0 %v2907_v62  ;;  %4975 = vmatprep.mubr.msk.f32.mxu0 %vm5392_vm1, %v5391_v13  ;;  %v3478_v62 = vld [vmem:[%s7809_s5 + $0x5e0] sm:$0xff] }
 0x539   :  { %4961 = vmatprep.subr.mxu0 %v5391_v13 }
 0x53a   :  { %4962 = vmatpush3.msra.mxu0 %v2906_v40  ;;  %v3396_v40 = vld [vmem:[%s7809_s5 + $0x5a0] sm:$0xff] }
 0x53b   :  { %4963 = vmatprep.subr.mxu0 %v5391_v13 }
 0x53c   :  { %4964 = vmatpush3.msra.mxu0 %v2905_v9  ;;  %v7336_v42 = vpop.f32.mrf.mxu1  ;;  %v3477_v9 = vld [vmem:[%s7809_s5 + $0x5d8] sm:$0xff] }
 0x53d   :  { %4965 = vmatprep.subr.mxu0 %v5391_v13 }
 0x53e   :  { %4966 = vmatpush3.msra.mxu0 %v2904_v4  ;;  %v4806_v31 = vpop.f32.mrf.mxu1  ;;  %v3395_v4 = vld [vmem:[%s7809_s5 + $0x598] sm:$0xff] }
 0x53f   :  { %4967 = vmatprep.subr.mxu0 %v5391_v13  ;;  %v3394_v31 = vld [vmem:[%s7809_s5 + $0x590] sm:$0xff] }
 0x540   :  { %4968 = vmatpush3.msra.mxu0 %v2903_v19  ;;  %v3476_v19 = vld [vmem:[%s7809_s5 + $0x5d0] sm:$0xff] }
 0x541   :  { %4969 = vmatprep.subr.mxu0 %v5391_v13 }
 0x542   :  { %4970 = vmatpush3.msra.mxu0 %v2902_v22 }
 0x543   :  { %4971 = vmatprep.subr.mxu0 %v5391_v13 }
 0x544   :  { %4972 = vmatpush3.msra.mxu0 %v2901_v14 }
 0x545   :  { %4973 = vmatprep.subr.mxu0 %v5391_v13 }
 0x546   :  { %4974 = vmatpush3.msra.mxu0 %v2900_v32  ;;  %v3393_v32 = vld [vmem:[%s7809_s5 + $0x588] sm:$0xff] }
 0x547   :  { %4976 = vmatmul.mubr.msk.f32.vlgmr.msra.gmra.mxu0 %vm508_vm0, %v1588_v28  ;;  %4997 = vmatprep.subr.mxu0 %v5391_v13 }
 0x548   :  { %4998 = vmatpush3.msra.mxu0 %v3071_v35  ;;  %5013 = vmatprep.mubr.msk.f32.mxu0 %vm5392_vm1, %v5391_v13  ;;  %v3474_v35 = vld [vmem:[%s7809_s5 + $0x5c0] sm:$0xff] }
 0x549   :  { %4999 = vmatprep.subr.mxu0 %v5391_v13 }
 0x54a   :  { %5000 = vmatpush3.msra.mxu0 %v3070_v48 }
 0x54b   :  { %5001 = vmatprep.subr.mxu0 %v5391_v13 }
 0x54c   :  { %5002 = vmatpush3.msra.mxu0 %v3069_v38 }
 0x54d   :  { %5003 = vmatprep.subr.mxu0 %v5391_v13 }
 0x54e   :  { %5004 = vmatpush3.msra.mxu0 %v3068_v16  ;;  %v3392_v16 = vld [vmem:[%s7809_s5 + $0x580] sm:$0xff] }
 0x54f   :  { %5005 = vmatprep.subr.mxu0 %v5391_v13 }
 0x550   :  { %5006 = vmatpush3.msra.mxu0 %v3067_v50 }
 0x551   :  { %5007 = vmatprep.subr.mxu0 %v5391_v13 }
 0x552   :  { %5008 = vmatpush3.msra.mxu0 %v3066_v34 }
 0x553   :  { %5009 = vmatprep.subr.mxu0 %v5391_v13 }
 0x554   :  { %5010 = vmatpush3.msra.mxu0 %v3065_v7 }
 0x555   :  { %5011 = vmatprep.subr.mxu0 %v5391_v13 }
 0x556   :  { %5012 = vmatpush3.msra.mxu0 %v3064_v57 }
 0x557   :  { %5035 = vmatprep.subr.mxu0 %v5391_v13 }
 0x55c   :  { %v4642_v24 = vpop.f32.mrf.mxu0 }
 0x55d   :  { %v1533_v56 = vadd.f32 %v7349_v21, %v4642_v24 }
 0x55e   :  { %v1527_v25 = vpop.f32.mrf.mxu0 }
 0x55f   :  { %v1591_v23 = vmax.f32 %v1533_v56, 0.0  ;;  %v1528_v60 = vadd.f32 %v7349_v21, %v1527_v25 }
 0x561   :  { %v1590_v55 = vmax.f32 %v1528_v60, 0.0  ;;  %5033 = vmatmul.mubr.msk.f32.vlgmr.msra.gmra.mxu1 %vm508_vm0, %v1591_v23 }
 0x562   :  { %5055 = vmatpush3.msra.mxu1 %v3317_v20  ;;  %5070 = vmatprep.mubr.msk.f32.mxu1 %vm5392_vm1, %v5391_v13 }
 0x563   :  { %5056 = vmatprep.subr.mxu1 %v5391_v13  ;;  %5014 = vmatmul.mubr.msk.f32.vlgmr.msra.gmra.mxu0 %vm508_vm0, %v1590_v55 }
 0x564   :  { %5036 = vmatpush3.msra.mxu0 %v3235_v15  ;;  %5057 = vmatpush3.msra.mxu1 %v3316_v0  ;;  %v4645_v51 = vpop.f32.mrf.mxu0 }
 0x565   :  { %5037 = vmatprep.subr.mxu0 %v5391_v13  ;;  %5058 = vmatprep.subr.mxu1 %v5391_v13  ;;  %v1543_v58 = vadd.f32 %v7349_v21, %v4645_v51 }
 0x566   :  { %5038 = vmatpush3.msra.mxu0 %v3234_v30  ;;  %5059 = vmatpush3.msra.mxu1 %v3315_v53  ;;  %v1537_v29 = vpop.f32.mrf.mxu0 }
 0x567   :  { %5039 = vmatprep.subr.mxu0 %v5391_v13  ;;  %5060 = vmatprep.subr.mxu1 %v5391_v13  ;;  %v1538_v46 = vadd.f32 %v7349_v21, %v1537_v29  ;;  %v1593_v36 = vmax.f32 %v1543_v58, 0.0  ;;  %v3571_v58 = vld [vmem:[%s7810_s6 + $0x28] sm:$0xff] }
 0x568   :  { %5040 = vmatpush3.msra.mxu0 %v3233_v45  ;;  %5061 = vmatpush3.msra.mxu1 %v3314_v54  ;;  %v3573_v45 = vld [vmem:[%s7810_s6 + $0x38] sm:$0xff] }
 0x569   :  { %5041 = vmatprep.subr.mxu0 %v5391_v13  ;;  %5062 = vmatprep.subr.mxu1 %v5391_v13  ;;  %v1592_v8 = vmax.f32 %v1538_v46, 0.0  ;;  %v3567_v46 = vld [vmem:[%s7810_s6 + $0x8] sm:$0xff] }
 0x56a   :  { %5042 = vmatpush3.msra.mxu0 %v3232_v33  ;;  %5063 = vmatpush3.msra.mxu1 %v3313_v1 }
 0x56b   :  { %5043 = vmatprep.subr.mxu0 %v5391_v13  ;;  %5064 = vmatprep.subr.mxu1 %v5391_v13 }
 0x56c   :  { %5044 = vmatpush3.msra.mxu0 %v3231_v11  ;;  %5065 = vmatpush3.msra.mxu1 %v3312_v6  ;;  %v4648_v26 = vpop.f32.mrf.mxu0  ;;  %v3572_v11 = vld [vmem:[%s7810_s6 + $0x30] sm:$0xff] }
 0x56d   :  { %5045 = vmatprep.subr.mxu0 %v5391_v13  ;;  %5066 = vmatprep.subr.mxu1 %v5391_v13  ;;  %v1553_v22 = vadd.f32 %v7349_v21, %v4648_v26  ;;  %v3668_v26 = vld [vmem:[%s7810_s6 + $0xc0] sm:$0xff] }
 0x56e   :  { %5046 = vmatpush3.msra.mxu0 %v3230_v3  ;;  %5067 = vmatpush3.msra.mxu1 %v3311_v27  ;;  %v1547_v44 = vpop.f32.mrf.mxu0  ;;  %v3569_v27 = vld [vmem:[%s7810_s6 + $0x18] sm:$0xff] }
 0x56f   :  { %5047 = vmatprep.subr.mxu0 %v5391_v13  ;;  %5068 = vmatprep.subr.mxu1 %v5391_v13  ;;  %v1548_v28 = vadd.f32 %v7349_v21, %v1547_v44  ;;  %v1595_v38 = vmax.f32 %v1553_v22, 0.0 }
 0x570   :  { %5048 = vmatpush3.msra.mxu0 %v3229_v63  ;;  %5069 = vmatpush3.msra.mxu1 %v3310_v10  ;;  %v3568_v10 = vld [vmem:[%s7810_s6 + $0x10] sm:$0xff] }
 0x571   :  { %5049 = vmatprep.subr.mxu0 %v5391_v13  ;;  %5071 = vmatmul.mubr.msk.f32.vlgmr.msra.gmra.mxu1 %vm508_vm0, %v1593_v36  ;;  %v1594_v50 = vmax.f32 %v1548_v28, 0.0  ;;  %v3667_v36 = vld [vmem:[%s7810_s6 + $0xb8] sm:$0xff] }
 0x572   :  { %5092 = vmatprep.subr.mxu1 %v5391_v13  ;;  %5050 = vmatpush3.msra.mxu0 %v3228_v39  ;;  %v3566_v39 = vld [vmem:[%s7810_s6] sm:$0xff] }
 0x573   :  { %5051 = vmatprep.mubr.msk.f32.mxu0 %vm5392_vm1, %v5391_v13  ;;  %5093 = vmatpush3.msra.mxu1 %v3481_v37  ;;  %v3666_v37 = vld [vmem:[%s7810_s6 + $0xb0] sm:$0xff] }
 0x574   :  { %5052 = vmatmul.mubr.msk.f32.vlgmr.msra.gmra.mxu0 %vm508_vm0, %v1592_v8  ;;  %5073 = vmatprep.subr.mxu0 %v5391_v13  ;;  %v4651_v18 = vpop.f32.mrf.mxu0  ;;  %v3665_v8 = vld [vmem:[%s7810_s6 + $0xa8] sm:$0xff] }
 0x575   :  { %5094 = vmatprep.subr.mxu1 %v5391_v13  ;;  %5074 = vmatpush3.msra.mxu0 %v3399_v41 }
 0x576   :  { %5095 = vmatpush3.msra.mxu1 %v3480_v43  ;;  %5075 = vmatprep.subr.mxu0 %v5391_v13  ;;  %v1557_v59 = vpop.f32.mrf.mxu0  ;;  %v3664_v43 = vld [vmem:[%s7810_s6 + $0xa0] sm:$0xff] }
 0x577   :  { %5096 = vmatprep.subr.mxu1 %v5391_v13  ;;  %5076 = vmatpush3.msra.mxu0 %v3398_v52  ;;  %v3661_v59 = vld [vmem:[%s7810_s6 + $0x88] sm:$0xff] }
 0x578   :  { %5097 = vmatpush3.msra.mxu1 %v3479_v12  ;;  %5077 = vmatprep.subr.mxu0 %v5391_v13  ;;  %v3663_v12 = vld [vmem:[%s7810_s6 + $0x98] sm:$0xff] }
 0x579   :  { %5098 = vmatprep.subr.mxu1 %v5391_v13  ;;  %5078 = vmatpush3.msra.mxu0 %v3397_v49 }
 0x57a   :  { %5099 = vmatpush3.msra.mxu1 %v3478_v62  ;;  %5079 = vmatprep.subr.mxu0 %v5391_v13  ;;  %v3660_v62 = vld [vmem:[%s7810_s6 + $0x80] sm:$0xff] }
 0x57b   :  { %5100 = vmatprep.subr.mxu1 %v5391_v13  ;;  %5080 = vmatpush3.msra.mxu0 %v3396_v40 }
 0x57c   :  { %5101 = vmatpush3.msra.mxu1 %v3477_v9  ;;  %5081 = vmatprep.subr.mxu0 %v5391_v13  ;;  %v4654_v61 = vpop.f32.mrf.mxu0 }
 0x57d   :  { %5102 = vmatprep.subr.mxu1 %v5391_v13  ;;  %5082 = vmatpush3.msra.mxu0 %v3395_v4  ;;  %v3659_v4 = vld [vmem:[%s7810_s6 + $0x78] sm:$0xff]  ;;  %v3657_v61 = vld [vmem:[%s7810_s6 + $0x68] sm:$0xff] }
 0x57e   :  { %5103 = vmatpush3.msra.mxu1 %v3476_v19  ;;  %5083 = vmatprep.subr.mxu0 %v5391_v13  ;;  %v1565_v14 = vpop.f32.mrf.mxu0  ;;  %v3658_v19 = vld [vmem:[%s7810_s6 + $0x70] sm:$0xff] }
 0x57f   :  { %5104 = vmatprep.subr.mxu1 %v5391_v13  ;;  %5084 = vmatpush3.msra.mxu0 %v3394_v31  ;;  %v3656_v31 = vld [vmem:[%s7810_s6 + $0x60] sm:$0xff] }
 0x580   :  { %5105 = vmatpush3.msra.mxu1 %v3475_v2  ;;  %5085 = vmatprep.subr.mxu0 %v5391_v13  ;;  %v1705_v48 = vpop.f32.mrf.mxu0 }
 0x581   :  { %5106 = vmatprep.subr.mxu1 %v5391_v13  ;;  %5086 = vmatpush3.msra.mxu0 %v3393_v32  ;;  %v1779_v33 = vadd.f32 %v7151_v17, %v1705_v48  ;;  %v3570_v17 = vld [vmem:[%s7810_s6 + $0x20] sm:$0xff] }
 0x582   :  { %5107 = vmatpush3.msra.mxu1 %v3474_v35  ;;  %5108 = vmatprep.mubr.msk.f32.mxu1 %vm5392_vm1, %v5391_v13  ;;  %v4673_v21 = vpop.f32.mrf.mxu0 }
 0x583   :  { %5087 = vmatprep.subr.mxu0 %v5391_v13  ;;  %5109 = vmatmul.mubr.msk.f32.vlgmr.msra.gmra.mxu1 %vm508_vm0, %v1595_v38 }
 0x584   :  { %5088 = vmatpush3.msra.mxu0 %v3392_v16  ;;  %5089 = vmatprep.mubr.msk.f32.mxu0 %vm5392_vm1, %v5391_v13 }
 0x585   :  { %5090 = vmatmul.mubr.msk.f32.vlgmr.msra.gmra.mxu0 %vm508_vm0, %v1594_v50  ;;  %5111 = vmatprep.subr.mxu0 %v5391_v13 }
 0x586   :  { %5127 = vmatprep.mubr.msk.f32.mxu0 %vm5392_vm1, %v5391_v13  ;;  %5130 = vmatprep.subr.mxu1 %v5391_v13 }
 0x587   :  { %5162 = vmatprep.mubr.msk.f32.mxu1 %vm5392_vm1, %v5391_v13  ;;  %5112 = vmatpush3.msra.mxu0 %v3573_v45 }
 0x588   :  { %5113 = vmatprep.subr.mxu0 %v5391_v13  ;;  %5131 = vmatpush3.msra.mxu1 %v3668_v26  ;;  %v3754_v26 = vld [vmem:[%s7810_s6 + $0x118] sm:$0xff] }
 0x589   :  { %5114 = vmatpush3.msra.mxu0 %v3572_v11  ;;  %5132 = vmatprep.subr.mxu1 %v5391_v13 }
 0x58a   :  { %5115 = vmatprep.subr.mxu0 %v5391_v13  ;;  %5133 = vmatpush3.msra.mxu1 %v3667_v36  ;;  %v3753_v36 = vld [vmem:[%s7810_s6 + $0x110] sm:$0xff] }
 0x58b   :  { %5116 = vmatpush3.msra.mxu0 %v3571_v58  ;;  %5134 = vmatprep.subr.mxu1 %v5391_v13  ;;  %v3654_v58 = vld [vmem:[%s7810_s6 + $0x50] sm:$0xff] }
 0x58c   :  { %5117 = vmatprep.subr.mxu0 %v5391_v13  ;;  %5135 = vmatpush3.msra.mxu1 %v3666_v37  ;;  %v3751_v37 = vld [vmem:[%s7810_s6 + $0x100] sm:$0xff] }
 0x58d   :  { %5118 = vmatpush3.msra.mxu0 %v3570_v17  ;;  %5136 = vmatprep.subr.mxu1 %v5391_v13  ;;  %v3653_v17 = vld [vmem:[%s7810_s6 + $0x48] sm:$0xff] }
 0x58e   :  { %5119 = vmatprep.subr.mxu0 %v5391_v13  ;;  %5137 = vmatpush3.msra.mxu1 %v3665_v8  ;;  %v3750_v8 = vld [vmem:[%s7810_s6 + $0xf8] sm:$0xff] }
 0x58f   :  { %5120 = vmatpush3.msra.mxu0 %v3569_v27  ;;  %5138 = vmatprep.subr.mxu1 %v5391_v13  ;;  %v3758_v27 = vld [vmem:[%s7810_s6 + $0x138] sm:$0xff] }
 0x590   :  { %v1859_v34 = vpop.f32.mrf.mxu0  ;;  %5121 = vmatprep.subr.mxu0 %v5391_v13  ;;  %5139 = vmatpush3.msra.mxu1 %v3664_v43  ;;  %v3969_v43 = vld [vmem:[%s7810_s6 + $0x40] ss:$0 sm:$0xff] }
 0x591   :  { %v1933_v57 = vadd.f32 %v7219_v5, %v1859_v34  ;;  %5122 = vmatpush3.msra.mxu0 %v3568_v10  ;;  %5140 = vmatprep.subr.mxu1 %v5391_v13  ;;  %v3756_v10 = vld [vmem:[%s7810_s6 + $0x128] sm:$0xff] }
 0x592   :  { %v4711_v7 = vpop.f32.mrf.mxu0  ;;  %5123 = vmatprep.subr.mxu0 %v5391_v13  ;;  %5141 = vmatpush3.msra.mxu1 %v3663_v12 }
 0x593   :  { %5124 = vmatpush3.msra.mxu0 %v3567_v46  ;;  %5142 = vmatprep.subr.mxu1 %v5391_v13  ;;  %v3755_v46 = vld [vmem:[%s7810_s6 + $0x120] sm:$0xff] }
 0x594   :  { %5125 = vmatprep.subr.mxu0 %v5391_v13 }
 0x595   :  { %5126 = vmatpush3.msra.mxu0 %v3566_v39  ;;  %v3752_v39 = vld [vmem:[%s7810_s6 + $0x108] sm:$0xff] }
 0x596   :  { %5165 = vmatprep.subr.mxu0 %v5391_v13 }
 0x597   :  { %v2403_v24 = vpop.f32.mrf.mxu1 }
 0x598   :  { %v2407_v56 = vadd.f32 %v2403_v24, %v1933_v57 }
 0x599   :  { %v4844_v25 = vpop.f32.mrf.mxu1 }
 0x5a0   :  { %v2013_v23 = vpop.f32.mrf.mxu0 }
 0x5a1   :  { %v2087_v44 = vadd.f32 %v7285_v47, %v2013_v23  ;;  %v3662_v47 = vld [vmem:[%s7810_s6 + $0x90] sm:$0xff] }
 0x5a2   :  { %v4749_v60 = vpop.f32.mrf.mxu0  ;;  %5143 = vmatpush3.msra.mxu1 %v3662_v47 }
 0x5a3   :  { %5144 = vmatprep.subr.mxu1 %v5391_v13 }
 0x5a4   :  { %5145 = vmatpush3.msra.mxu1 %v3661_v59  ;;  %v3747_v59 = vld [vmem:[%s7810_s6 + $0xe0] sm:$0xff] }
 0x5a5   :  { %5146 = vmatprep.subr.mxu1 %v5391_v13 }
 0x5a6   :  { %5147 = vmatpush3.msra.mxu1 %v3660_v62  ;;  %v3745_v62 = vld [vmem:[%s7810_s6 + $0xd0] sm:$0xff] }
 0x5a7   :  { %5148 = vmatprep.subr.mxu1 %v5391_v13 }
 0x5a8   :  { %v2567_v20 = vpop.f32.mrf.mxu1  ;;  %5149 = vmatpush3.msra.mxu1 %v3659_v4  ;;  %v3850_v4 = vld [vmem:[%s7810_s6 + $0x1c0] sm:$0xff] }
 0x5a9   :  { %5150 = vmatprep.subr.mxu1 %v5391_v13 }
 0x5aa   :  { %v4882_v55 = vpop.f32.mrf.mxu1  ;;  %5151 = vmatpush3.msra.mxu1 %v3658_v19  ;;  %v3849_v19 = vld [vmem:[%s7810_s6 + $0x1b8] sm:$0xff] }
 0x5ab   :  { %5152 = vmatprep.subr.mxu1 %v5391_v13 }
 0x5ac   :  { %5153 = vmatpush3.msra.mxu1 %v3657_v61  ;;  %v3848_v61 = vld [vmem:[%s7810_s6 + $0x1b0] sm:$0xff] }
 0x5ad   :  { %5154 = vmatprep.subr.mxu1 %v5391_v13 }
 0x5ae   :  { %5155 = vmatpush3.msra.mxu1 %v3656_v31  ;;  %v3847_v31 = vld [vmem:[%s7810_s6 + $0x1a8] sm:$0xff] }
 0x5af   :  { %5156 = vmatprep.subr.mxu1 %v5391_v13 }
 0x5b2   :  { %v2167_v15 = vpop.f32.mrf.mxu0 }
 0x5b3   :  { %v2241_v0 = vadd.f32 %v7336_v42, %v2167_v15 }
 0x5b4   :  { %v4787_v30 = vpop.f32.mrf.mxu0 }
 0x5b5   :  { %v2571_v53 = vadd.f32 %v2567_v20, %v2241_v0 }
 0x5ba   :  { %v2731_v54 = vpop.f32.mrf.mxu1 }
 0x5bb   :  { %v2735_v5 = vadd.f32 %v2731_v54, %v2407_v56 }
 0x5bc   :  { %v4920_v51 = vpop.f32.mrf.mxu1 }
 0x5c4   :  { %v2321_v1 = vpop.f32.mrf.mxu0 }
 0x5c5   :  { %v7559_v42 = vadd.f32 %v2321_v1, %v1779_v33  ;;  %v3968_v33 = vld [vmem:[%s7809_s5 + $0x600] ss:$0 sm:$0xff] }
 0x5c6   :  { %v4825_v6 = vpop.f32.mrf.mxu0 }
 0x5c7   :  { %v3655_v6 = vld [vmem:[%s7810_s6 + $0x58] sm:$0xff] }
 0x5c8   :  { %5157 = vmatpush3.msra.mxu1 %v3655_v6 }
 0x5c9   :  { %5158 = vmatprep.subr.mxu1 %v5391_v13 }
 0x5ca   :  { %5159 = vmatpush3.msra.mxu1 %v3654_v58 }
 0x5cb   :  { %5160 = vmatprep.subr.mxu1 %v5391_v13 }
 0x5cc   :  { %v2895_v29 = vpop.f32.mrf.mxu1  ;;  %5161 = vmatpush3.msra.mxu1 %v3653_v17 }
 0x5cd   :  { %v7569_v3 = vadd.f32 %v2895_v29, %v2571_v53  ;;  %v3760_v29 = vld [vmem:[%s7810_s6 + $0x148] sm:$0xff]  ;;  %5200 = vmatprep.subr.mxu1 %v5391_v13 }
 0x5ce   :  { %v4958_v63 = vpop.f32.mrf.mxu1 }
 0x5cf   :  { %v3757_v63 = vld [vmem:[%s7810_s6 + $0x130] sm:$0xff] }
 0x5d6   :  { %v2485_v41 = vpop.f32.mrf.mxu0 }
 0x5d7   :  { %v2489_v18 = vadd.f32 %v2485_v41, %v2087_v44  ;;  %v3749_v44 = vld [vmem:[%s7810_s6 + $0xf0] sm:$0xff]  ;;  %v3748_v41 = vld [vmem:[%s7810_s6 + $0xe8] sm:$0xff] }
 0x5d8   :  { %v4863_v52 = vpop.f32.mrf.mxu0 }
 0x5de   :  { %v3059_v49 = vpop.f32.mrf.mxu1 }
 0x5df   :  { %v3063_v40 = vadd.f32 %v3059_v49, %v2735_v5  ;;  %v3746_v49 = vld [vmem:[%s7810_s6 + $0xd8] sm:$0xff] }
 0x5e0   :  { %v4996_v9 = vpop.f32.mrf.mxu1 }
 0x5e1   :  { %v3851_v9 = vld [vmem:[%s7810_s6 + $0x1c8] sm:$0xff] }
 0x5e7   :  { %v2649_v22 = vpop.f32.mrf.mxu0 }
 0x5e8   :  { %v2653_v2 = vadd.f32 %v2649_v22, %v7559_v42  ;;  %v3846_v22 = vld [vmem:[%s7810_s6 + $0x1a0] sm:$0xff] }
 0x5e9   :  { %v4901_v14 = vpop.f32.mrf.mxu0 }
 0x5ea   :  { %v3844_v14 = vld [vmem:[%s7810_s6 + $0x190] sm:$0xff] }
 0x5f7   :  { %v2813_v32 = vpop.f32.mrf.mxu0 }
 0x5f8   :  { %v2817_v28 = vadd.f32 %v2813_v32, %v2489_v18  ;;  %v3843_v32 = vld [vmem:[%s7810_s6 + $0x188] sm:$0xff] }
 0x5f9   :  { %v4939_v35 = vpop.f32.mrf.mxu0 }
 0x5fa   :  { %v3841_v35 = vld [vmem:[%s7810_s6 + $0x178] sm:$0xff] }
 0x607   :  { %v2977_v48 = vpop.f32.mrf.mxu0 }
 0x608   :  { %v2981_v57 = vadd.f32 %v2977_v48, %v2653_v2  ;;  %v3845_v2 = vld [vmem:[%s7810_s6 + $0x198] sm:$0xff]  ;;  %v3840_v48 = vld [vmem:[%s7810_s6 + $0x170] sm:$0xff] }
 0x609   :  { %v4977_v38 = vpop.f32.mrf.mxu0 }
 0x60a   :  { %v3971_v38 = vld [vmem:[%s7810_s6 + $0xc8] ss:$0 sm:$0xff] }
 0x621   :  { %v3223_v16 = vpop.f32.mrf.mxu1 }
 0x622   :  { %v3227_v53 = vadd.f32 %v3223_v16, %v7569_v3  ;;  %v3759_v3 = vld [vmem:[%s7810_s6 + $0x140] sm:$0xff] }
 0x623   :  { %v3141_v21 = vpop.f32.mrf.mxu0  ;;  %v5034_v50 = vpop.f32.mrf.mxu1 }
 0x624   :  { %v3145_v15 = vadd.f32 %v3141_v21, %v2817_v28  ;;  %v3842_v28 = vld [vmem:[%s7810_s6 + $0x180] sm:$0xff] }
 0x625   :  { %v5015_v34 = vpop.f32.mrf.mxu0 }
 0x631   :  { %v3387_v7 = vpop.f32.mrf.mxu1 }
 0x632   :  { %v3391_v25 = vadd.f32 %v3387_v7, %v3063_v40  ;;  %v3852_v40 = vld [vmem:[%s7810_s6 + $0x1d0] sm:$0xff]  ;;  %v3839_v7 = vld [vmem:[%s7810_s6 + $0x168] sm:$0xff] }
 0x633   :  { %v5072_v24 = vpop.f32.mrf.mxu1 }
 0x634   :  { %v3305_v56 = vpop.f32.mrf.mxu0  ;;  %v3837_v24 = vld [vmem:[%s7810_s6 + $0x158] sm:$0xff] }
 0x635   :  { %v3309_v23 = vadd.f32 %v3305_v56, %v2981_v57  ;;  %v3838_v57 = vld [vmem:[%s7810_s6 + $0x160] sm:$0xff]  ;;  %v3972_v56 = vld [vmem:[%s7810_s6 + $0x150] ss:$0 sm:$0xff] }
 0x636   :  { %v5053_v60 = vpop.f32.mrf.mxu0 }
 0x637   :  { %v3557_v20 = vadd.f32 %v3391_v25, %v3309_v23 }
 0x643   :  { %v3551_v55 = vpop.f32.mrf.mxu1 }
 0x644   :  { %v3555_v5 = vadd.f32 %v3551_v55, %v3227_v53  ;;  %v3973_v55 = vld [vmem:[%s7810_s6 + $0x1d8] ss:$0 sm:$0xff] }
 0x645   :  { %v3469_v0 = vpop.f32.mrf.mxu0  ;;  %v5110_v30 = vpop.f32.mrf.mxu1 }
 0x646   :  { %v3473_v45 = vadd.f32 %v3469_v0, %v3145_v15 }
 0x647   :  { %v5091_v54 = vpop.f32.mrf.mxu0 }
 0x648   :  { %v3558_v51 = vadd.f32 %v3557_v20, %v3473_v45 }
 0x64a   :  { %v3559_v1 = vadd.f32 %v3558_v51, %v3555_v5 }
 0x64c   :  { %v3564_v11 = vadd.f32 %v3968_v33, %v3559_v1 }
 0x64e   :  { %v3565_v42 = vmax.f32 %v3564_v11, 0.0 }
 0x650   :  { %5128 = vmatmul.mubr.msk.f32.vlgmr.msra.gmra.mxu0 %vm508_vm0, %v3565_v42 }
 0x651   :  { %5197 = vmatprep.mubr.msk.f32.mxu0 %vm5392_vm1, %v5391_v13  ;;  %5166 = vmatpush3.msra.mxu0 %v3760_v29 }
 0x652   :  { %5167 = vmatprep.subr.mxu0 %v5391_v13 }
 0x653   :  { %5168 = vmatpush3.msra.mxu0 %v3759_v3 }
 0x654   :  { %5169 = vmatprep.subr.mxu0 %v5391_v13 }
 0x655   :  { %5170 = vmatpush3.msra.mxu0 %v3758_v27 }
 0x656   :  { %5171 = vmatprep.subr.mxu0 %v5391_v13 }
 0x657   :  { %5172 = vmatpush3.msra.mxu0 %v3757_v63 }
 0x658   :  { %5173 = vmatprep.subr.mxu0 %v5391_v13 }
 0x659   :  { %5174 = vmatpush3.msra.mxu0 %v3756_v10 }
 0x65a   :  { %5175 = vmatprep.subr.mxu0 %v5391_v13 }
 0x65b   :  { %5176 = vmatpush3.msra.mxu0 %v3755_v46 }
 0x65c   :  { %5177 = vmatprep.subr.mxu0 %v5391_v13 }
 0x65d   :  { %5178 = vmatpush3.msra.mxu0 %v3754_v26 }
 0x65e   :  { %5179 = vmatprep.subr.mxu0 %v5391_v13 }
 0x65f   :  { %5180 = vmatpush3.msra.mxu0 %v3753_v36 }
 0x660   :  { %5181 = vmatprep.subr.mxu0 %v5391_v13 }
 0x661   :  { %5182 = vmatpush3.msra.mxu0 %v3752_v39 }
 0x662   :  { %5183 = vmatprep.subr.mxu0 %v5391_v13 }
 0x663   :  { %5184 = vmatpush3.msra.mxu0 %v3751_v37 }
 0x664   :  { %5185 = vmatprep.subr.mxu0 %v5391_v13 }
 0x665   :  { %5186 = vmatpush3.msra.mxu0 %v3750_v8 }
 0x666   :  { %5187 = vmatprep.subr.mxu0 %v5391_v13 }
 0x667   :  { %5188 = vmatpush3.msra.mxu0 %v3749_v44 }
 0x668   :  { %5189 = vmatprep.subr.mxu0 %v5391_v13 }
 0x669   :  { %5190 = vmatpush3.msra.mxu0 %v3748_v41 }
 0x66a   :  { %5191 = vmatprep.subr.mxu0 %v5391_v13 }
 0x66b   :  { %5192 = vmatpush3.msra.mxu0 %v3747_v59 }
 0x66c   :  { %5193 = vmatprep.subr.mxu0 %v5391_v13 }
 0x66d   :  { %5194 = vmatpush3.msra.mxu0 %v3746_v49 }
 0x66e   :  { %5195 = vmatprep.subr.mxu0 %v5391_v13 }
 0x66f   :  { %5196 = vmatpush3.msra.mxu0 %v3745_v62 }
 0x710   :  { %v3648_v18 = vpop.f32.mrf.mxu0 }
 0x711   :  { %v3649_v52 = vadd.f32 %v3969_v43, %v3648_v18 }
 0x712   :  { %v5129_v12 = vpop.f32.mrf.mxu0 }
 0x713   :  { %v3652_v47 = vmax.f32 %v3649_v52, 0.0 }
 0x715   :  { %5163 = vmatmul.mubr.f32.vlgmr.msra.gmra.mxu1 %v3652_v47 }
 0x716   :  { %5232 = vmatprep.mubr.msk.f32.mxu1 %vm5392_vm1, %v5391_v13  ;;  %5201 = vmatpush3.msra.mxu1 %v3852_v40 }
 0x717   :  { %5202 = vmatprep.subr.mxu1 %v5391_v13 }
 0x718   :  { %5203 = vmatpush3.msra.mxu1 %v3851_v9 }
 0x719   :  { %5204 = vmatprep.subr.mxu1 %v5391_v13 }
 0x71a   :  { %5205 = vmatpush3.msra.mxu1 %v3850_v4 }
 0x71b   :  { %5206 = vmatprep.subr.mxu1 %v5391_v13 }
 0x71c   :  { %5207 = vmatpush3.msra.mxu1 %v3849_v19 }
 0x71d   :  { %5208 = vmatprep.subr.mxu1 %v5391_v13 }
 0x71e   :  { %5209 = vmatpush3.msra.mxu1 %v3848_v61 }
 0x71f   :  { %5210 = vmatprep.subr.mxu1 %v5391_v13 }
 0x720   :  { %5211 = vmatpush3.msra.mxu1 %v3847_v31 }
 0x721   :  { %5212 = vmatprep.subr.mxu1 %v5391_v13 }
 0x722   :  { %5213 = vmatpush3.msra.mxu1 %v3846_v22 }
 0x723   :  { %5214 = vmatprep.subr.mxu1 %v5391_v13 }
 0x724   :  { %5215 = vmatpush3.msra.mxu1 %v3845_v2 }
 0x725   :  { %5216 = vmatprep.subr.mxu1 %v5391_v13 }
 0x726   :  { %5217 = vmatpush3.msra.mxu1 %v3844_v14 }
 0x727   :  { %5218 = vmatprep.subr.mxu1 %v5391_v13 }
 0x728   :  { %5219 = vmatpush3.msra.mxu1 %v3843_v32 }
 0x729   :  { %5220 = vmatprep.subr.mxu1 %v5391_v13 }
 0x72a   :  { %5221 = vmatpush3.msra.mxu1 %v3842_v28 }
 0x72b   :  { %5222 = vmatprep.subr.mxu1 %v5391_v13 }
 0x72c   :  { %5223 = vmatpush3.msra.mxu1 %v3841_v35 }
 0x72d   :  { %5224 = vmatprep.subr.mxu1 %v5391_v13 }
 0x72e   :  { %5225 = vmatpush3.msra.mxu1 %v3840_v48 }
 0x72f   :  { %5226 = vmatprep.subr.mxu1 %v5391_v13 }
 0x730   :  { %5227 = vmatpush3.msra.mxu1 %v3839_v7 }
 0x731   :  { %5228 = vmatprep.subr.mxu1 %v5391_v13 }
 0x732   :  { %5229 = vmatpush3.msra.mxu1 %v3838_v57 }
 0x733   :  { %5230 = vmatprep.subr.mxu1 %v5391_v13 }
 0x734   :  { %5231 = vmatpush3.msra.mxu1 %v3837_v24 }
 0x7d5   :  { %v3740_v16 = vpop.f32.mrf.mxu1 }
 0x7d6   :  { %v3741_v21 = vadd.f32 %v3971_v38, %v3740_v16 }
 0x7d7   :  { %v5164_v50 = vpop.f32.mrf.mxu1 }
 0x7d8   :  { %v3744_v34 = vmax.f32 %v3741_v21, 0.0 }
 0x7da   :  { %5198 = vmatmul.mubr.f32.vlgmr.msra.gmra.mxu0 %v3744_v34 }
 0x89a   :  { %v3832_v25 = vpop.f32.mrf.mxu0 }
 0x89b   :  { %v3833_v23 = vadd.f32 %v3972_v56, %v3832_v25 }
 0x89c   :  { %v5199_v60 = vpop.f32.mrf.mxu0 }
 0x89d   :  { %v3836_v20 = vmax.f32 %v3833_v23, 0.0 }
 0x89f   :  { %5233 = vmatmul.mubr.f32.vlgmr.msra.gmra.mxu1 %v3836_v20 }
 0x95f   :  { %v3924_v15 = vpop.f32.mrf.mxu1 }
 0x960   :  { %v3925_v0 = vadd.f32 %v3973_v55, %v3924_v15 }
 0x961   :  { %v5234_v30 = vpop.f32.mrf.mxu1 }
 0x962   :  { %v3928_v53 = vmul.f32 0.5, %v3925_v0 }
 0x964   :  { %5386 = vtanh.f32 %v3928_v53 }
 0x971   :  { %v5387_v13 = vpop.eup %5386 }
 0x972   :  { %v3930_v45 = vadd.f32 1.0, %v5387_v13 }
 0x974   :  { %v3931_v54 = vmul.f32 0.5, %v3930_v45 }
 0x976   :  { %3933 = vst.msk [vmem:[%s7811_s7] sm:$0xff] %vm3932_vm2, %v3931_v54 }

</bundles_post_ra>
